<compile_context>
chip_gen: v5e
topology: v5e:2x2
jax: 0.10.0
libtpu: 0.0.40
codegen_flags: <defaults>
</compile_context>

<pallas_src>
import functools

import jax
import jax.numpy as jnp
from jax.experimental import pallas as pl
from jax.experimental.pallas import tpu as pltpu

EPS = 1e-5          # BatchNorm1d eps (PyTorch default)
BF16 = jnp.bfloat16
LANE = 128


def _round_up(v, m):
    return ((v + m - 1) // m) * m


def _dot(a, b):
    """MXU matmul with f32 accumulation."""
    return jnp.dot(a, b, preferred_element_type=jnp.float32)


def _bn_fold(v, gamma, beta, mask, inv_n, eps):
    """BatchNorm1d, training-mode (biased) batch stats.

    Padded rows are excluded from the statistics via the 0/1 row `mask`
    (valid-row outputs are exact), and the affine is folded into a single
    scale/shift pair to save two full-size VPU passes per call.
    """
    vm = v * mask
    mean = jnp.sum(vm, axis=0, keepdims=True) * inv_n
    mean_sq = jnp.sum(vm * vm, axis=0, keepdims=True) * inv_n
    var = jnp.maximum(mean_sq - mean * mean, 0.0)
    scale = gamma * jax.lax.rsqrt(var + eps)
    shift = beta - mean * scale
    return v * scale + shift


# ----------------------------------------------------------------------------
# Fused kernel: (seed pre-FC) -> gc_count GGCNConv layers -> pool -> post-FC
# ----------------------------------------------------------------------------
def _ggcn_edge_kernel(
        x0_ref, e0_ref,                        # pre-FC activations (layer-0 seed)
        ohs_ref, ohd_ref, ohsT_ref, ohb_ref,   # resident graph structure (bf16 0/1)
        nmask_ref, emask_ref,                  # resident row masks [R,1] f32
        w_ref, v_ref,                          # per-layer packed slabs
        pw_ref, pb_ref, ow_ref, ob_ref,        # post-FC / output head params
        out_ref,
        x_cur, e_cur,                          # VMEM carries across the layer axis
        *, dp, inv_n_nodes, inv_n_edges, eps_gate, seed_via_dma):
    layer = pl.program_id(0)
    n_layers = pl.num_programs(0)

    # ---- layer 0: seed carried activations with the pre-FC outputs.
    @pl.when(layer == 0)
    def _seed():
        if seed_via_dma:
            # x0/e0 live in HBM (pl.ANY): one DMA, never resident across layers.
            pltpu.sync_copy(x0_ref, x_cur)
            pltpu.sync_copy(e0_ref, e_cur)
        else:
            # fallback path: x0/e0 are ordinary resident VMEM blocks.
            x_cur[...] = x0_ref[...]
            e_cur[...] = e0_ref[...]

    x = x_cur[...]                     # [Np, Dp] f32  (out_x entering this layer)
    e = e_cur[...]                     # [Ep, Dp] f32  (out_e entering this layer)
    x_bf = x.astype(BF16)
    e_bf = e.astype(BF16)
    nmask = nmask_ref[...]
    emask = emask_ref[...]

    # destination gather x[edge_index[1]] as an exact one-hot matmul (MXU)
    x_dst = _dot(ohd_ref[...], x_bf)            # [Ep, Dp]  (values bf16-exact)
    x_dst_bf = x_dst.astype(BF16)

    # gate pre-activation; 1/sqrt(dim) is already folded into w_ref / bias row 0.
    # slot-1 term re-associated: (ohs @ x) @ Wg1 == ohs @ (x @ Wg1)  (no x_src).
    t1 = _dot(x_bf, w_ref[0:dp, :])             # [Np, Dp]
    m = (_dot(ohs_ref[...], t1.astype(BF16))
         + _dot(x_dst_bf, w_ref[dp:2 * dp, :])
         + _dot(e_bf, w_ref[2 * dp:3 * dp, :])
         + v_ref[0:1, :])                       # [Ep, Dp]
    sigma = 1.0 / (1.0 + jnp.exp(-m))           # exact sigmoid(m_ref / sqrt(dim))

    src = _dot(x_bf, w_ref[3 * dp:4 * dp, :]) + v_ref[1:2, :]        # [Np, Dp]
    dst = _dot(x_dst_bf, w_ref[4 * dp:5 * dp, :]) + v_ref[2:3, :]    # [Ep, Dp]

    # scatter-sum of sigma*dst onto edge_index[0]: precomputed [Np, Ep] one-hot
    # transpose avoids any per-layer XLU transpose of the [Ep, Np] matrix.
    agg = _dot(ohsT_ref[...], (sigma * dst).astype(BF16))            # [Np, Dp]
    h = src + agg

    # GGCNConv-internal BN (+relu), then outer bn_list_nodes / bn_list_edges.
    # eps_gate = EPS/dim exactly compensates the folded 1/sqrt(dim) gate scale.
    hn = jnp.maximum(_bn_fold(h, v_ref[3:4, :], v_ref[4:5, :],
                              nmask, inv_n_nodes, EPS), 0.0)
    me = jnp.maximum(_bn_fold(m, v_ref[5:6, :], v_ref[6:7, :],
                              emask, inv_n_edges, eps_gate), 0.0)
    hn = _bn_fold(hn, v_ref[7:8, :], v_ref[8:9, :], nmask, inv_n_nodes, EPS)
    me = _bn_fold(me, v_ref[9:10, :], v_ref[10:11, :], emask, inv_n_edges, EPS)

    # residual add with previous layer output (dropout p=0.0 -> identity)
    new_x = hn + x
    new_e = me + e
    x_cur[...] = new_x
    e_cur[...] = new_e

    # ---- last layer: global_add_pool + post FC (relu) + output head
    @pl.when(layer == n_layers - 1)
    def _final():
        pooled = _dot(ohb_ref[...], new_x.astype(BF16))              # [B, Dp]
        hid = jnp.maximum(_dot(pooled.astype(BF16), pw_ref[...]) + pb_ref[...], 0.0)
        out_ref[...] = _dot(hid.astype(BF16), ow_ref[...]) + ob_ref[...]


# ----------------------------------------------------------------------------
# Wrapper
# ----------------------------------------------------------------------------
def _vmem_limit_bytes():
    """Generation-aware scoped-VMEM budget (<=3/4 of physical, cap 100 MiB)."""
    try:
        cap = int(pltpu.get_tpu_info().vmem_capacity_bytes)
    except Exception:
        cap = 64 * 1024 * 1024
    return min(cap * 3 // 4, 100 * 1024 * 1024)


def ggcn_edge_forward(params, x, edge_attr, edge_index, batch, num_graphs):
    convs = params["convs"]
    n_layers = len(convs)
    assert n_layers > 0, "Need at least one GGCN layer"

    n_nodes = x.shape[0]
    n_edges = edge_attr.shape[0]
    dim1 = params["pre_n_w"].shape[1]
    dim2 = params["post_w"].shape[1]
    out_dim = params["out_w"].shape[1]

    # lane-dense padded sizes (exact semantics preserved, see kernel comments)
    dp = _round_up(dim1, LANE)
    d2p = _round_up(dim2, LANE)
    outp = _round_up(out_dim, LANE)
    np_ = _round_up(n_nodes, LANE)      # lane axis of the [E, N] one-hots
    ep = _round_up(n_edges, 16)         # bf16 sublane granule

    def pad2(a, r, c):
        return jnp.pad(a, ((0, r - a.shape[0]), (0, c - a.shape[1])))

    # ---- pre-FC (node & edge) as tiny XLA f32 matmuls, padded to kernel layout
    x0 = jnp.maximum(x @ params["pre_n_w"] + params["pre_n_b"], 0.0)
    e0 = jnp.maximum(edge_attr @ params["pre_e_w"] + params["pre_e_b"], 0.0)
    x0 = pad2(x0, np_, dp).astype(jnp.float32)          # [Np, Dp]
    e0 = pad2(e0, ep, dp).astype(jnp.float32)           # [Ep, Dp]

    # ---- graph structure as exact 0/1 bf16 matrices (VMEM-resident, DMA'd once)
    oh_src = jnp.pad(jax.nn.one_hot(edge_index[0], np_, dtype=BF16),
                     ((0, ep - n_edges), (0, 0)))        # [Ep, Np]
    oh_dst = jnp.pad(jax.nn.one_hot(edge_index[1], np_, dtype=BF16),
                     ((0, ep - n_edges), (0, 0)))        # [Ep, Np]
    oh_srcT = oh_src.T                                   # [Np, Ep] (no in-kernel transpose)
    oh_batch = jnp.pad(jax.nn.one_hot(batch, num_graphs, dtype=BF16).T,
                       ((0, 0), (0, np_ - n_nodes)))     # [B, Np]

    # row masks: padded rows are excluded from BatchNorm statistics
    node_mask = (jnp.arange(np_) < n_nodes).astype(jnp.float32)[:, None]   # [Np,1]
    edge_mask = (jnp.arange(ep) < n_edges).astype(jnp.float32)[:, None]    # [Ep,1]

    # ---- per-layer params packed into 2 slabs (2 streamed DMAs per layer)
    inv_sqrt_d = 1.0 / (float(dim1) ** 0.5)
    w_layers, v_layers = [], []
    for c in convs:
        wg = c["wg"] * inv_sqrt_d        # fold the gate 1/sqrt(dim) scale into W
        blocks = [pad2(wg[0:dim1], dp, dp),
                  pad2(wg[dim1:2 * dim1], dp, dp),
                  pad2(wg[2 * dim1:3 * dim1], dp, dp),
                  pad2(c["ws"], dp, dp),
                  pad2(c["wd"], dp, dp)]
        w_layers.append(jnp.concatenate(blocks, axis=0).astype(BF16))       # [5Dp, Dp]
        vecs = [c["bg"] * inv_sqrt_d, c["bs"], c["bd"],
                c["g_node"], c["b_node"], c["g_edge"], c["b_edge"],
                c["g_node2"], c["b_node2"], c["g_edge2"], c["b_edge2"]]
        v_layers.append(jnp.concatenate([pad2(r, 1, dp) for r in vecs],
                                        axis=0).astype(jnp.float32))        # [11, Dp]
    w_slab = jnp.stack(w_layers, axis=0)     # [L, 5Dp, Dp] bf16
    v_slab = jnp.stack(v_layers, axis=0)     # [L, 11, Dp]  f32

    # ---- post-FC / output head params (small; resident)
    pw = pad2(params["post_w"], dp, d2p).astype(BF16)
    pb = pad2(params["post_b"], 1, d2p).astype(jnp.float32)
    ow = pad2(params["out_w"], d2p, outp).astype(BF16)
    ob = pad2(params["out_b"], 1, outp).astype(jnp.float32)

    args = (x0, e0, oh_src, oh_dst, oh_srcT, oh_batch, node_mask, edge_mask,
            w_slab, v_slab, pw, pb, ow, ob)

    def run(optimized):
        kw = {"pipeline_mode": pl.Buffered(1)} if optimized else {}

        def resident(a):
            nd = a.ndim
            return pl.BlockSpec(a.shape, lambda *_: (0,) * nd, **kw)

        def per_layer(a):
            tail = tuple(a.shape[1:])
            return pl.BlockSpec((None,) + tail, lambda l: (l,) + (0,) * len(tail))

        if optimized:
            x0_spec = pl.BlockSpec(memory_space=pl.ANY)   # layer-0-only: keep in HBM
            e0_spec = pl.BlockSpec(memory_space=pl.ANY)
        else:
            x0_spec = resident(x0)
            e0_spec = resident(e0)

        in_specs = [x0_spec, e0_spec,
                    resident(oh_src), resident(oh_dst),
                    resident(oh_srcT), resident(oh_batch),
                    resident(node_mask), resident(edge_mask),
                    per_layer(w_slab), per_layer(v_slab),
                    resident(pw), resident(pb), resident(ow), resident(ob)]

        grid_spec = pltpu.PrefetchScalarGridSpec(
            num_scalar_prefetch=0,
            grid=(n_layers,),
            in_specs=in_specs,
            out_specs=pl.BlockSpec((num_graphs, outp), lambda l: (0, 0)),
            scratch_shapes=[
                pltpu.VMEM((np_, dp), jnp.float32),   # carried node activations
                pltpu.VMEM((ep, dp), jnp.float32),    # carried edge activations
            ],
        )

        kern = functools.partial(
            _ggcn_edge_kernel,
            dp=dp,
            inv_n_nodes=1.0 / float(n_nodes),
            inv_n_edges=1.0 / float(n_edges),
            eps_gate=EPS / float(dim1),
            seed_via_dma=optimized,
        )

        out = pl.pallas_call(
            kern,
            out_shape=jax.ShapeDtypeStruct((num_graphs, outp), jnp.float32),
            grid_spec=grid_spec,
            compiler_params=pltpu.CompilerParams(
                dimension_semantics=("arbitrary",),     # layer axis is sequential
                vmem_limit_bytes=_vmem_limit_bytes(),
            ),
        )(*args)
        return jax.block_until_ready(out)

    try:
        out_padded = run(True)
    except Exception:
        # conservative fallback (no single-buffering / no pl.ANY seed DMA)
        out_padded = run(False)

    return out_padded[:, :out_dim]


# ----------------------------------------------------------------------------
# Parameter construction (deterministic, PyTorch-Linear-style init)
# ----------------------------------------------------------------------------
def _lin_params(key, fan_in, fan_out):
    k1, k2 = jax.random.split(key)
    bound = 1.0 / (fan_in ** 0.5)
    w = jax.random.uniform(k1, (fan_in, fan_out), jnp.float32, -bound, bound)
    b = jax.random.uniform(k2, (1, fan_out), jnp.float32, -bound, bound)
    return w, b


def init_params(key, num_features, num_edge_features, dim1, dim2, gc_count, output_dim):
    keys = jax.random.split(key, 8 + 3 * gc_count)
    ki = iter(keys)
    p = {}
    p["pre_n_w"], p["pre_n_b"] = _lin_params(next(ki), num_features, dim1)
    p["pre_e_w"], p["pre_e_b"] = _lin_params(next(ki), num_edge_features, dim1)
    convs = []
    for _ in range(gc_count):
        wg, bg = _lin_params(next(ki), 3 * dim1, dim1)
        ws, bs = _lin_params(next(ki), dim1, dim1)
        wd, bd = _lin_params(next(ki), dim1, dim1)
        ones = jnp.ones((1, dim1), jnp.float32)
        zeros = jnp.zeros((1, dim1), jnp.float32)
        convs.append(dict(
            wg=wg, bg=bg, ws=ws, bs=bs, wd=wd, bd=bd,
            g_node=ones, b_node=zeros, g_edge=ones, b_edge=zeros,      # GGCNConv BNs
            g_node2=ones, b_node2=zeros, g_edge2=ones, b_edge2=zeros,  # outer BN lists
        ))
    p["convs"] = convs
    p["post_w"], p["post_b"] = _lin_params(next(ki), dim1, dim2)
    p["out_w"], p["out_b"] = _lin_params(next(ki), dim2, output_dim)
    return p


if __name__ == "__main__":
    # small, self-consistent synthetic graph batch
    NUM_FEATURES = 8
    NUM_EDGE_FEATURES = 4
    DIM1 = 32
    DIM2 = 64
    GC_COUNT = 5
    OUTPUT_DIM = 1
    N_NODES = 16
    N_EDGES = 32
    N_GRAPHS = 2

    key = jax.random.PRNGKey(0)
    k_par, k_x, k_e, k_src, k_dst = jax.random.split(key, 5)

    params = init_params(k_par, NUM_FEATURES, NUM_EDGE_FEATURES,
                         DIM1, DIM2, GC_COUNT, OUTPUT_DIM)

    x = jax.random.normal(k_x, (N_NODES, NUM_FEATURES), jnp.float32)
    edge_attr = jax.random.normal(k_e, (N_EDGES, NUM_EDGE_FEATURES), jnp.float32)
    edge_index = jnp.stack([
        jax.random.randint(k_src, (N_EDGES,), 0, N_NODES),
        jax.random.randint(k_dst, (N_EDGES,), 0, N_NODES),
    ], axis=0)
    # first half of the nodes belong to graph 0, second half to graph 1
    batch = jnp.concatenate([
        jnp.zeros((N_NODES // 2,), jnp.int32),
        jnp.ones((N_NODES - N_NODES // 2,), jnp.int32),
    ])

    out = ggcn_edge_forward(params, x, edge_attr, edge_index, batch, N_GRAPHS)
    out = jax.block_until_ready(out)
    assert out.shape == (N_GRAPHS, OUTPUT_DIM)
    assert bool(jnp.all(jnp.isfinite(out)))
    print("KERNEL_OK")
</pallas_src>

<mosaic_0001>
module attributes {stable_mosaic.version = 11 : i64} {
  func.func @_ggcn_edge_kernel(%arg0: i32, %arg1: memref<128x128xf32, #tpu.memory_space<any>>, %arg2: memref<32x128xf32, #tpu.memory_space<any>>, %arg3: memref<32x128xbf16, #tpu.memory_space<vmem>>, %arg4: memref<32x128xbf16, #tpu.memory_space<vmem>>, %arg5: memref<128x32xbf16, #tpu.memory_space<vmem>>, %arg6: memref<2x128xbf16, #tpu.memory_space<vmem>>, %arg7: memref<128x1xf32, #tpu.memory_space<vmem>>, %arg8: memref<32x1xf32, #tpu.memory_space<vmem>>, %arg9: memref<1x640x128xbf16, #tpu.memory_space<vmem>>, %arg10: memref<1x11x128xf32, #tpu.memory_space<vmem>>, %arg11: memref<128x128xbf16, #tpu.memory_space<vmem>>, %arg12: memref<1x128xf32, #tpu.memory_space<vmem>>, %arg13: memref<128x128xbf16, #tpu.memory_space<vmem>>, %arg14: memref<1x128xf32, #tpu.memory_space<vmem>>, %arg15: memref<2x128xf32, #tpu.memory_space<vmem>>, %arg16: memref<128x128xf32, #tpu.memory_space<vmem>>, %arg17: memref<32x128xf32, #tpu.memory_space<vmem>>) attributes {dimension_semantics = [#tpu.dimension_semantics<arbitrary>], iteration_bounds = array<i64: 5>, scalar_prefetch = 0 : i64, scratch_operands = 2 : i64, tpu.core_type = #tpu.core_type<tc>, window_params = [{}, {}, {pipeline_mode = #tpu.pipeline_mode<synchronous>, transform_indices = @transform_2, window_bounds = array<i64: 32, 128>}, {pipeline_mode = #tpu.pipeline_mode<synchronous>, transform_indices = @transform_3, window_bounds = array<i64: 32, 128>}, {pipeline_mode = #tpu.pipeline_mode<synchronous>, transform_indices = @transform_4, window_bounds = array<i64: 128, 32>}, {pipeline_mode = #tpu.pipeline_mode<synchronous>, transform_indices = @transform_5, window_bounds = array<i64: 2, 128>}, {pipeline_mode = #tpu.pipeline_mode<synchronous>, transform_indices = @transform_6, window_bounds = array<i64: 128, 1>}, {pipeline_mode = #tpu.pipeline_mode<synchronous>, transform_indices = @transform_7, window_bounds = array<i64: 32, 1>}, {transform_indices = @transform_8, window_bounds = array<i64: 1, 640, 128>}, {transform_indices = @transform_9, window_bounds = array<i64: 1, 11, 128>}, {pipeline_mode = #tpu.pipeline_mode<synchronous>, transform_indices = @transform_10, window_bounds = array<i64: 128, 128>}, {pipeline_mode = #tpu.pipeline_mode<synchronous>, transform_indices = @transform_11, window_bounds = array<i64: 1, 128>}, {pipeline_mode = #tpu.pipeline_mode<synchronous>, transform_indices = @transform_12, window_bounds = array<i64: 128, 128>}, {pipeline_mode = #tpu.pipeline_mode<synchronous>, transform_indices = @transform_13, window_bounds = array<i64: 1, 128>}, {pipeline_mode = #tpu.pipeline_mode<synchronous>, transform_indices = @transform_14, window_bounds = array<i64: 2, 128>}]} {
    %c0_i32 = arith.constant 0 : i32
    %0 = arith.cmpi eq, %arg0, %c0_i32 : i32
    %1 = arith.extui %0 : i1 to i32
    %c0_i32_0 = arith.constant 0 : i32
    %2 = arith.cmpi ne, %1, %c0_i32_0 : i32
    scf.if %2 {
      "tpu.region"() ({
        %183 = tpu.sem_alloc : memref<!tpu.dma_semaphore, #tpu.memory_space<semaphore_mem>>
        tpu.enqueue_dma source(%arg1 : memref<128x128xf32, #tpu.memory_space<any>>) target(%arg16 : memref<128x128xf32, #tpu.memory_space<vmem>>) target_semaphore(%183 : memref<!tpu.dma_semaphore, #tpu.memory_space<semaphore_mem>>)
        tpu.wait_dma2 semaphore(%183 : memref<!tpu.dma_semaphore, #tpu.memory_space<semaphore_mem>>) src(%arg1 : memref<128x128xf32, #tpu.memory_space<any>>) dst(%arg16 : memref<128x128xf32, #tpu.memory_space<vmem>>)
        tpu.yield
      }) : () -> ()
      "tpu.region"() ({
        %183 = tpu.sem_alloc : memref<!tpu.dma_semaphore, #tpu.memory_space<semaphore_mem>>
        tpu.enqueue_dma source(%arg2 : memref<32x128xf32, #tpu.memory_space<any>>) target(%arg17 : memref<32x128xf32, #tpu.memory_space<vmem>>) target_semaphore(%183 : memref<!tpu.dma_semaphore, #tpu.memory_space<semaphore_mem>>)
        tpu.wait_dma2 semaphore(%183 : memref<!tpu.dma_semaphore, #tpu.memory_space<semaphore_mem>>) src(%arg2 : memref<32x128xf32, #tpu.memory_space<any>>) dst(%arg17 : memref<32x128xf32, #tpu.memory_space<vmem>>)
        tpu.yield
      }) : () -> ()
    } else {
    }
    %c0 = arith.constant 0 : index
    %c0_1 = arith.constant 0 : index
    %3 = vector.load %arg16[%c0, %c0_1] : memref<128x128xf32, #tpu.memory_space<vmem>>, vector<128x128xf32>
    %c0_2 = arith.constant 0 : index
    %c0_3 = arith.constant 0 : index
    %4 = vector.load %arg17[%c0_2, %c0_3] : memref<32x128xf32, #tpu.memory_space<vmem>>, vector<32x128xf32>
    %5 = arith.truncf %3 : vector<128x128xf32> to vector<128x128xbf16>
    %6 = arith.truncf %4 : vector<32x128xf32> to vector<32x128xbf16>
    %c0_4 = arith.constant 0 : index
    %c0_5 = arith.constant 0 : index
    %7 = vector.load %arg7[%c0_4, %c0_5] : memref<128x1xf32, #tpu.memory_space<vmem>>, vector<128x1xf32>
    %c0_6 = arith.constant 0 : index
    %c0_7 = arith.constant 0 : index
    %8 = vector.load %arg8[%c0_6, %c0_7] : memref<32x1xf32, #tpu.memory_space<vmem>>, vector<32x1xf32>
    %c0_8 = arith.constant 0 : index
    %c0_9 = arith.constant 0 : index
    %9 = vector.load %arg4[%c0_8, %c0_9] : memref<32x128xbf16, #tpu.memory_space<vmem>>, vector<32x128xbf16>
    %cst = arith.constant dense<0.000000e+00> : vector<32x128xf32>
    %10 = tpu.matmul %9, %5, %cst {dimension_numbers = #tpu.dot_dimension_numbers<[1], [0], [0], [1], [0, 0, 1, 1], [], []>} : vector<32x128xbf16>, vector<128x128xbf16>, vector<32x128xf32> -> vector<32x128xf32>
    %11 = arith.truncf %10 : vector<32x128xf32> to vector<32x128xbf16>
    %c0_10 = arith.constant 0 : index
    %c0_11 = arith.constant 0 : index
    %c0_12 = arith.constant 0 : index
    %12 = vector.load %arg9[%c0_10, %c0_11, %c0_12] : memref<1x640x128xbf16, #tpu.memory_space<vmem>>, vector<1x128x128xbf16>
    %13 = vector.shape_cast %12 : vector<1x128x128xbf16> to vector<128x128xbf16>
    %cst_13 = arith.constant dense<0.000000e+00> : vector<128x128xf32>
    %14 = tpu.matmul %5, %13, %cst_13 {dimension_numbers = #tpu.dot_dimension_numbers<[1], [0], [0], [1], [0, 0, 1, 1], [], []>} : vector<128x128xbf16>, vector<128x128xbf16>, vector<128x128xf32> -> vector<128x128xf32>
    %c0_14 = arith.constant 0 : index
    %c0_15 = arith.constant 0 : index
    %15 = vector.load %arg3[%c0_14, %c0_15] : memref<32x128xbf16, #tpu.memory_space<vmem>>, vector<32x128xbf16>
    %16 = arith.truncf %14 : vector<128x128xf32> to vector<128x128xbf16>
    %cst_16 = arith.constant dense<0.000000e+00> : vector<32x128xf32>
    %17 = tpu.matmul %15, %16, %cst_16 {dimension_numbers = #tpu.dot_dimension_numbers<[1], [0], [0], [1], [0, 0, 1, 1], [], []>} : vector<32x128xbf16>, vector<128x128xbf16>, vector<32x128xf32> -> vector<32x128xf32>
    %c0_17 = arith.constant 0 : index
    %c128 = arith.constant 128 : index
    %c0_18 = arith.constant 0 : index
    %18 = vector.load %arg9[%c0_17, %c128, %c0_18] : memref<1x640x128xbf16, #tpu.memory_space<vmem>>, vector<1x128x128xbf16>
    %19 = vector.shape_cast %18 : vector<1x128x128xbf16> to vector<128x128xbf16>
    %cst_19 = arith.constant dense<0.000000e+00> : vector<32x128xf32>
    %20 = tpu.matmul %11, %19, %cst_19 {dimension_numbers = #tpu.dot_dimension_numbers<[1], [0], [0], [1], [0, 0, 1, 1], [], []>} : vector<32x128xbf16>, vector<128x128xbf16>, vector<32x128xf32> -> vector<32x128xf32>
    %21 = arith.addf %17, %20 : vector<32x128xf32>
    %c0_20 = arith.constant 0 : index
    %c256 = arith.constant 256 : index
    %c0_21 = arith.constant 0 : index
    %22 = vector.load %arg9[%c0_20, %c256, %c0_21] : memref<1x640x128xbf16, #tpu.memory_space<vmem>>, vector<1x128x128xbf16>
    %23 = vector.shape_cast %22 : vector<1x128x128xbf16> to vector<128x128xbf16>
    %cst_22 = arith.constant dense<0.000000e+00> : vector<32x128xf32>
    %24 = tpu.matmul %6, %23, %cst_22 {dimension_numbers = #tpu.dot_dimension_numbers<[1], [0], [0], [1], [0, 0, 1, 1], [], []>} : vector<32x128xbf16>, vector<128x128xbf16>, vector<32x128xf32> -> vector<32x128xf32>
    %25 = arith.addf %21, %24 : vector<32x128xf32>
    %c0_23 = arith.constant 0 : index
    %c0_24 = arith.constant 0 : index
    %c0_25 = arith.constant 0 : index
    %26 = vector.load %arg10[%c0_23, %c0_24, %c0_25] : memref<1x11x128xf32, #tpu.memory_space<vmem>>, vector<1x1x128xf32>
    %27 = vector.shape_cast %26 : vector<1x1x128xf32> to vector<1x128xf32>
    %28 = vector.broadcast %27 : vector<1x128xf32> to vector<32x128xf32>
    %29 = arith.addf %25, %28 : vector<32x128xf32>
    %cst_26 = arith.constant 0.000000e+00 : f32
    %30 = vector.broadcast %cst_26 : f32 to vector<32x128xf32>
    %31 = arith.subf %30, %29 : vector<32x128xf32>
    %32 = math.exp %31 : vector<32x128xf32>
    %cst_27 = arith.constant 1.000000e+00 : f32
    %33 = vector.broadcast %cst_27 : f32 to vector<32x128xf32>
    %34 = arith.addf %33, %32 : vector<32x128xf32>
    %cst_28 = arith.constant 1.000000e+00 : f32
    %35 = vector.broadcast %cst_28 : f32 to vector<32x128xf32>
    %36 = arith.divf %35, %34 : vector<32x128xf32>
    %c0_29 = arith.constant 0 : index
    %c384 = arith.constant 384 : index
    %c0_30 = arith.constant 0 : index
    %37 = vector.load %arg9[%c0_29, %c384, %c0_30] : memref<1x640x128xbf16, #tpu.memory_space<vmem>>, vector<1x128x128xbf16>
    %38 = vector.shape_cast %37 : vector<1x128x128xbf16> to vector<128x128xbf16>
    %cst_31 = arith.constant dense<0.000000e+00> : vector<128x128xf32>
    %39 = tpu.matmul %5, %38, %cst_31 {dimension_numbers = #tpu.dot_dimension_numbers<[1], [0], [0], [1], [0, 0, 1, 1], [], []>} : vector<128x128xbf16>, vector<128x128xbf16>, vector<128x128xf32> -> vector<128x128xf32>
    %c0_32 = arith.constant 0 : index
    %c1 = arith.constant 1 : index
    %c0_33 = arith.constant 0 : index
    %40 = vector.load %arg10[%c0_32, %c1, %c0_33] : memref<1x11x128xf32, #tpu.memory_space<vmem>>, vector<1x1x128xf32>
    %41 = vector.shape_cast %40 : vector<1x1x128xf32> to vector<1x128xf32>
    %42 = vector.broadcast %41 : vector<1x128xf32> to vector<128x128xf32>
    %43 = arith.addf %39, %42 : vector<128x128xf32>
    %c0_34 = arith.constant 0 : index
    %c512 = arith.constant 512 : index
    %c0_35 = arith.constant 0 : index
    %44 = vector.load %arg9[%c0_34, %c512, %c0_35] : memref<1x640x128xbf16, #tpu.memory_space<vmem>>, vector<1x128x128xbf16>
    %45 = vector.shape_cast %44 : vector<1x128x128xbf16> to vector<128x128xbf16>
    %cst_36 = arith.constant dense<0.000000e+00> : vector<32x128xf32>
    %46 = tpu.matmul %11, %45, %cst_36 {dimension_numbers = #tpu.dot_dimension_numbers<[1], [0], [0], [1], [0, 0, 1, 1], [], []>} : vector<32x128xbf16>, vector<128x128xbf16>, vector<32x128xf32> -> vector<32x128xf32>
    %c0_37 = arith.constant 0 : index
    %c2 = arith.constant 2 : index
    %c0_38 = arith.constant 0 : index
    %47 = vector.load %arg10[%c0_37, %c2, %c0_38] : memref<1x11x128xf32, #tpu.memory_space<vmem>>, vector<1x1x128xf32>
    %48 = vector.shape_cast %47 : vector<1x1x128xf32> to vector<1x128xf32>
    %49 = vector.broadcast %48 : vector<1x128xf32> to vector<32x128xf32>
    %50 = arith.addf %46, %49 : vector<32x128xf32>
    %c0_39 = arith.constant 0 : index
    %c0_40 = arith.constant 0 : index
    %51 = vector.load %arg5[%c0_39, %c0_40] : memref<128x32xbf16, #tpu.memory_space<vmem>>, vector<128x32xbf16>
    %52 = arith.mulf %36, %50 : vector<32x128xf32>
    %53 = arith.truncf %52 : vector<32x128xf32> to vector<32x128xbf16>
    %cst_41 = arith.constant dense<0.000000e+00> : vector<128x128xf32>
    %54 = tpu.matmul %51, %53, %cst_41 {dimension_numbers = #tpu.dot_dimension_numbers<[1], [0], [0], [1], [0, 0, 1, 1], [], []>} : vector<128x32xbf16>, vector<32x128xbf16>, vector<128x128xf32> -> vector<128x128xf32>
    %55 = arith.addf %43, %54 : vector<128x128xf32>
    %c0_42 = arith.constant 0 : index
    %c3 = arith.constant 3 : index
    %c0_43 = arith.constant 0 : index
    %56 = vector.load %arg10[%c0_42, %c3, %c0_43] : memref<1x11x128xf32, #tpu.memory_space<vmem>>, vector<1x1x128xf32>
    %57 = vector.shape_cast %56 : vector<1x1x128xf32> to vector<1x128xf32>
    %c0_44 = arith.constant 0 : index
    %c4 = arith.constant 4 : index
    %c0_45 = arith.constant 0 : index
    %58 = vector.load %arg10[%c0_44, %c4, %c0_45] : memref<1x11x128xf32, #tpu.memory_space<vmem>>, vector<1x1x128xf32>
    %59 = vector.shape_cast %58 : vector<1x1x128xf32> to vector<1x128xf32>
    %60 = vector.broadcast %7 : vector<128x1xf32> to vector<128x128xf32>
    %61 = arith.mulf %55, %60 : vector<128x128xf32>
    %cst_46 = arith.constant dense<0.000000e+00> : vector<128xf32>
    %62 = vector.multi_reduction <add>, %61, %cst_46 [0] : vector<128x128xf32> to vector<128xf32>
    %63 = vector.shape_cast %62 : vector<128xf32> to vector<1x128xf32>
    %cst_47 = arith.constant 6.250000e-02 : f32
    %64 = vector.broadcast %cst_47 : f32 to vector<1x128xf32>
    %65 = arith.mulf %63, %64 : vector<1x128xf32>
    %66 = arith.mulf %61, %61 : vector<128x128xf32>
    %cst_48 = arith.constant dense<0.000000e+00> : vector<128xf32>
    %67 = vector.multi_reduction <add>, %66, %cst_48 [0] : vector<128x128xf32> to vector<128xf32>
    %68 = vector.shape_cast %67 : vector<128xf32> to vector<1x128xf32>
    %cst_49 = arith.constant 6.250000e-02 : f32
    %69 = vector.broadcast %cst_49 : f32 to vector<1x128xf32>
    %70 = arith.mulf %68, %69 : vector<1x128xf32>
    %71 = arith.mulf %65, %65 : vector<1x128xf32>
    %72 = arith.subf %70, %71 : vector<1x128xf32>
    %cst_50 = arith.constant 0.000000e+00 : f32
    %73 = vector.broadcast %cst_50 : f32 to vector<1x128xf32>
    %74 = arith.maximumf %72, %73 : vector<1x128xf32>
    %cst_51 = arith.constant 9.99999974E-6 : f32
    %75 = vector.broadcast %cst_51 : f32 to vector<1x128xf32>
    %76 = arith.addf %74, %75 : vector<1x128xf32>
    %77 = math.rsqrt %76 : vector<1x128xf32>
    %78 = arith.mulf %57, %77 : vector<1x128xf32>
    %79 = arith.mulf %65, %78 : vector<1x128xf32>
    %80 = arith.subf %59, %79 : vector<1x128xf32>
    %81 = vector.broadcast %78 : vector<1x128xf32> to vector<128x128xf32>
    %82 = arith.mulf %55, %81 : vector<128x128xf32>
    %83 = vector.broadcast %80 : vector<1x128xf32> to vector<128x128xf32>
    %84 = arith.addf %82, %83 : vector<128x128xf32>
    %cst_52 = arith.constant 0.000000e+00 : f32
    %85 = vector.broadcast %cst_52 : f32 to vector<128x128xf32>
    %86 = arith.maximumf %84, %85 : vector<128x128xf32>
    %c0_53 = arith.constant 0 : index
    %c5 = arith.constant 5 : index
    %c0_54 = arith.constant 0 : index
    %87 = vector.load %arg10[%c0_53, %c5, %c0_54] : memref<1x11x128xf32, #tpu.memory_space<vmem>>, vector<1x1x128xf32>
    %88 = vector.shape_cast %87 : vector<1x1x128xf32> to vector<1x128xf32>
    %c0_55 = arith.constant 0 : index
    %c6 = arith.constant 6 : index
    %c0_56 = arith.constant 0 : index
    %89 = vector.load %arg10[%c0_55, %c6, %c0_56] : memref<1x11x128xf32, #tpu.memory_space<vmem>>, vector<1x1x128xf32>
    %90 = vector.shape_cast %89 : vector<1x1x128xf32> to vector<1x128xf32>
    %91 = vector.broadcast %8 : vector<32x1xf32> to vector<32x128xf32>
    %92 = arith.mulf %29, %91 : vector<32x128xf32>
    %cst_57 = arith.constant dense<0.000000e+00> : vector<128xf32>
    %93 = vector.multi_reduction <add>, %92, %cst_57 [0] : vector<32x128xf32> to vector<128xf32>
    %94 = vector.shape_cast %93 : vector<128xf32> to vector<1x128xf32>
    %cst_58 = arith.constant 3.125000e-02 : f32
    %95 = vector.broadcast %cst_58 : f32 to vector<1x128xf32>
    %96 = arith.mulf %94, %95 : vector<1x128xf32>
    %97 = arith.mulf %92, %92 : vector<32x128xf32>
    %cst_59 = arith.constant dense<0.000000e+00> : vector<128xf32>
    %98 = vector.multi_reduction <add>, %97, %cst_59 [0] : vector<32x128xf32> to vector<128xf32>
    %99 = vector.shape_cast %98 : vector<128xf32> to vector<1x128xf32>
    %cst_60 = arith.constant 3.125000e-02 : f32
    %100 = vector.broadcast %cst_60 : f32 to vector<1x128xf32>
    %101 = arith.mulf %99, %100 : vector<1x128xf32>
    %102 = arith.mulf %96, %96 : vector<1x128xf32>
    %103 = arith.subf %101, %102 : vector<1x128xf32>
    %cst_61 = arith.constant 0.000000e+00 : f32
    %104 = vector.broadcast %cst_61 : f32 to vector<1x128xf32>
    %105 = arith.maximumf %103, %104 : vector<1x128xf32>
    %cst_62 = arith.constant 3.125000e-07 : f32
    %106 = vector.broadcast %cst_62 : f32 to vector<1x128xf32>
    %107 = arith.addf %105, %106 : vector<1x128xf32>
    %108 = math.rsqrt %107 : vector<1x128xf32>
    %109 = arith.mulf %88, %108 : vector<1x128xf32>
    %110 = arith.mulf %96, %109 : vector<1x128xf32>
    %111 = arith.subf %90, %110 : vector<1x128xf32>
    %112 = vector.broadcast %109 : vector<1x128xf32> to vector<32x128xf32>
    %113 = arith.mulf %29, %112 : vector<32x128xf32>
    %114 = vector.broadcast %111 : vector<1x128xf32> to vector<32x128xf32>
    %115 = arith.addf %113, %114 : vector<32x128xf32>
    %cst_63 = arith.constant 0.000000e+00 : f32
    %116 = vector.broadcast %cst_63 : f32 to vector<32x128xf32>
    %117 = arith.maximumf %115, %116 : vector<32x128xf32>
    %c0_64 = arith.constant 0 : index
    %c7 = arith.constant 7 : index
    %c0_65 = arith.constant 0 : index
    %118 = vector.load %arg10[%c0_64, %c7, %c0_65] : memref<1x11x128xf32, #tpu.memory_space<vmem>>, vector<1x1x128xf32>
    %119 = vector.shape_cast %118 : vector<1x1x128xf32> to vector<1x128xf32>
    %c0_66 = arith.constant 0 : index
    %c8 = arith.constant 8 : index
    %c0_67 = arith.constant 0 : index
    %120 = vector.load %arg10[%c0_66, %c8, %c0_67] : memref<1x11x128xf32, #tpu.memory_space<vmem>>, vector<1x1x128xf32>
    %121 = vector.shape_cast %120 : vector<1x1x128xf32> to vector<1x128xf32>
    %122 = vector.broadcast %7 : vector<128x1xf32> to vector<128x128xf32>
    %123 = arith.mulf %86, %122 : vector<128x128xf32>
    %cst_68 = arith.constant dense<0.000000e+00> : vector<128xf32>
    %124 = vector.multi_reduction <add>, %123, %cst_68 [0] : vector<128x128xf32> to vector<128xf32>
    %125 = vector.shape_cast %124 : vector<128xf32> to vector<1x128xf32>
    %cst_69 = arith.constant 6.250000e-02 : f32
    %126 = vector.broadcast %cst_69 : f32 to vector<1x128xf32>
    %127 = arith.mulf %125, %126 : vector<1x128xf32>
    %128 = arith.mulf %123, %123 : vector<128x128xf32>
    %cst_70 = arith.constant dense<0.000000e+00> : vector<128xf32>
    %129 = vector.multi_reduction <add>, %128, %cst_70 [0] : vector<128x128xf32> to vector<128xf32>
    %130 = vector.shape_cast %129 : vector<128xf32> to vector<1x128xf32>
    %cst_71 = arith.constant 6.250000e-02 : f32
    %131 = vector.broadcast %cst_71 : f32 to vector<1x128xf32>
    %132 = arith.mulf %130, %131 : vector<1x128xf32>
    %133 = arith.mulf %127, %127 : vector<1x128xf32>
    %134 = arith.subf %132, %133 : vector<1x128xf32>
    %cst_72 = arith.constant 0.000000e+00 : f32
    %135 = vector.broadcast %cst_72 : f32 to vector<1x128xf32>
    %136 = arith.maximumf %134, %135 : vector<1x128xf32>
    %cst_73 = arith.constant 9.99999974E-6 : f32
    %137 = vector.broadcast %cst_73 : f32 to vector<1x128xf32>
    %138 = arith.addf %136, %137 : vector<1x128xf32>
    %139 = math.rsqrt %138 : vector<1x128xf32>
    %140 = arith.mulf %119, %139 : vector<1x128xf32>
    %141 = arith.mulf %127, %140 : vector<1x128xf32>
    %142 = arith.subf %121, %141 : vector<1x128xf32>
    %143 = vector.broadcast %140 : vector<1x128xf32> to vector<128x128xf32>
    %144 = arith.mulf %86, %143 : vector<128x128xf32>
    %145 = vector.broadcast %142 : vector<1x128xf32> to vector<128x128xf32>
    %146 = arith.addf %144, %145 : vector<128x128xf32>
    %c0_74 = arith.constant 0 : index
    %c9 = arith.constant 9 : index
    %c0_75 = arith.constant 0 : index
    %147 = vector.load %arg10[%c0_74, %c9, %c0_75] : memref<1x11x128xf32, #tpu.memory_space<vmem>>, vector<1x1x128xf32>
    %148 = vector.shape_cast %147 : vector<1x1x128xf32> to vector<1x128xf32>
    %c0_76 = arith.constant 0 : index
    %c10 = arith.constant 10 : index
    %c0_77 = arith.constant 0 : index
    %149 = vector.load %arg10[%c0_76, %c10, %c0_77] : memref<1x11x128xf32, #tpu.memory_space<vmem>>, vector<1x1x128xf32>
    %150 = vector.shape_cast %149 : vector<1x1x128xf32> to vector<1x128xf32>
    %151 = vector.broadcast %8 : vector<32x1xf32> to vector<32x128xf32>
    %152 = arith.mulf %117, %151 : vector<32x128xf32>
    %cst_78 = arith.constant dense<0.000000e+00> : vector<128xf32>
    %153 = vector.multi_reduction <add>, %152, %cst_78 [0] : vector<32x128xf32> to vector<128xf32>
    %154 = vector.shape_cast %153 : vector<128xf32> to vector<1x128xf32>
    %cst_79 = arith.constant 3.125000e-02 : f32
    %155 = vector.broadcast %cst_79 : f32 to vector<1x128xf32>
    %156 = arith.mulf %154, %155 : vector<1x128xf32>
    %157 = arith.mulf %152, %152 : vector<32x128xf32>
    %cst_80 = arith.constant dense<0.000000e+00> : vector<128xf32>
    %158 = vector.multi_reduction <add>, %157, %cst_80 [0] : vector<32x128xf32> to vector<128xf32>
    %159 = vector.shape_cast %158 : vector<128xf32> to vector<1x128xf32>
    %cst_81 = arith.constant 3.125000e-02 : f32
    %160 = vector.broadcast %cst_81 : f32 to vector<1x128xf32>
    %161 = arith.mulf %159, %160 : vector<1x128xf32>
    %162 = arith.mulf %156, %156 : vector<1x128xf32>
    %163 = arith.subf %161, %162 : vector<1x128xf32>
    %cst_82 = arith.constant 0.000000e+00 : f32
    %164 = vector.broadcast %cst_82 : f32 to vector<1x128xf32>
    %165 = arith.maximumf %163, %164 : vector<1x128xf32>
    %cst_83 = arith.constant 9.99999974E-6 : f32
    %166 = vector.broadcast %cst_83 : f32 to vector<1x128xf32>
    %167 = arith.addf %165, %166 : vector<1x128xf32>
    %168 = math.rsqrt %167 : vector<1x128xf32>
    %169 = arith.mulf %148, %168 : vector<1x128xf32>
    %170 = arith.mulf %156, %169 : vector<1x128xf32>
    %171 = arith.subf %150, %170 : vector<1x128xf32>
    %172 = vector.broadcast %169 : vector<1x128xf32> to vector<32x128xf32>
    %173 = arith.mulf %117, %172 : vector<32x128xf32>
    %174 = vector.broadcast %171 : vector<1x128xf32> to vector<32x128xf32>
    %175 = arith.addf %173, %174 : vector<32x128xf32>
    %176 = arith.addf %146, %3 : vector<128x128xf32>
    %177 = arith.addf %175, %4 : vector<32x128xf32>
    %c0_84 = arith.constant 0 : index
    %c0_85 = arith.constant 0 : index
    %178 = vector.load %arg16[%c0_84, %c0_85] : memref<128x128xf32, #tpu.memory_space<vmem>>, vector<128x128xf32>
    tpu.vector_store %arg16[%c0_84, %c0_85], %176 {strides = array<i32>} : memref<128x128xf32, #tpu.memory_space<vmem>>, vector<128x128xf32>,
    %c0_86 = arith.constant 0 : index
    %c0_87 = arith.constant 0 : index
    %179 = vector.load %arg17[%c0_86, %c0_87] : memref<32x128xf32, #tpu.memory_space<vmem>>, vector<32x128xf32>
    tpu.vector_store %arg17[%c0_86, %c0_87], %177 {strides = array<i32>} : memref<32x128xf32, #tpu.memory_space<vmem>>, vector<32x128xf32>,
    %c4_i32 = arith.constant 4 : i32
    %180 = arith.cmpi eq, %arg0, %c4_i32 : i32
    %181 = arith.extui %180 : i1 to i32
    %c0_i32_88 = arith.constant 0 : i32
    %182 = arith.cmpi ne, %181, %c0_i32_88 : i32
    scf.if %182 {
      %c0_89 = arith.constant 0 : index
      %c0_90 = arith.constant 0 : index
      %183 = vector.load %arg6[%c0_89, %c0_90] : memref<2x128xbf16, #tpu.memory_space<vmem>>, vector<2x128xbf16>
      %184 = arith.truncf %176 : vector<128x128xf32> to vector<128x128xbf16>
      %cst_91 = arith.constant dense<0.000000e+00> : vector<2x128xf32>
      %185 = tpu.matmul %183, %184, %cst_91 {dimension_numbers = #tpu.dot_dimension_numbers<[1], [0], [0], [1], [0, 0, 1, 1], [], []>} : vector<2x128xbf16>, vector<128x128xbf16>, vector<2x128xf32> -> vector<2x128xf32>
      %186 = arith.truncf %185 : vector<2x128xf32> to vector<2x128xbf16>
      %c0_92 = arith.constant 0 : index
      %c0_93 = arith.constant 0 : index
      %187 = vector.load %arg11[%c0_92, %c0_93] : memref<128x128xbf16, #tpu.memory_space<vmem>>, vector<128x128xbf16>
      %cst_94 = arith.constant dense<0.000000e+00> : vector<2x128xf32>
      %188 = tpu.matmul %186, %187, %cst_94 {dimension_numbers = #tpu.dot_dimension_numbers<[1], [0], [0], [1], [0, 0, 1, 1], [], []>} : vector<2x128xbf16>, vector<128x128xbf16>, vector<2x128xf32> -> vector<2x128xf32>
      %c0_95 = arith.constant 0 : index
      %c0_96 = arith.constant 0 : index
      %189 = vector.load %arg12[%c0_95, %c0_96] : memref<1x128xf32, #tpu.memory_space<vmem>>, vector<1x128xf32>
      %190 = vector.broadcast %189 : vector<1x128xf32> to vector<2x128xf32>
      %191 = arith.addf %188, %190 : vector<2x128xf32>
      %cst_97 = arith.constant 0.000000e+00 : f32
      %192 = vector.broadcast %cst_97 : f32 to vector<2x128xf32>
      %193 = arith.maximumf %191, %192 : vector<2x128xf32>
      %194 = arith.truncf %193 : vector<2x128xf32> to vector<2x128xbf16>
      %c0_98 = arith.constant 0 : index
      %c0_99 = arith.constant 0 : index
      %195 = vector.load %arg13[%c0_98, %c0_99] : memref<128x128xbf16, #tpu.memory_space<vmem>>, vector<128x128xbf16>
      %cst_100 = arith.constant dense<0.000000e+00> : vector<2x128xf32>
      %196 = tpu.matmul %194, %195, %cst_100 {dimension_numbers = #tpu.dot_dimension_numbers<[1], [0], [0], [1], [0, 0, 1, 1], [], []>} : vector<2x128xbf16>, vector<128x128xbf16>, vector<2x128xf32> -> vector<2x128xf32>
      %c0_101 = arith.constant 0 : index
      %c0_102 = arith.constant 0 : index
      %197 = vector.load %arg14[%c0_101, %c0_102] : memref<1x128xf32, #tpu.memory_space<vmem>>, vector<1x128xf32>
      %198 = vector.broadcast %197 : vector<1x128xf32> to vector<2x128xf32>
      %199 = arith.addf %196, %198 : vector<2x128xf32>
      %c0_103 = arith.constant 0 : index
      %c0_104 = arith.constant 0 : index
      %200 = vector.load %arg15[%c0_103, %c0_104] : memref<2x128xf32, #tpu.memory_space<vmem>>, vector<2x128xf32>
      tpu.vector_store %arg15[%c0_103, %c0_104], %199 {strides = array<i32>} : memref<2x128xf32, #tpu.memory_space<vmem>>, vector<2x128xf32>,
    } else {
    }
    return
  }
  func.func @transform_2(%arg0: i32) -> (i32, i32) {
    %c0_i32 = arith.constant 0 : i32
    %c0_i32_0 = arith.constant 0 : i32
    %c0_i32_1 = arith.constant 0 : i32
    return %c0_i32, %c0_i32_0 : i32, i32
  }
  func.func @transform_3(%arg0: i32) -> (i32, i32) {
    %c0_i32 = arith.constant 0 : i32
    %c0_i32_0 = arith.constant 0 : i32
    %c0_i32_1 = arith.constant 0 : i32
    return %c0_i32, %c0_i32_0 : i32, i32
  }
  func.func @transform_4(%arg0: i32) -> (i32, i32) {
    %c0_i32 = arith.constant 0 : i32
    %c0_i32_0 = arith.constant 0 : i32
    %c0_i32_1 = arith.constant 0 : i32
    return %c0_i32, %c0_i32_0 : i32, i32
  }
  func.func @transform_5(%arg0: i32) -> (i32, i32) {
    %c0_i32 = arith.constant 0 : i32
    %c0_i32_0 = arith.constant 0 : i32
    %c0_i32_1 = arith.constant 0 : i32
    return %c0_i32, %c0_i32_0 : i32, i32
  }
  func.func @transform_6(%arg0: i32) -> (i32, i32) {
    %c0_i32 = arith.constant 0 : i32
    %c0_i32_0 = arith.constant 0 : i32
    %c0_i32_1 = arith.constant 0 : i32
    return %c0_i32, %c0_i32_0 : i32, i32
  }
  func.func @transform_7(%arg0: i32) -> (i32, i32) {
    %c0_i32 = arith.constant 0 : i32
    %c0_i32_0 = arith.constant 0 : i32
    %c0_i32_1 = arith.constant 0 : i32
    return %c0_i32, %c0_i32_0 : i32, i32
  }
  func.func @transform_8(%arg0: i32) -> (i32, i32, i32) {
    %c0_i32 = arith.constant 0 : i32
    %c0_i32_0 = arith.constant 0 : i32
    %c0_i32_1 = arith.constant 0 : i32
    return %arg0, %c0_i32, %c0_i32_0 : i32, i32, i32
  }
  func.func @transform_9(%arg0: i32) -> (i32, i32, i32) {
    %c0_i32 = arith.constant 0 : i32
    %c0_i32_0 = arith.constant 0 : i32
    %c0_i32_1 = arith.constant 0 : i32
    return %arg0, %c0_i32, %c0_i32_0 : i32, i32, i32
  }
  func.func @transform_10(%arg0: i32) -> (i32, i32) {
    %c0_i32 = arith.constant 0 : i32
    %c0_i32_0 = arith.constant 0 : i32
    %c0_i32_1 = arith.constant 0 : i32
    return %c0_i32, %c0_i32_0 : i32, i32
  }
  func.func @transform_11(%arg0: i32) -> (i32, i32) {
    %c0_i32 = arith.constant 0 : i32
    %c0_i32_0 = arith.constant 0 : i32
    %c0_i32_1 = arith.constant 0 : i32
    return %c0_i32, %c0_i32_0 : i32, i32
  }
  func.func @transform_12(%arg0: i32) -> (i32, i32) {
    %c0_i32 = arith.constant 0 : i32
    %c0_i32_0 = arith.constant 0 : i32
    %c0_i32_1 = arith.constant 0 : i32
    return %c0_i32, %c0_i32_0 : i32, i32
  }
  func.func @transform_13(%arg0: i32) -> (i32, i32) {
    %c0_i32 = arith.constant 0 : i32
    %c0_i32_0 = arith.constant 0 : i32
    %c0_i32_1 = arith.constant 0 : i32
    return %c0_i32, %c0_i32_0 : i32, i32
  }
  func.func @transform_14(%arg0: i32) -> (i32, i32) {
    %c0_i32 = arith.constant 0 : i32
    %c0_i32_0 = arith.constant 0 : i32
    %c0_i32_1 = arith.constant 0 : i32
    return %c0_i32, %c0_i32_0 : i32, i32
  }
}

module attributes {stable_mosaic.version = 11 : i64} {
  func.func @_ggcn_edge_kernel(%arg0: i32, %arg1: memref<128x128xf32, #tpu.memory_space<vmem>>, %arg2: memref<32x128xf32, #tpu.memory_space<vmem>>, %arg3: memref<32x128xbf16, #tpu.memory_space<vmem>>, %arg4: memref<32x128xbf16, #tpu.memory_space<vmem>>, %arg5: memref<128x32xbf16, #tpu.memory_space<vmem>>, %arg6: memref<2x128xbf16, #tpu.memory_space<vmem>>, %arg7: memref<128x1xf32, #tpu.memory_space<vmem>>, %arg8: memref<32x1xf32, #tpu.memory_space<vmem>>, %arg9: memref<1x640x128xbf16, #tpu.memory_space<vmem>>, %arg10: memref<1x11x128xf32, #tpu.memory_space<vmem>>, %arg11: memref<128x128xbf16, #tpu.memory_space<vmem>>, %arg12: memref<1x128xf32, #tpu.memory_space<vmem>>, %arg13: memref<128x128xbf16, #tpu.memory_space<vmem>>, %arg14: memref<1x128xf32, #tpu.memory_space<vmem>>, %arg15: memref<2x128xf32, #tpu.memory_space<vmem>>, %arg16: memref<128x128xf32, #tpu.memory_space<vmem>>, %arg17: memref<32x128xf32, #tpu.memory_space<vmem>>) attributes {dimension_semantics = [#tpu.dimension_semantics<arbitrary>], iteration_bounds = array<i64: 5>, scalar_prefetch = 0 : i64, scratch_operands = 2 : i64, tpu.core_type = #tpu.core_type<tc>, window_params = [{pipeline_mode = #tpu.pipeline_mode<synchronous>, transform_indices = @transform_0, window_bounds = array<i64: 128, 128>}, {pipeline_mode = #tpu.pipeline_mode<synchronous>, transform_indices = @transform_1, window_bounds = array<i64: 32, 128>}, {pipeline_mode = #tpu.pipeline_mode<synchronous>, transform_indices = @transform_2, window_bounds = array<i64: 32, 128>}, {pipeline_mode = #tpu.pipeline_mode<synchronous>, transform_indices = @transform_3, window_bounds = array<i64: 32, 128>}, {pipeline_mode = #tpu.pipeline_mode<synchronous>, transform_indices = @transform_4, window_bounds = array<i64: 128, 32>}, {pipeline_mode = #tpu.pipeline_mode<synchronous>, transform_indices = @transform_5, window_bounds = array<i64: 2, 128>}, {pipeline_mode = #tpu.pipeline_mode<synchronous>, transform_indices = @transform_6, window_bounds = array<i64: 128, 1>}, {pipeline_mode = #tpu.pipeline_mode<synchronous>, transform_indices = @transform_7, window_bounds = array<i64: 32, 1>}, {transform_indices = @transform_8, window_bounds = array<i64: 1, 640, 128>}, {transform_indices = @transform_9, window_bounds = array<i64: 1, 11, 128>}, {pipeline_mode = #tpu.pipeline_mode<synchronous>, transform_indices = @transform_10, window_bounds = array<i64: 128, 128>}, {pipeline_mode = #tpu.pipeline_mode<synchronous>, transform_indices = @transform_11, window_bounds = array<i64: 1, 128>}, {pipeline_mode = #tpu.pipeline_mode<synchronous>, transform_indices = @transform_12, window_bounds = array<i64: 128, 128>}, {pipeline_mode = #tpu.pipeline_mode<synchronous>, transform_indices = @transform_13, window_bounds = array<i64: 1, 128>}, {pipeline_mode = #tpu.pipeline_mode<synchronous>, transform_indices = @transform_14, window_bounds = array<i64: 2, 128>}]} {
    %c0_i32 = arith.constant 0 : i32
    %0 = arith.cmpi eq, %arg0, %c0_i32 : i32
    %1 = arith.extui %0 : i1 to i32
    %c0_i32_0 = arith.constant 0 : i32
    %2 = arith.cmpi ne, %1, %c0_i32_0 : i32
    scf.if %2 {
      %c0_89 = arith.constant 0 : index
      %c0_90 = arith.constant 0 : index
      %183 = vector.load %arg1[%c0_89, %c0_90] : memref<128x128xf32, #tpu.memory_space<vmem>>, vector<128x128xf32>
      %c0_91 = arith.constant 0 : index
      %c0_92 = arith.constant 0 : index
      %184 = vector.load %arg16[%c0_91, %c0_92] : memref<128x128xf32, #tpu.memory_space<vmem>>, vector<128x128xf32>
      tpu.vector_store %arg16[%c0_91, %c0_92], %183 {strides = array<i32>} : memref<128x128xf32, #tpu.memory_space<vmem>>, vector<128x128xf32>,
      %c0_93 = arith.constant 0 : index
      %c0_94 = arith.constant 0 : index
      %185 = vector.load %arg2[%c0_93, %c0_94] : memref<32x128xf32, #tpu.memory_space<vmem>>, vector<32x128xf32>
      %c0_95 = arith.constant 0 : index
      %c0_96 = arith.constant 0 : index
      %186 = vector.load %arg17[%c0_95, %c0_96] : memref<32x128xf32, #tpu.memory_space<vmem>>, vector<32x128xf32>
      tpu.vector_store %arg17[%c0_95, %c0_96], %185 {strides = array<i32>} : memref<32x128xf32, #tpu.memory_space<vmem>>, vector<32x128xf32>,
    } else {
    }
    %c0 = arith.constant 0 : index
    %c0_1 = arith.constant 0 : index
    %3 = vector.load %arg16[%c0, %c0_1] : memref<128x128xf32, #tpu.memory_space<vmem>>, vector<128x128xf32>
    %c0_2 = arith.constant 0 : index
    %c0_3 = arith.constant 0 : index
    %4 = vector.load %arg17[%c0_2, %c0_3] : memref<32x128xf32, #tpu.memory_space<vmem>>, vector<32x128xf32>
    %5 = arith.truncf %3 : vector<128x128xf32> to vector<128x128xbf16>
    %6 = arith.truncf %4 : vector<32x128xf32> to vector<32x128xbf16>
    %c0_4 = arith.constant 0 : index
    %c0_5 = arith.constant 0 : index
    %7 = vector.load %arg7[%c0_4, %c0_5] : memref<128x1xf32, #tpu.memory_space<vmem>>, vector<128x1xf32>
    %c0_6 = arith.constant 0 : index
    %c0_7 = arith.constant 0 : index
    %8 = vector.load %arg8[%c0_6, %c0_7] : memref<32x1xf32, #tpu.memory_space<vmem>>, vector<32x1xf32>
    %c0_8 = arith.constant 0 : index
    %c0_9 = arith.constant 0 : index
    %9 = vector.load %arg4[%c0_8, %c0_9] : memref<32x128xbf16, #tpu.memory_space<vmem>>, vector<32x128xbf16>
    %cst = arith.constant dense<0.000000e+00> : vector<32x128xf32>
    %10 = tpu.matmul %9, %5, %cst {dimension_numbers = #tpu.dot_dimension_numbers<[1], [0], [0], [1], [0, 0, 1, 1], [], []>} : vector<32x128xbf16>, vector<128x128xbf16>, vector<32x128xf32> -> vector<32x128xf32>
    %11 = arith.truncf %10 : vector<32x128xf32> to vector<32x128xbf16>
    %c0_10 = arith.constant 0 : index
    %c0_11 = arith.constant 0 : index
    %c0_12 = arith.constant 0 : index
    %12 = vector.load %arg9[%c0_10, %c0_11, %c0_12] : memref<1x640x128xbf16, #tpu.memory_space<vmem>>, vector<1x128x128xbf16>
    %13 = vector.shape_cast %12 : vector<1x128x128xbf16> to vector<128x128xbf16>
    %cst_13 = arith.constant dense<0.000000e+00> : vector<128x128xf32>
    %14 = tpu.matmul %5, %13, %cst_13 {dimension_numbers = #tpu.dot_dimension_numbers<[1], [0], [0], [1], [0, 0, 1, 1], [], []>} : vector<128x128xbf16>, vector<128x128xbf16>, vector<128x128xf32> -> vector<128x128xf32>
    %c0_14 = arith.constant 0 : index
    %c0_15 = arith.constant 0 : index
    %15 = vector.load %arg3[%c0_14, %c0_15] : memref<32x128xbf16, #tpu.memory_space<vmem>>, vector<32x128xbf16>
    %16 = arith.truncf %14 : vector<128x128xf32> to vector<128x128xbf16>
    %cst_16 = arith.constant dense<0.000000e+00> : vector<32x128xf32>
    %17 = tpu.matmul %15, %16, %cst_16 {dimension_numbers = #tpu.dot_dimension_numbers<[1], [0], [0], [1], [0, 0, 1, 1], [], []>} : vector<32x128xbf16>, vector<128x128xbf16>, vector<32x128xf32> -> vector<32x128xf32>
    %c0_17 = arith.constant 0 : index
    %c128 = arith.constant 128 : index
    %c0_18 = arith.constant 0 : index
    %18 = vector.load %arg9[%c0_17, %c128, %c0_18] : memref<1x640x128xbf16, #tpu.memory_space<vmem>>, vector<1x128x128xbf16>
    %19 = vector.shape_cast %18 : vector<1x128x128xbf16> to vector<128x128xbf16>
    %cst_19 = arith.constant dense<0.000000e+00> : vector<32x128xf32>
    %20 = tpu.matmul %11, %19, %cst_19 {dimension_numbers = #tpu.dot_dimension_numbers<[1], [0], [0], [1], [0, 0, 1, 1], [], []>} : vector<32x128xbf16>, vector<128x128xbf16>, vector<32x128xf32> -> vector<32x128xf32>
    %21 = arith.addf %17, %20 : vector<32x128xf32>
    %c0_20 = arith.constant 0 : index
    %c256 = arith.constant 256 : index
    %c0_21 = arith.constant 0 : index
    %22 = vector.load %arg9[%c0_20, %c256, %c0_21] : memref<1x640x128xbf16, #tpu.memory_space<vmem>>, vector<1x128x128xbf16>
    %23 = vector.shape_cast %22 : vector<1x128x128xbf16> to vector<128x128xbf16>
    %cst_22 = arith.constant dense<0.000000e+00> : vector<32x128xf32>
    %24 = tpu.matmul %6, %23, %cst_22 {dimension_numbers = #tpu.dot_dimension_numbers<[1], [0], [0], [1], [0, 0, 1, 1], [], []>} : vector<32x128xbf16>, vector<128x128xbf16>, vector<32x128xf32> -> vector<32x128xf32>
    %25 = arith.addf %21, %24 : vector<32x128xf32>
    %c0_23 = arith.constant 0 : index
    %c0_24 = arith.constant 0 : index
    %c0_25 = arith.constant 0 : index
    %26 = vector.load %arg10[%c0_23, %c0_24, %c0_25] : memref<1x11x128xf32, #tpu.memory_space<vmem>>, vector<1x1x128xf32>
    %27 = vector.shape_cast %26 : vector<1x1x128xf32> to vector<1x128xf32>
    %28 = vector.broadcast %27 : vector<1x128xf32> to vector<32x128xf32>
    %29 = arith.addf %25, %28 : vector<32x128xf32>
    %cst_26 = arith.constant 0.000000e+00 : f32
    %30 = vector.broadcast %cst_26 : f32 to vector<32x128xf32>
    %31 = arith.subf %30, %29 : vector<32x128xf32>
    %32 = math.exp %31 : vector<32x128xf32>
    %cst_27 = arith.constant 1.000000e+00 : f32
    %33 = vector.broadcast %cst_27 : f32 to vector<32x128xf32>
    %34 = arith.addf %33, %32 : vector<32x128xf32>
    %cst_28 = arith.constant 1.000000e+00 : f32
    %35 = vector.broadcast %cst_28 : f32 to vector<32x128xf32>
    %36 = arith.divf %35, %34 : vector<32x128xf32>
    %c0_29 = arith.constant 0 : index
    %c384 = arith.constant 384 : index
    %c0_30 = arith.constant 0 : index
    %37 = vector.load %arg9[%c0_29, %c384, %c0_30] : memref<1x640x128xbf16, #tpu.memory_space<vmem>>, vector<1x128x128xbf16>
    %38 = vector.shape_cast %37 : vector<1x128x128xbf16> to vector<128x128xbf16>
    %cst_31 = arith.constant dense<0.000000e+00> : vector<128x128xf32>
    %39 = tpu.matmul %5, %38, %cst_31 {dimension_numbers = #tpu.dot_dimension_numbers<[1], [0], [0], [1], [0, 0, 1, 1], [], []>} : vector<128x128xbf16>, vector<128x128xbf16>, vector<128x128xf32> -> vector<128x128xf32>
    %c0_32 = arith.constant 0 : index
    %c1 = arith.constant 1 : index
    %c0_33 = arith.constant 0 : index
    %40 = vector.load %arg10[%c0_32, %c1, %c0_33] : memref<1x11x128xf32, #tpu.memory_space<vmem>>, vector<1x1x128xf32>
    %41 = vector.shape_cast %40 : vector<1x1x128xf32> to vector<1x128xf32>
    %42 = vector.broadcast %41 : vector<1x128xf32> to vector<128x128xf32>
    %43 = arith.addf %39, %42 : vector<128x128xf32>
    %c0_34 = arith.constant 0 : index
    %c512 = arith.constant 512 : index
    %c0_35 = arith.constant 0 : index
    %44 = vector.load %arg9[%c0_34, %c512, %c0_35] : memref<1x640x128xbf16, #tpu.memory_space<vmem>>, vector<1x128x128xbf16>
    %45 = vector.shape_cast %44 : vector<1x128x128xbf16> to vector<128x128xbf16>
    %cst_36 = arith.constant dense<0.000000e+00> : vector<32x128xf32>
    %46 = tpu.matmul %11, %45, %cst_36 {dimension_numbers = #tpu.dot_dimension_numbers<[1], [0], [0], [1], [0, 0, 1, 1], [], []>} : vector<32x128xbf16>, vector<128x128xbf16>, vector<32x128xf32> -> vector<32x128xf32>
    %c0_37 = arith.constant 0 : index
    %c2 = arith.constant 2 : index
    %c0_38 = arith.constant 0 : index
    %47 = vector.load %arg10[%c0_37, %c2, %c0_38] : memref<1x11x128xf32, #tpu.memory_space<vmem>>, vector<1x1x128xf32>
    %48 = vector.shape_cast %47 : vector<1x1x128xf32> to vector<1x128xf32>
    %49 = vector.broadcast %48 : vector<1x128xf32> to vector<32x128xf32>
    %50 = arith.addf %46, %49 : vector<32x128xf32>
    %c0_39 = arith.constant 0 : index
    %c0_40 = arith.constant 0 : index
    %51 = vector.load %arg5[%c0_39, %c0_40] : memref<128x32xbf16, #tpu.memory_space<vmem>>, vector<128x32xbf16>
    %52 = arith.mulf %36, %50 : vector<32x128xf32>
    %53 = arith.truncf %52 : vector<32x128xf32> to vector<32x128xbf16>
    %cst_41 = arith.constant dense<0.000000e+00> : vector<128x128xf32>
    %54 = tpu.matmul %51, %53, %cst_41 {dimension_numbers = #tpu.dot_dimension_numbers<[1], [0], [0], [1], [0, 0, 1, 1], [], []>} : vector<128x32xbf16>, vector<32x128xbf16>, vector<128x128xf32> -> vector<128x128xf32>
    %55 = arith.addf %43, %54 : vector<128x128xf32>
    %c0_42 = arith.constant 0 : index
    %c3 = arith.constant 3 : index
    %c0_43 = arith.constant 0 : index
    %56 = vector.load %arg10[%c0_42, %c3, %c0_43] : memref<1x11x128xf32, #tpu.memory_space<vmem>>, vector<1x1x128xf32>
    %57 = vector.shape_cast %56 : vector<1x1x128xf32> to vector<1x128xf32>
    %c0_44 = arith.constant 0 : index
    %c4 = arith.constant 4 : index
    %c0_45 = arith.constant 0 : index
    %58 = vector.load %arg10[%c0_44, %c4, %c0_45] : memref<1x11x128xf32, #tpu.memory_space<vmem>>, vector<1x1x128xf32>
    %59 = vector.shape_cast %58 : vector<1x1x128xf32> to vector<1x128xf32>
    %60 = vector.broadcast %7 : vector<128x1xf32> to vector<128x128xf32>
    %61 = arith.mulf %55, %60 : vector<128x128xf32>
    %cst_46 = arith.constant dense<0.000000e+00> : vector<128xf32>
    %62 = vector.multi_reduction <add>, %61, %cst_46 [0] : vector<128x128xf32> to vector<128xf32>
    %63 = vector.shape_cast %62 : vector<128xf32> to vector<1x128xf32>
    %cst_47 = arith.constant 6.250000e-02 : f32
    %64 = vector.broadcast %cst_47 : f32 to vector<1x128xf32>
    %65 = arith.mulf %63, %64 : vector<1x128xf32>
    %66 = arith.mulf %61, %61 : vector<128x128xf32>
    %cst_48 = arith.constant dense<0.000000e+00> : vector<128xf32>
    %67 = vector.multi_reduction <add>, %66, %cst_48 [0] : vector<128x128xf32> to vector<128xf32>
    %68 = vector.shape_cast %67 : vector<128xf32> to vector<1x128xf32>
    %cst_49 = arith.constant 6.250000e-02 : f32
    %69 = vector.broadcast %cst_49 : f32 to vector<1x128xf32>
    %70 = arith.mulf %68, %69 : vector<1x128xf32>
    %71 = arith.mulf %65, %65 : vector<1x128xf32>
    %72 = arith.subf %70, %71 : vector<1x128xf32>
    %cst_50 = arith.constant 0.000000e+00 : f32
    %73 = vector.broadcast %cst_50 : f32 to vector<1x128xf32>
    %74 = arith.maximumf %72, %73 : vector<1x128xf32>
    %cst_51 = arith.constant 9.99999974E-6 : f32
    %75 = vector.broadcast %cst_51 : f32 to vector<1x128xf32>
    %76 = arith.addf %74, %75 : vector<1x128xf32>
    %77 = math.rsqrt %76 : vector<1x128xf32>
    %78 = arith.mulf %57, %77 : vector<1x128xf32>
    %79 = arith.mulf %65, %78 : vector<1x128xf32>
    %80 = arith.subf %59, %79 : vector<1x128xf32>
    %81 = vector.broadcast %78 : vector<1x128xf32> to vector<128x128xf32>
    %82 = arith.mulf %55, %81 : vector<128x128xf32>
    %83 = vector.broadcast %80 : vector<1x128xf32> to vector<128x128xf32>
    %84 = arith.addf %82, %83 : vector<128x128xf32>
    %cst_52 = arith.constant 0.000000e+00 : f32
    %85 = vector.broadcast %cst_52 : f32 to vector<128x128xf32>
    %86 = arith.maximumf %84, %85 : vector<128x128xf32>
    %c0_53 = arith.constant 0 : index
    %c5 = arith.constant 5 : index
    %c0_54 = arith.constant 0 : index
    %87 = vector.load %arg10[%c0_53, %c5, %c0_54] : memref<1x11x128xf32, #tpu.memory_space<vmem>>, vector<1x1x128xf32>
    %88 = vector.shape_cast %87 : vector<1x1x128xf32> to vector<1x128xf32>
    %c0_55 = arith.constant 0 : index
    %c6 = arith.constant 6 : index
    %c0_56 = arith.constant 0 : index
    %89 = vector.load %arg10[%c0_55, %c6, %c0_56] : memref<1x11x128xf32, #tpu.memory_space<vmem>>, vector<1x1x128xf32>
    %90 = vector.shape_cast %89 : vector<1x1x128xf32> to vector<1x128xf32>
    %91 = vector.broadcast %8 : vector<32x1xf32> to vector<32x128xf32>
    %92 = arith.mulf %29, %91 : vector<32x128xf32>
    %cst_57 = arith.constant dense<0.000000e+00> : vector<128xf32>
    %93 = vector.multi_reduction <add>, %92, %cst_57 [0] : vector<32x128xf32> to vector<128xf32>
    %94 = vector.shape_cast %93 : vector<128xf32> to vector<1x128xf32>
    %cst_58 = arith.constant 3.125000e-02 : f32
    %95 = vector.broadcast %cst_58 : f32 to vector<1x128xf32>
    %96 = arith.mulf %94, %95 : vector<1x128xf32>
    %97 = arith.mulf %92, %92 : vector<32x128xf32>
    %cst_59 = arith.constant dense<0.000000e+00> : vector<128xf32>
    %98 = vector.multi_reduction <add>, %97, %cst_59 [0] : vector<32x128xf32> to vector<128xf32>
    %99 = vector.shape_cast %98 : vector<128xf32> to vector<1x128xf32>
    %cst_60 = arith.constant 3.125000e-02 : f32
    %100 = vector.broadcast %cst_60 : f32 to vector<1x128xf32>
    %101 = arith.mulf %99, %100 : vector<1x128xf32>
    %102 = arith.mulf %96, %96 : vector<1x128xf32>
    %103 = arith.subf %101, %102 : vector<1x128xf32>
    %cst_61 = arith.constant 0.000000e+00 : f32
    %104 = vector.broadcast %cst_61 : f32 to vector<1x128xf32>
    %105 = arith.maximumf %103, %104 : vector<1x128xf32>
    %cst_62 = arith.constant 3.125000e-07 : f32
    %106 = vector.broadcast %cst_62 : f32 to vector<1x128xf32>
    %107 = arith.addf %105, %106 : vector<1x128xf32>
    %108 = math.rsqrt %107 : vector<1x128xf32>
    %109 = arith.mulf %88, %108 : vector<1x128xf32>
    %110 = arith.mulf %96, %109 : vector<1x128xf32>
    %111 = arith.subf %90, %110 : vector<1x128xf32>
    %112 = vector.broadcast %109 : vector<1x128xf32> to vector<32x128xf32>
    %113 = arith.mulf %29, %112 : vector<32x128xf32>
    %114 = vector.broadcast %111 : vector<1x128xf32> to vector<32x128xf32>
    %115 = arith.addf %113, %114 : vector<32x128xf32>
    %cst_63 = arith.constant 0.000000e+00 : f32
    %116 = vector.broadcast %cst_63 : f32 to vector<32x128xf32>
    %117 = arith.maximumf %115, %116 : vector<32x128xf32>
    %c0_64 = arith.constant 0 : index
    %c7 = arith.constant 7 : index
    %c0_65 = arith.constant 0 : index
    %118 = vector.load %arg10[%c0_64, %c7, %c0_65] : memref<1x11x128xf32, #tpu.memory_space<vmem>>, vector<1x1x128xf32>
    %119 = vector.shape_cast %118 : vector<1x1x128xf32> to vector<1x128xf32>
    %c0_66 = arith.constant 0 : index
    %c8 = arith.constant 8 : index
    %c0_67 = arith.constant 0 : index
    %120 = vector.load %arg10[%c0_66, %c8, %c0_67] : memref<1x11x128xf32, #tpu.memory_space<vmem>>, vector<1x1x128xf32>
    %121 = vector.shape_cast %120 : vector<1x1x128xf32> to vector<1x128xf32>
    %122 = vector.broadcast %7 : vector<128x1xf32> to vector<128x128xf32>
    %123 = arith.mulf %86, %122 : vector<128x128xf32>
    %cst_68 = arith.constant dense<0.000000e+00> : vector<128xf32>
    %124 = vector.multi_reduction <add>, %123, %cst_68 [0] : vector<128x128xf32> to vector<128xf32>
    %125 = vector.shape_cast %124 : vector<128xf32> to vector<1x128xf32>
    %cst_69 = arith.constant 6.250000e-02 : f32
    %126 = vector.broadcast %cst_69 : f32 to vector<1x128xf32>
    %127 = arith.mulf %125, %126 : vector<1x128xf32>
    %128 = arith.mulf %123, %123 : vector<128x128xf32>
    %cst_70 = arith.constant dense<0.000000e+00> : vector<128xf32>
    %129 = vector.multi_reduction <add>, %128, %cst_70 [0] : vector<128x128xf32> to vector<128xf32>
    %130 = vector.shape_cast %129 : vector<128xf32> to vector<1x128xf32>
    %cst_71 = arith.constant 6.250000e-02 : f32
    %131 = vector.broadcast %cst_71 : f32 to vector<1x128xf32>
    %132 = arith.mulf %130, %131 : vector<1x128xf32>
    %133 = arith.mulf %127, %127 : vector<1x128xf32>
    %134 = arith.subf %132, %133 : vector<1x128xf32>
    %cst_72 = arith.constant 0.000000e+00 : f32
    %135 = vector.broadcast %cst_72 : f32 to vector<1x128xf32>
    %136 = arith.maximumf %134, %135 : vector<1x128xf32>
    %cst_73 = arith.constant 9.99999974E-6 : f32
    %137 = vector.broadcast %cst_73 : f32 to vector<1x128xf32>
    %138 = arith.addf %136, %137 : vector<1x128xf32>
    %139 = math.rsqrt %138 : vector<1x128xf32>
    %140 = arith.mulf %119, %139 : vector<1x128xf32>
    %141 = arith.mulf %127, %140 : vector<1x128xf32>
    %142 = arith.subf %121, %141 : vector<1x128xf32>
    %143 = vector.broadcast %140 : vector<1x128xf32> to vector<128x128xf32>
    %144 = arith.mulf %86, %143 : vector<128x128xf32>
    %145 = vector.broadcast %142 : vector<1x128xf32> to vector<128x128xf32>
    %146 = arith.addf %144, %145 : vector<128x128xf32>
    %c0_74 = arith.constant 0 : index
    %c9 = arith.constant 9 : index
    %c0_75 = arith.constant 0 : index
    %147 = vector.load %arg10[%c0_74, %c9, %c0_75] : memref<1x11x128xf32, #tpu.memory_space<vmem>>, vector<1x1x128xf32>
    %148 = vector.shape_cast %147 : vector<1x1x128xf32> to vector<1x128xf32>
    %c0_76 = arith.constant 0 : index
    %c10 = arith.constant 10 : index
    %c0_77 = arith.constant 0 : index
    %149 = vector.load %arg10[%c0_76, %c10, %c0_77] : memref<1x11x128xf32, #tpu.memory_space<vmem>>, vector<1x1x128xf32>
    %150 = vector.shape_cast %149 : vector<1x1x128xf32> to vector<1x128xf32>
    %151 = vector.broadcast %8 : vector<32x1xf32> to vector<32x128xf32>
    %152 = arith.mulf %117, %151 : vector<32x128xf32>
    %cst_78 = arith.constant dense<0.000000e+00> : vector<128xf32>
    %153 = vector.multi_reduction <add>, %152, %cst_78 [0] : vector<32x128xf32> to vector<128xf32>
    %154 = vector.shape_cast %153 : vector<128xf32> to vector<1x128xf32>
    %cst_79 = arith.constant 3.125000e-02 : f32
    %155 = vector.broadcast %cst_79 : f32 to vector<1x128xf32>
    %156 = arith.mulf %154, %155 : vector<1x128xf32>
    %157 = arith.mulf %152, %152 : vector<32x128xf32>
    %cst_80 = arith.constant dense<0.000000e+00> : vector<128xf32>
    %158 = vector.multi_reduction <add>, %157, %cst_80 [0] : vector<32x128xf32> to vector<128xf32>
    %159 = vector.shape_cast %158 : vector<128xf32> to vector<1x128xf32>
    %cst_81 = arith.constant 3.125000e-02 : f32
    %160 = vector.broadcast %cst_81 : f32 to vector<1x128xf32>
    %161 = arith.mulf %159, %160 : vector<1x128xf32>
    %162 = arith.mulf %156, %156 : vector<1x128xf32>
    %163 = arith.subf %161, %162 : vector<1x128xf32>
    %cst_82 = arith.constant 0.000000e+00 : f32
    %164 = vector.broadcast %cst_82 : f32 to vector<1x128xf32>
    %165 = arith.maximumf %163, %164 : vector<1x128xf32>
    %cst_83 = arith.constant 9.99999974E-6 : f32
    %166 = vector.broadcast %cst_83 : f32 to vector<1x128xf32>
    %167 = arith.addf %165, %166 : vector<1x128xf32>
    %168 = math.rsqrt %167 : vector<1x128xf32>
    %169 = arith.mulf %148, %168 : vector<1x128xf32>
    %170 = arith.mulf %156, %169 : vector<1x128xf32>
    %171 = arith.subf %150, %170 : vector<1x128xf32>
    %172 = vector.broadcast %169 : vector<1x128xf32> to vector<32x128xf32>
    %173 = arith.mulf %117, %172 : vector<32x128xf32>
    %174 = vector.broadcast %171 : vector<1x128xf32> to vector<32x128xf32>
    %175 = arith.addf %173, %174 : vector<32x128xf32>
    %176 = arith.addf %146, %3 : vector<128x128xf32>
    %177 = arith.addf %175, %4 : vector<32x128xf32>
    %c0_84 = arith.constant 0 : index
    %c0_85 = arith.constant 0 : index
    %178 = vector.load %arg16[%c0_84, %c0_85] : memref<128x128xf32, #tpu.memory_space<vmem>>, vector<128x128xf32>
    tpu.vector_store %arg16[%c0_84, %c0_85], %176 {strides = array<i32>} : memref<128x128xf32, #tpu.memory_space<vmem>>, vector<128x128xf32>,
    %c0_86 = arith.constant 0 : index
    %c0_87 = arith.constant 0 : index
    %179 = vector.load %arg17[%c0_86, %c0_87] : memref<32x128xf32, #tpu.memory_space<vmem>>, vector<32x128xf32>
    tpu.vector_store %arg17[%c0_86, %c0_87], %177 {strides = array<i32>} : memref<32x128xf32, #tpu.memory_space<vmem>>, vector<32x128xf32>,
    %c4_i32 = arith.constant 4 : i32
    %180 = arith.cmpi eq, %arg0, %c4_i32 : i32
    %181 = arith.extui %180 : i1 to i32
    %c0_i32_88 = arith.constant 0 : i32
    %182 = arith.cmpi ne, %181, %c0_i32_88 : i32
    scf.if %182 {
      %c0_89 = arith.constant 0 : index
      %c0_90 = arith.constant 0 : index
      %183 = vector.load %arg6[%c0_89, %c0_90] : memref<2x128xbf16, #tpu.memory_space<vmem>>, vector<2x128xbf16>
      %184 = arith.truncf %176 : vector<128x128xf32> to vector<128x128xbf16>
      %cst_91 = arith.constant dense<0.000000e+00> : vector<2x128xf32>
      %185 = tpu.matmul %183, %184, %cst_91 {dimension_numbers = #tpu.dot_dimension_numbers<[1], [0], [0], [1], [0, 0, 1, 1], [], []>} : vector<2x128xbf16>, vector<128x128xbf16>, vector<2x128xf32> -> vector<2x128xf32>
      %186 = arith.truncf %185 : vector<2x128xf32> to vector<2x128xbf16>
      %c0_92 = arith.constant 0 : index
      %c0_93 = arith.constant 0 : index
      %187 = vector.load %arg11[%c0_92, %c0_93] : memref<128x128xbf16, #tpu.memory_space<vmem>>, vector<128x128xbf16>
      %cst_94 = arith.constant dense<0.000000e+00> : vector<2x128xf32>
      %188 = tpu.matmul %186, %187, %cst_94 {dimension_numbers = #tpu.dot_dimension_numbers<[1], [0], [0], [1], [0, 0, 1, 1], [], []>} : vector<2x128xbf16>, vector<128x128xbf16>, vector<2x128xf32> -> vector<2x128xf32>
      %c0_95 = arith.constant 0 : index
      %c0_96 = arith.constant 0 : index
      %189 = vector.load %arg12[%c0_95, %c0_96] : memref<1x128xf32, #tpu.memory_space<vmem>>, vector<1x128xf32>
      %190 = vector.broadcast %189 : vector<1x128xf32> to vector<2x128xf32>
      %191 = arith.addf %188, %190 : vector<2x128xf32>
      %cst_97 = arith.constant 0.000000e+00 : f32
      %192 = vector.broadcast %cst_97 : f32 to vector<2x128xf32>
      %193 = arith.maximumf %191, %192 : vector<2x128xf32>
      %194 = arith.truncf %193 : vector<2x128xf32> to vector<2x128xbf16>
      %c0_98 = arith.constant 0 : index
      %c0_99 = arith.constant 0 : index
      %195 = vector.load %arg13[%c0_98, %c0_99] : memref<128x128xbf16, #tpu.memory_space<vmem>>, vector<128x128xbf16>
      %cst_100 = arith.constant dense<0.000000e+00> : vector<2x128xf32>
      %196 = tpu.matmul %194, %195, %cst_100 {dimension_numbers = #tpu.dot_dimension_numbers<[1], [0], [0], [1], [0, 0, 1, 1], [], []>} : vector<2x128xbf16>, vector<128x128xbf16>, vector<2x128xf32> -> vector<2x128xf32>
      %c0_101 = arith.constant 0 : index
      %c0_102 = arith.constant 0 : index
      %197 = vector.load %arg14[%c0_101, %c0_102] : memref<1x128xf32, #tpu.memory_space<vmem>>, vector<1x128xf32>
      %198 = vector.broadcast %197 : vector<1x128xf32> to vector<2x128xf32>
      %199 = arith.addf %196, %198 : vector<2x128xf32>
      %c0_103 = arith.constant 0 : index
      %c0_104 = arith.constant 0 : index
      %200 = vector.load %arg15[%c0_103, %c0_104] : memref<2x128xf32, #tpu.memory_space<vmem>>, vector<2x128xf32>
      tpu.vector_store %arg15[%c0_103, %c0_104], %199 {strides = array<i32>} : memref<2x128xf32, #tpu.memory_space<vmem>>, vector<2x128xf32>,
    } else {
    }
    return
  }
  func.func @transform_0(%arg0: i32) -> (i32, i32) {
    %c0_i32 = arith.constant 0 : i32
    %c0_i32_0 = arith.constant 0 : i32
    %c0_i32_1 = arith.constant 0 : i32
    return %c0_i32, %c0_i32_0 : i32, i32
  }
  func.func @transform_1(%arg0: i32) -> (i32, i32) {
    %c0_i32 = arith.constant 0 : i32
    %c0_i32_0 = arith.constant 0 : i32
    %c0_i32_1 = arith.constant 0 : i32
    return %c0_i32, %c0_i32_0 : i32, i32
  }
  func.func @transform_2(%arg0: i32) -> (i32, i32) {
    %c0_i32 = arith.constant 0 : i32
    %c0_i32_0 = arith.constant 0 : i32
    %c0_i32_1 = arith.constant 0 : i32
    return %c0_i32, %c0_i32_0 : i32, i32
  }
  func.func @transform_3(%arg0: i32) -> (i32, i32) {
    %c0_i32 = arith.constant 0 : i32
    %c0_i32_0 = arith.constant 0 : i32
    %c0_i32_1 = arith.constant 0 : i32
    return %c0_i32, %c0_i32_0 : i32, i32
  }
  func.func @transform_4(%arg0: i32) -> (i32, i32) {
    %c0_i32 = arith.constant 0 : i32
    %c0_i32_0 = arith.constant 0 : i32
    %c0_i32_1 = arith.constant 0 : i32
    return %c0_i32, %c0_i32_0 : i32, i32
  }
  func.func @transform_5(%arg0: i32) -> (i32, i32) {
    %c0_i32 = arith.constant 0 : i32
    %c0_i32_0 = arith.constant 0 : i32
    %c0_i32_1 = arith.constant 0 : i32
    return %c0_i32, %c0_i32_0 : i32, i32
  }
  func.func @transform_6(%arg0: i32) -> (i32, i32) {
    %c0_i32 = arith.constant 0 : i32
    %c0_i32_0 = arith.constant 0 : i32
    %c0_i32_1 = arith.constant 0 : i32
    return %c0_i32, %c0_i32_0 : i32, i32
  }
  func.func @transform_7(%arg0: i32) -> (i32, i32) {
    %c0_i32 = arith.constant 0 : i32
    %c0_i32_0 = arith.constant 0 : i32
    %c0_i32_1 = arith.constant 0 : i32
    return %c0_i32, %c0_i32_0 : i32, i32
  }
  func.func @transform_8(%arg0: i32) -> (i32, i32, i32) {
    %c0_i32 = arith.constant 0 : i32
    %c0_i32_0 = arith.constant 0 : i32
    %c0_i32_1 = arith.constant 0 : i32
    return %arg0, %c0_i32, %c0_i32_0 : i32, i32, i32
  }
  func.func @transform_9(%arg0: i32) -> (i32, i32, i32) {
    %c0_i32 = arith.constant 0 : i32
    %c0_i32_0 = arith.constant 0 : i32
    %c0_i32_1 = arith.constant 0 : i32
    return %arg0, %c0_i32, %c0_i32_0 : i32, i32, i32
  }
  func.func @transform_10(%arg0: i32) -> (i32, i32) {
    %c0_i32 = arith.constant 0 : i32
    %c0_i32_0 = arith.constant 0 : i32
    %c0_i32_1 = arith.constant 0 : i32
    return %c0_i32, %c0_i32_0 : i32, i32
  }
  func.func @transform_11(%arg0: i32) -> (i32, i32) {
    %c0_i32 = arith.constant 0 : i32
    %c0_i32_0 = arith.constant 0 : i32
    %c0_i32_1 = arith.constant 0 : i32
    return %c0_i32, %c0_i32_0 : i32, i32
  }
  func.func @transform_12(%arg0: i32) -> (i32, i32) {
    %c0_i32 = arith.constant 0 : i32
    %c0_i32_0 = arith.constant 0 : i32
    %c0_i32_1 = arith.constant 0 : i32
    return %c0_i32, %c0_i32_0 : i32, i32
  }
  func.func @transform_13(%arg0: i32) -> (i32, i32) {
    %c0_i32 = arith.constant 0 : i32
    %c0_i32_0 = arith.constant 0 : i32
    %c0_i32_1 = arith.constant 0 : i32
    return %c0_i32, %c0_i32_0 : i32, i32
  }
  func.func @transform_14(%arg0: i32) -> (i32, i32) {
    %c0_i32 = arith.constant 0 : i32
    %c0_i32_0 = arith.constant 0 : i32
    %c0_i32_1 = arith.constant 0 : i32
    return %c0_i32, %c0_i32_0 : i32, i32
  }
}

</mosaic_0001>

<bundles_post_ra>
// kernel: tpu_custom_call.1
= control target key start
LH: loop header
LB: loop body
LE: loop exit
PB: predicated region body
PF: predicated region fallthrough
CT: control target
= control target key end

     0   :  { %s4005_s0 = inlined_call_operand.vmem [shape: f32[128,128], index: 0, kind: input, shape index: {}]   ;;  %s4006_s1 = inlined_call_operand.hbm [shape: f32[32,128], index: 1, kind: input, shape index: {}]   ;;  %s4007_s2 = inlined_call_operand.vmem [shape: bf16[32,128], index: 2, kind: input, shape index: {}]   ;;  %s4008_s3 = inlined_call_operand.hbm [shape: bf16[32,128], index: 3, kind: input, shape index: {}]   ;;  %s4009_s4 = inlined_call_operand.vmem [shape: bf16[128,32], index: 4, kind: input, shape index: {}]   ;;  %s4010_s5 = inlined_call_operand.vmem [shape: bf16[2,128], index: 5, kind: input, shape index: {}]   ;;  %s4011_s6 = inlined_call_operand.vmem [shape: f32[128,1], index: 6, kind: input, shape index: {}]   ;;  %s4012_s7 = inlined_call_operand.vmem [shape: f32[32,1], index: 7, kind: input, shape index: {}]   ;;  %s4013_s8 = inlined_call_operand.hbm [shape: bf16[5,640,128], index: 8, kind: input, shape index: {}]   ;;  %s4014_s9 = inlined_call_operand.vmem [shape: f32[5,11,128], index: 9, kind: input, shape index: {}]   ;;  %s4015_s10 = inlined_call_operand.hbm [shape: bf16[128,128], index: 10, kind: input, shape index: {}]   ;;  %s4016_s11 = inlined_call_operand.vmem [shape: f32[1,128], index: 11, kind: input, shape index: {}]   ;;  %s4017_s12 = inlined_call_operand.hbm [shape: bf16[128,128], index: 12, kind: input, shape index: {}]   ;;  %s4018_s13 = inlined_call_operand.vmem [shape: f32[1,128], index: 13, kind: input, shape index: {}]   ;;  %s4019_s14 = inlined_call_operand.hbm [shape: f32[2,128], index: 14, kind: output, shape index: {}]  }
   0x1   :  { %4025 = sst [smem:[#allocation30_spill]] %s4008_s3 }
   0x2   :  { %4026 = sst [smem:[#allocation31_spill]] %s4015_s10 }
   0x3   :  { %4027 = sst [smem:[#allocation32_spill]] %s4017_s12 }
   0x4   :  { %4028 = sst [smem:[#allocation33_spill]] %s4019_s14 }
   0x5   :  { %19 = vsyncpa [#allocation5], 0 }
   0x6   :  { %20 = vsyncpa [#allocation8], 0 }
   0x7   :  { %22 = vsyncpa [#allocation8 + $0x1], 0 }
   0x8   :  { %23 = vsyncpa [#allocation11], 0 }
   0x9   :  { %24 = vsyncpa [#allocation6], 0  ;;  %s3056_s29 = smov 0   ;;  %s3058_s30 = smov 0  }
   0xa   :  { %s3060_s15 = smov 0   ;;  %s3062_s16 = smov 0  }
   0xb LB: > { %4029 = sst [smem:[#allocation27_spill]] %s2967_s15  ;;  %s3075_s17 = sadd.s32 4294967295, %s2971_s16   ;;  %s2971_s16 = sphi %s3062_s16, %s4050_s16   ;;  %s2967_s15 = sphi %s3060_s15, %s4052_s15   ;;  %s2963_s30 = sphi %s3058_s30, %s4054_s30   ;;  %s2959_s29 = sphi %s3056_s29, %s4053_s29  }
   0xc   : > { %p176_p0 = scmp.ne.s32.totalorder %s2963_s30, %s2959_s29  ;;  %p177_p1 = scmp.eq.s32.totalorder %s3075_s17, 0 }
   0xd   : > { %p2244_p2 = scmp.ge.s32.totalorder %s2971_s16, 1  ;;  %p318_p3 = scmp.lt.s32.totalorder %s2971_s16, 6 }
   0xe   : > { %p2245_p4 = scmp.ne.s32.totalorder %s3075_s17, 0  ;;  %p3084_p5 = por %p177_p1, %p176_p0 }
   0xf   : > { %p3088_p6 = pnand %p2244_p2, %p318_p3  ;;  %s4032_s10 = sld [smem:[#allocation31_spill]] }
  0x10   : > { %s2973_s23 = smov [#allocation9]   ;;  %s4034_s3 = sld [smem:[#allocation30_spill]] }
  0x11   : > { %p2634_p7 = pneg %p3088_p6  ;;  %s360_s24 = sshll.u32 %s2973_s23, 4  ;;  %s361_s24 = int_to_ptr.vmem [resolvable:$true] %s360_s24 }
  0x12   : > { %s4020_s29 = smov 64   ;;  %s4021_s20 = smov 4  }
  0x13   : > { %p3099_p8 = pnand %p2634_p7, %p177_p1  ;;  %s2976_s21 = smov [#allocation4]  }
  0x14   : > { %s334_s23 = sshll.u32 %s2976_s21, 4  ;;  %s4035_s12 = sld [smem:[#allocation32_spill]]  ;;  %s335_s23 = int_to_ptr.vmem [resolvable:$true] %s334_s23 }
  0x15   : > { %s358_s22 = sshll.u32 %s4032_s10, 4  ;;  %s163_s21 = sadd.s32 1, %s2967_s15  ;;  %s359_s22 = int_to_ptr.hbm [resolvable:$true] %s358_s22 }
  0x16   : > { %s332_s28 = sshll.u32 %s4034_s3, 4  ;;  %s2977_s3 = smov [#allocation10]   ;;  %s333_s28 = int_to_ptr.hbm [resolvable:$true] %s332_s28 }
  0x17   : > { %2640 = dma.hbm_to_vmem [thread:$0]  (!%p3099_p8), %s359_s22, 1024, %s361_s24, [#allocation8], %s4020_s29, %s4020_s29, %s4021_s20  }
  0x18   : > { %2637 = dma.hbm_to_vmem [thread:$0]  (!%p3099_p8), %s333_s28, 256, %s335_s23, [#allocation5], %s4020_s29, %s4020_s29, %s4021_s20  }
  0x19   : > { %s377_s22 = sshll.u32 %s2977_s3, 4  ;;  %s3120_s24 = sadd.s32 1, %s2971_s16   ;;  %s378_s22 = int_to_ptr.vmem [resolvable:$true] %s377_s22 }
  0x1a   : > { %s375_s27 = sshll.u32 %s4035_s12, 4  ;;  %4036 = sst [smem:[#allocation28_spill]] %s3120_s24  ;;  %s376_s27 = int_to_ptr.hbm [resolvable:$true] %s375_s27 }
  0x1b   : > { %2643 = dma.hbm_to_vmem [thread:$0]  (!%p3099_p8), %s376_s27, 1024, %s378_s22, [#allocation11], %s4020_s29, %s4020_s29, %s4021_s20  }
  0x1c   : > { %s160_s10 = ssub.s32 %s2971_s16, %s3120_s24  ;;  %p170_p10 = scmp.ne.s32.totalorder %s2967_s15, %s2963_s30 }
  0x1d   : > { %p161_p9 = scmp.eq.s32.totalorder %s160_s10, 0  ;;  %p171_p11 = scmp.eq.s32.totalorder %s2971_s16, 0 }
  0x1e   : > { %p2651_p12 = scmp.lt.s32.totalorder %s2971_s16, 5  ;;  %s394_s3 = sand.u32 1, %s2971_s16  }
  0x1f   : > { %s3135_s26 = scalar_select %p161_p9, %s2967_s15, %s163_s21  }
  0x20   : > { %p172_p13 = por %p171_p11, %p170_p10  ;;  %s396_s28 = sand.u32 1, %s2967_s15  }
  0x21   : > { %4037 = sst [smem:[#allocation29_spill]] %s3135_s26  ;;  %s2613_s23 = smul.u32 320, %s396_s28 }
  0x22   : > { %p3139_p0 = pnand %p2651_p12, %p172_p13  ;;  %s2614_s25 = smul.u32 320, %s2971_s16 }
  0x23   : > { %s398_s10 = scalar_lea.vmem [#allocation7], %s2613_s23  ;;  %s395_s21 = scalar_lea.sflag [#allocation8], %s394_s3 }
  0x24   : > { %s403_s22 = scalar_lea.hbm %s4013_s8, %s2614_s25  ;;  %s406_s29 = sshll.u32 %s398_s10, 4  ;;  %s407_s29 = int_to_ptr.vmem [resolvable:$true] %s406_s29 }
  0x25   : > { %s404_s20 = sshll.u32 %s403_s22, 4  ;;  %p2839_p3 = pneg %p3139_p0  ;;  %s405_s20 = int_to_ptr.hbm [resolvable:$true] %s404_s20 }
  0x26   : > { %s2835_s26 = sshra.s32 %s405_s20, 4  ;;  %s2842_s24 = scalar_lea.hbm %s4013_s8, 1600  ;;  %s2836_s26 = int_to_ptr.hbm [resolvable:$true] %s2835_s26 }
  0x27   : > { %s2837_s15 = scalar_lea.hbm %s2836_s26, 320  ;;  %p2843_p9 = scmp.lt.s32.totalorder %s2836_s26, %s4013_s8 }
  0x28   : > { %p2838_p2 = scmp.ne.s32.totalorder %s2836_s26, %s2837_s15  ;;  %p2844_p10 = scmp.lt.s32.totalorder %s2842_s24, %s2837_s15 }
  0x2a   : > { %p2840_p7 = pnand %p2839_p3, %p2838_p2  ;;  %p2845_p11 = por %p2844_p10, %p2843_p9 }
  0x2c   : > { %p2841_p8 = pneg %p2840_p7 }
  0x2e   : > { %p2846_p12 = pnand %p2845_p11, %p2841_p8 }
  0x30   : > { %2849 = shalt.err (!%p2846_p12)
}
  0x31   : > { %s4039_s3 = smov 4   ;;  %s4040_s23 = smov 64  }
  0x32   : > { %2647 = dma.hbm_to_vmem [thread:$0]  (!%p3139_p0), %s405_s20, 5120, %s407_s29, %s395_s21, %s4040_s23, %s4040_s23, %s4039_s3  }
  0x33   : > { %426 = sbr.rel (%p3088_p6) target bundleno = 1423 (0x58f), region = 68 }
  0x38   : > { %2934 = dma.done.wait (%p177_p1), [#allocation5], 256  }
  0x39   : > { %2936 = vsyncadd (%p177_p1), [#allocation5], 4294967040  ;;  %s433_s15 = sand.u32 1, %s3075_s17   ;;  %s435_s24 = sand.u32 1, %s2963_s30  }
  0x3a   : > { %s2615_s26 = smul.u32 320, %s435_s24  ;;  %s434_s12 = scalar_lea.sflag [#allocation8], %s433_s15 }
  0x3c   : > { %s3168_s27 = scalar_lea.vmem [#allocation7], %s2615_s26 }
  0x3d   : > { %2938 = dma.done.wait (%p3084_p5), %s434_s12, 5120  }
  0x3e   : > { %2940 = vsyncadd (%p3084_p5), %s434_s12, 4294962176 }
  0x3f   : > { %2942 = dma.done.wait (%p177_p1), [#allocation8], 1024  }
  0x40   : > { %2944 = vsyncadd (%p177_p1), [#allocation8], 4294966272 }
  0x41   : > { %2946 = dma.done.wait (%p177_p1), [#allocation11], 1024  }
  0x42   : > { %2948 = vsyncadd (%p177_p1), [#allocation11], 4294966272  ;;  %p489_p6 = scmp.lt.s32.totalorder %s3075_s17, 4 }
  0x43   : > { %498 = sbr.rel (%p2245_p4) target bundleno = 97 (0x61), region = 88 }
  0x44   : > { %s490_s19 = scalar_select %p489_p6, %s3075_s17, 4 }
  0x46   : > { %s2542_s29 = sshll.u32 %s490_s19, 4 }
  0x47   : > { %s3187_s22 = scalar_lea.vmem %s4014_s9, %s2542_s29 }
  0x48   : > { %v509_v0 = vld [vmem:[%s4005_s0] sm:$0xff]  ;;  %v511_v1 = vld [vmem:[%s4005_s0 + $0x8] sm:$0xff]  ;;  %v513_v2 = vld [vmem:[%s4005_s0 + $0x10] sm:$0xff] }
  0x49   : > { %510 = vst [vmem:[#allocation2 + $0x30] sm:$0xff] %v509_v0  ;;  %v515_v3 = vld [vmem:[%s4005_s0 + $0x18] sm:$0xff]  ;;  %v517_v4 = vld [vmem:[%s4005_s0 + $0x20] sm:$0xff]  ;;  %v519_v5 = vld [vmem:[%s4005_s0 + $0x28] sm:$0xff] }
  0x4a   : > { %512 = vst [vmem:[#allocation2] sm:$0xff] %v511_v1  ;;  %v521_v6 = vld [vmem:[%s4005_s0 + $0x30] sm:$0xff]  ;;  %v523_v7 = vld [vmem:[%s4005_s0 + $0x38] sm:$0xff]  ;;  %v525_v8 = vld [vmem:[%s4005_s0 + $0x40] sm:$0xff] }
  0x4b   : > { %514 = vst [vmem:[#allocation2 + $0x58] sm:$0xff] %v513_v2  ;;  %v527_v9 = vld [vmem:[%s4005_s0 + $0x48] sm:$0xff]  ;;  %v529_v10 = vld [vmem:[%s4005_s0 + $0x50] sm:$0xff]  ;;  %v531_v11 = vld [vmem:[%s4005_s0 + $0x58] sm:$0xff] }
  0x4c   : > { %516 = vst [vmem:[#allocation2 + $0x18] sm:$0xff] %v515_v3  ;;  %v533_v12 = vld [vmem:[%s4005_s0 + $0x60] sm:$0xff]  ;;  %v535_v13 = vld [vmem:[%s4005_s0 + $0x68] sm:$0xff]  ;;  %v537_v14 = vld [vmem:[%s4005_s0 + $0x70] sm:$0xff] }
  0x4d   : > { %518 = vst [vmem:[#allocation2 + $0x50] sm:$0xff] %v517_v4  ;;  %v539_v15 = vld [vmem:[%s4005_s0 + $0x78] sm:$0xff] }
  0x4e   : > { %520 = vst [vmem:[#allocation2 + $0x68] sm:$0xff] %v519_v5 }
  0x4f   : > { %522 = vst [vmem:[#allocation2 + $0x8] sm:$0xff] %v521_v6 }
  0x50   : > { %524 = vst [vmem:[#allocation2 + $0x48] sm:$0xff] %v523_v7 }
  0x51   : > { %526 = vst [vmem:[#allocation2 + $0x40] sm:$0xff] %v525_v8 }
  0x52   : > { %528 = vst [vmem:[#allocation2 + $0x20] sm:$0xff] %v527_v9 }
  0x53   : > { %530 = vst [vmem:[#allocation2 + $0x10] sm:$0xff] %v529_v10 }
  0x54   : > { %532 = vst [vmem:[#allocation2 + $0x38] sm:$0xff] %v531_v11 }
  0x55   : > { %534 = vst [vmem:[#allocation2 + $0x60] sm:$0xff] %v533_v12 }
  0x56   : > { %536 = vst [vmem:[#allocation2 + $0x70] sm:$0xff] %v535_v13 }
  0x57   : > { %538 = vst [vmem:[#allocation2 + $0x78] sm:$0xff] %v537_v14 }
  0x58   : > { %540 = vst [vmem:[#allocation2 + $0x28] sm:$0xff] %v539_v15 }
  0x59   : > { %546 = vsyncadd [#allocation13], 2048 }
  0x5a   : > { %2949 = dma.done.wait [#allocation13], 2048 }
  0x5b   : > { %2950 = vsyncadd [#allocation13], 4294965248 }
  0x5c   : > { %s557_s28 = sshll.u32 %s4006_s1, 4  ;;  %s2978_s16 = smov [#allocation3]   ;;  %s558_s28 = int_to_ptr.hbm [resolvable:$true] %s557_s28 }
  0x5d   : > { %s559_s14 = sshll.u32 %s2978_s16, 4  ;;  %s560_s14 = int_to_ptr.vmem [resolvable:$true] %s559_s14 }
  0x5e   : > { %562 = dma.hbm_to_vmem [thread:$0]  %s558_s28, 512, %s560_s14, [#allocation15] }
  0x5f   : > { %2951 = dma.done.wait [#allocation15], 512 }
  0x60   : > { %2952 = vsyncadd [#allocation15], 4294966784 }
  0x61 PF: > { %v2552_v16 = vld [vmem:[%s3168_s27 + $0x38] sm:$0xff]  ;;  %v2551_v17 = vld [vmem:[%s3168_s27 + $0x30] sm:$0xff]  ;;  %v2550_v18 = vld [vmem:[%s3168_s27 + $0x28] sm:$0xff]  ;;  %p2473_p1 = scmp.ne.s32.totalorder %s3075_s17, 4 }
  0x62   : > { %717 = vmatpush.bf16.msra.mxu1 %v2552_v16  ;;  %v2549_v19 = vld [vmem:[%s3168_s27 + $0x20] sm:$0xff]  ;;  %v2548_v20 = vld [vmem:[%s3168_s27 + $0x18] sm:$0xff]  ;;  %v2547_v21 = vld [vmem:[%s3168_s27 + $0x10] sm:$0xff] }
  0x63   : > { %v2546_v22 = vld [vmem:[%s3168_s27 + $0x8] sm:$0xff]  ;;  %v2545_v23 = vld [vmem:[%s3168_s27] sm:$0xff]  ;;  %v567_v25 = vld [vmem:[#allocation2] sm:$0xff] }
  0x64   : > { %v566_v24 = vld [vmem:[#allocation2 + $0x30] sm:$0xff]  ;;  %v568_v27 = vld [vmem:[#allocation2 + $0x58] sm:$0xff]  ;;  %v581_v31 = vld [vmem:[#allocation2 + $0x28] sm:$0xff] }
  0x65   : > { %v3250_v26 = vpack.c.bf16 %v567_v25, %v566_v24  ;;  %v569_v28 = vld [vmem:[#allocation2 + $0x18] sm:$0xff]  ;;  %v570_v33 = vld [vmem:[#allocation2 + $0x50] sm:$0xff]  ;;  %v571_v34 = vld [vmem:[#allocation2 + $0x68] sm:$0xff] }
  0x66   : > { %718 = vmatpush.bf16.msra.mxu1 %v2551_v17  ;;  %v3253_v29 = vpack.c.bf16 %v569_v28, %v568_v27  ;;  %v580_v30 = vld [vmem:[#allocation2 + $0x78] sm:$0xff]  ;;  %v3259_v35 = vpack.c.bf16 %v571_v34, %v570_v33  ;;  %v578_v36 = vld [vmem:[#allocation2 + $0x60] sm:$0xff]  ;;  %v579_v37 = vld [vmem:[#allocation2 + $0x70] sm:$0xff] }
  0x67   : > { %v3256_v32 = vpack.c.bf16 %v581_v31, %v580_v30  ;;  %v576_v38 = vld [vmem:[#allocation2 + $0x10] sm:$0xff]  ;;  %v3262_v39 = vpack.c.bf16 %v579_v37, %v578_v36  ;;  %v577_v40 = vld [vmem:[#allocation2 + $0x38] sm:$0xff]  ;;  %v574_v42 = vld [vmem:[#allocation2 + $0x40] sm:$0xff] }
  0x68   : > { %v3265_v41 = vpack.c.bf16 %v577_v40, %v576_v38  ;;  %v575_v43 = vld [vmem:[#allocation2 + $0x20] sm:$0xff]  ;;  %v572_v44 = vld [vmem:[#allocation2 + $0x8] sm:$0xff]  ;;  %v2560_v62 = vld [vmem:[%s3168_s27 + $0x68] sm:$0xff] }
  0x69   : > { %632 = vmatpush.bf16.msra.mxu0 %v3256_v32  ;;  %v573_v45 = vld [vmem:[#allocation2 + $0x48] sm:$0xff]  ;;  %v3268_v46 = vpack.c.bf16 %v575_v43, %v574_v42  ;;  %v2543_v48 = vld [vmem:[#allocation4] sm:$0xff]  ;;  %v2559_v63 = vld [vmem:[%s3168_s27 + $0x60] sm:$0xff] }
  0x6a   : > { %719 = vmatpush.bf16.msra.mxu1 %v2550_v18  ;;  %v3271_v47 = vpack.c.bf16 %v573_v45, %v572_v44  ;;  %v2544_v49 = vld [vmem:[#allocation4 + $0x8] sm:$0xff]  ;;  %v2561_v60 = vld [vmem:[%s3168_s27 + $0x70] sm:$0xff]  ;;  %v2556_v6 = vld [vmem:[%s3168_s27 + $0x48] sm:$0xff] }
  0x6b   : > { %v2562_v59 = vld [vmem:[%s3168_s27 + $0x78] sm:$0xff]  ;;  %v2557_v3 = vld [vmem:[%s3168_s27 + $0x50] sm:$0xff]  ;;  %v2555_v7 = vld [vmem:[%s3168_s27 + $0x40] sm:$0xff] }
  0x6c   : > { %842 = vmatpush.bf16.msra.mxu3 %v2562_v59  ;;  %v2558_v2 = vld [vmem:[%s3168_s27 + $0x58] sm:$0xff]  ;;  %v2569_v17 = vld [vmem:[%s3168_s27 + $0xb0] sm:$0xff]  ;;  %v599_v27 = vld [vmem:[%s4011_s6 + $0x18] sm:$0xff] }
  0x6d   : > { %633 = vmatpush.bf16.msra.mxu0 %v3262_v39  ;;  %v2570_v16 = vld [vmem:[%s3168_s27 + $0xb8] sm:$0xff]  ;;  %v2565_v25 = vld [vmem:[%s3168_s27 + $0x90] sm:$0xff]  ;;  %v2564_v31 = vld [vmem:[%s3168_s27 + $0x88] sm:$0xff] }
  0x6e   : > { %720 = vmatpush.bf16.msra.mxu1 %v2549_v19  ;;  %v2568_v19 = vld [vmem:[%s3168_s27 + $0xa8] sm:$0xff]  ;;  %v2566_v24 = vld [vmem:[%s3168_s27 + $0x98] sm:$0xff]  ;;  %v596_v28 = vld [vmem:[%s4011_s6] sm:$0xff] }
  0x6f   : > { %v2563_v33 = vld [vmem:[%s3168_s27 + $0x80] sm:$0xff]  ;;  %v603_v34 = vld [vmem:[%s4011_s6 + $0x38] sm:$0xff]  ;;  %v597_v36 = vld [vmem:[%s4011_s6 + $0x8] sm:$0xff] }
  0x70   : > { %843 = vmatpush.bf16.msra.mxu3 %v2561_v60  ;;  %v3345_v38 = vld [vmem:[#allocation3] sm:$0xff]  ;;  %v3347_v40 = vld [vmem:[#allocation3 + $0x8] sm:$0xff]  ;;  %v602_v45 = vld [vmem:[%s4011_s6 + $0x30] sm:$0xff] }
  0x71   : > { %634 = vmatpush.bf16.msra.mxu0 %v3265_v41  ;;  %v594_v43 = vpack.c.bf16 %v3347_v40, %v3345_v38  ;;  %v600_v59 = vld [vmem:[%s4011_s6 + $0x20] sm:$0xff] }
  0x72   : > { %721 = vmatpush.bf16.msra.mxu1 %v2548_v20  ;;  %v2567_v20 = vld [vmem:[%s3168_s27 + $0xa0] sm:$0xff] }
  0x74   : > { %844 = vmatpush.bf16.msra.mxu3 %v2560_v62  ;;  %v605_v62 = vld [vmem:[%s4011_s6 + $0x48] sm:$0xff] }
  0x75   : > { %635 = vmatpush.bf16.msra.mxu0 %v3268_v46 }
  0x76   : > { %722 = vmatpush.bf16.msra.mxu1 %v2547_v21  ;;  %v598_v21 = vld [vmem:[%s4011_s6 + $0x10] sm:$0xff] }
  0x78   : > { %845 = vmatpush.bf16.msra.mxu3 %v2559_v63  ;;  %v609_v63 = vld [vmem:[%s4011_s6 + $0x68] sm:$0xff] }
  0x79   : > { %636 = vmatpush.bf16.msra.mxu0 %v3271_v47 }
  0x7a   : > { %723 = vmatpush.bf16.msra.mxu1 %v2546_v22 }
  0x7c   : > { %846 = vmatpush.bf16.msra.mxu3 %v2558_v2  ;;  %v3367_v2 = vld [vmem:[#allocation3 + $0x10] sm:$0xff] }
  0x7d   : > { %637 = vmatpush.bf16.msra.mxu0 %v3259_v35 }
  0x7e   : > { %724 = vmatpush.bf16.msra.mxu1 %v2545_v23  ;;  %v2979_v23 = vmov 0  }
  0x7f   : > { %2698 = vset.pattern.permute.xlu1 %v2979_v23  ;;  %2697 = vset.pattern.permute.xlu0 %v2979_v23 }
  0x80   : > { %847 = vmatpush.bf16.msra.mxu3 %v2557_v3  ;;  %1427 = vperm.xlu1 %2698, %v598_v21   ;;  %v3369_v3 = vld [vmem:[#allocation3 + $0x18] sm:$0xff] }
  0x81   : > { %725 = vmatmul.bf16.vlgmr.msra.gmra.mxu1 %v3250_v26  ;;  %638 = vmatpush.bf16.msra.mxu0 %v3253_v29  ;;  %v2572_v21 = vld [vmem:[%s3168_s27 + $0xc8] sm:$0xff] }
  0x82   : > { %2699 = vset.pattern.permute.xlu2 %v2979_v23  ;;  %1417 = vperm.xlu0 %2697, %v596_v28  }
  0x83   : > { %1437 = vperm.xlu2 %2699, %v600_v59  }
  0x84   : > { %848 = vmatpush.bf16.msra.mxu3 %v2556_v6  ;;  %v608_v6 = vld [vmem:[%s4011_s6 + $0x60] sm:$0xff] }
  0x85   : > { %639 = vmatpush.bf16.msra.mxu0 %v3250_v26 }
  0x88   : > { %640 = vmatmul.bf16.vlgmr.msra.gmra.mxu0 %v2543_v48  ;;  %849 = vmatpush.bf16.msra.mxu3 %v2555_v7  ;;  %v606_v48 = vld [vmem:[%s4011_s6 + $0x50] sm:$0xff]  ;;  %v612_v7 = vld [vmem:[%s4012_s7] sm:$0xff] }
  0x89   : > { %956 = vmatpush.bf16.msrb.mxu0 %v2570_v16  ;;  %1432 = vperm.xlu1 %2698, %v599_v27   ;;  %v2577_v16 = vld [vmem:[%s3168_s27 + $0xf0] sm:$0xff] }
  0x8a   : > { %1422 = vperm.xlu0 %2697, %v597_v36  }
  0x8d   : > { %957 = vmatpush.bf16.msrb.mxu0 %v2569_v17  ;;  %v2576_v17 = vld [vmem:[%s3168_s27 + $0xe8] sm:$0xff] }
  0x91   : > { %730 = vmatmul.bf16.gmra.mxu1 %v3253_v29  ;;  %958 = vmatpush.bf16.msrb.mxu0 %v2568_v19  ;;  %v2574_v19 = vld [vmem:[%s3168_s27 + $0xd8] sm:$0xff] }
  0x92   : > { %1452 = vperm.xlu1 %2698, %v603_v34   ;;  %1447 = vperm.xlu0 %2697, %v602_v45  }
  0x95   : > { %959 = vmatpush.bf16.msrb.mxu0 %v2567_v20  ;;  %v2573_v20 = vld [vmem:[%s3168_s27 + $0xd0] sm:$0xff] }
  0x98   : > { %645 = vmatmul.bf16.gmra.mxu0 %v2544_v49 }
  0x99   : > { %960 = vmatpush.bf16.msrb.mxu0 %v2566_v24 }
  0x9a   : > { %1467 = vperm.xlu1 %2698, %v606_v48   ;;  %1462 = vperm.xlu0 %2697, %v605_v62   ;;  %v2700_v48 = vld [vmem:[%s3187_s22] ss:$0 sm:$0xff] }
  0x9d   : > { %961 = vmatpush.bf16.msrb.mxu0 %v2565_v25 }
  0xa1   : > { %735 = vmatmul.bf16.gmra.mxu1 %v3259_v35  ;;  %962 = vmatpush.bf16.msrb.mxu0 %v2564_v31 }
  0xa2   : > { %1482 = vperm.xlu1 %2698, %v609_v63   ;;  %1477 = vperm.xlu0 %2697, %v608_v6  }
  0xa5   : > { %963 = vmatpush.bf16.msrb.mxu0 %v2563_v33 }
  0xa8   : > { %964 = vmatmul.bf16.vlgmr.msrb.gmra.mxu0 %v594_v43 }
  0xaa   : > { %1642 = vperm.xlu1 %2698, %v612_v7  }
  0xb1   : > { %740 = vmatmul.bf16.gmra.mxu1 %v3271_v47 }
  0xc1   : > { %745 = vmatmul.bf16.gmra.mxu1 %v3268_v46 }
  0xd1   : > { %750 = vmatmul.bf16.gmra.mxu1 %v3265_v41 }
  0xe1   : > { %755 = vmatmul.bf16.gmra.mxu1 %v3262_v39 }
  0xf1   : > { %760 = vmatmul.bf16.gmra.mxu1 %v3256_v32 }
  0xf2   : > { %v3444_v24 = vpop.permute.xlu1 %1427 }
  0xf4   : > { %v3440_v23 = vpop.permute.xlu0 %1417 }
  0xfc   : > { %v3446_v27 = vpop.permute.xlu0 %1422 }
  0xfe   : > { %v3282_v50 = vpop.f32.mrf.mxu1 }
 0x104   : > { %v3453_v33 = vpop.permute.xlu0 %1447 }
 0x105   : > { %v641_v4 = vpop.f32.mrf.mxu0 }
 0x106   : > { %v3284_v51 = vpop.f32.mrf.mxu1 }
 0x107   : > { %v770_v52 = vpack.c.bf16 %v3284_v51, %v3282_v50  ;;  %v614_v50 = vld [vmem:[%s4012_s7 + $0x10] sm:$0xff] }
 0x108   : > { %v2583_v51 = vld [vmem:[%s3168_s27 + $0x120] sm:$0xff] }
 0x10d   : > { %v643_v8 = vpop.f32.mrf.mxu0 }
 0x10e   : > { %v3288_v53 = vpop.f32.mrf.mxu1  ;;  %v3316_v9 = vpack.c.bf16 %v643_v8, %v641_v4  ;;  %v595_v4 = vpack.c.bf16 %v3369_v3, %v3367_v2  ;;  %v2554_v8 = vld [vmem:[%s4007_s2 + $0x8] sm:$0xff] }
 0x110   : > { %850 = vmatmul.bf16.vlgmr.msra.gmra.mxu3 %v3316_v9  ;;  %969 = vmatmul.bf16.gmra.mxu0 %v595_v4 }
 0x115   : > { %v646_v11 = vpop.f32.mrf.mxu0 }
 0x116   : > { %v3290_v54 = vpop.f32.mrf.mxu1 }
 0x117   : > { %v771_v55 = vpack.c.bf16 %v3290_v54, %v3288_v53  ;;  %v2585_v53 = vld [vmem:[%s3168_s27 + $0x130] sm:$0xff]  ;;  %v607_v54 = vld [vmem:[%s4011_s6 + $0x58] sm:$0xff] }
 0x11d   : > { %v648_v13 = vpop.f32.mrf.mxu0 }
 0x11e   : > { %v3294_v56 = vpop.f32.mrf.mxu1  ;;  %v3319_v14 = vpack.c.bf16 %v648_v13, %v646_v11  ;;  %v613_v11 = vld [vmem:[%s4012_s7 + $0x8] sm:$0xff]  ;;  %v2579_v13 = vld [vmem:[%s3168_s27 + $0x100] sm:$0xff] }
 0x120   : > { %855 = vmatmul.bf16.gmra.mxu3 %v3319_v14 }
 0x126   : > { %v3296_v57 = vpop.f32.mrf.mxu1 }
 0x127   : > { %v772_v58 = vpack.c.bf16 %v3296_v57, %v3294_v56  ;;  %v2553_v56 = vld [vmem:[%s4007_s2] sm:$0xff]  ;;  %v2584_v57 = vld [vmem:[%s3168_s27 + $0x128] sm:$0xff] }
 0x12e   : > { %v3302_v61 = vpop.f32.mrf.mxu1 }
 0x136   : > { %v3306_v0 = vpop.f32.mrf.mxu1 }
 0x137   : > { %v773_v1 = vpack.c.bf16 %v3306_v0, %v3302_v61  ;;  %v2586_v61 = vld [vmem:[%s3168_s27 + $0x138] sm:$0xff]  ;;  %v604_v0 = vld [vmem:[%s4011_s6 + $0x40] sm:$0xff] }
 0x13e   : > { %v3312_v5 = vpop.f32.mrf.mxu1 }
 0x146   : > { %v748_v10 = vpop.f32.mrf.mxu1 }
 0x147   : > { %v774_v60 = vpack.c.bf16 %v748_v10, %v3312_v5  ;;  %v601_v5 = vld [vmem:[%s4011_s6 + $0x28] sm:$0xff]  ;;  %v2581_v10 = vld [vmem:[%s3168_s27 + $0x110] sm:$0xff] }
 0x148   : > { %1442 = vperm.xlu2 %2699, %v601_v5  }
 0x14e   : > { %v751_v12 = vpop.f32.mrf.mxu1 }
 0x150   : > { %1457 = vperm.xlu2 %2699, %v604_v0  }
 0x156   : > { %v753_v15 = vpop.f32.mrf.mxu1 }
 0x157   : > { %v775_v49 = vpack.c.bf16 %v753_v15, %v751_v12  ;;  %v2580_v12 = vld [vmem:[%s3168_s27 + $0x108] sm:$0xff]  ;;  %v2578_v15 = vld [vmem:[%s3168_s27 + $0xf8] sm:$0xff] }
 0x158   : > { %1472 = vperm.xlu2 %2699, %v607_v54   ;;  %1127 = vmatpush.bf16.msra.mxu2 %v2578_v15 }
 0x15c   : > { %1128 = vmatpush.bf16.msra.mxu2 %v2577_v16 }
 0x15e   : > { %v756_v18 = vpop.f32.mrf.mxu1 }
 0x160   : > { %1129 = vmatpush.bf16.msra.mxu2 %v2576_v17 }
 0x166   : > { %v758_v22 = vpop.f32.mrf.mxu1 }
 0x167   : > { %v776_v44 = vpack.c.bf16 %v758_v22, %v756_v18  ;;  %v2575_v18 = vld [vmem:[%s3168_s27 + $0xe0] sm:$0xff] }
 0x168   : > { %1130 = vmatpush.bf16.msra.mxu2 %v2575_v18  ;;  %v2571_v22 = vld [vmem:[%s3168_s27 + $0xc0] sm:$0xff] }
 0x16c   : > { %1131 = vmatpush.bf16.msra.mxu2 %v2574_v19 }
 0x16e   : > { %v761_v30 = vpop.f32.mrf.mxu1 }
 0x170   : > { %1132 = vmatpush.bf16.msra.mxu2 %v2573_v20 }
 0x174   : > { %1133 = vmatpush.bf16.msra.mxu2 %v2572_v21 }
 0x176   : > { %v763_v37 = vpop.f32.mrf.mxu1 }
 0x177   : > { %v777_v42 = vpack.c.bf16 %v763_v37, %v761_v30  ;;  %v3451_v30 = vpop.permute.xlu1 %1432  ;;  %v3460_v37 = vpop.permute.xlu0 %1462 }
 0x178   : > { %1134 = vmatpush.bf16.msra.mxu2 %v2571_v22 }
 0x179   : > { %873 = vmatpush.bf16.msrb.mxu3 %v777_v42  ;;  %v965_v42 = vpop.f32.mrf.mxu0 }
 0x17b   : > { %1135 = vmatmul.bf16.vlgmr.msra.gmra.mxu2 %v3250_v26 }
 0x17d   : > { %874 = vmatpush.bf16.msrb.mxu3 %v776_v44 }
 0x17f   : > { %v3457_v34 = vpop.permute.xlu1 %1452 }
 0x181   : > { %875 = vmatpush.bf16.msrb.mxu3 %v775_v49  ;;  %v3467_v49 = vpop.permute.xlu0 %1477  ;;  %v967_v62 = vpop.f32.mrf.mxu0 }
 0x185   : > { %876 = vmatpush.bf16.msrb.mxu3 %v774_v60 }
 0x189   : > { %877 = vmatpush.bf16.msrb.mxu3 %v773_v1  ;;  %v611_v1 = vld [vmem:[%s4011_s6 + $0x78] sm:$0xff] }
 0x18a   : > { %1492 = vperm.xlu0 %2697, %v611_v1  }
 0x18b   : > { %1140 = vmatmul.bf16.gmra.mxu2 %v3253_v29  ;;  %v3464_v29 = vpop.permute.xlu1 %1467 }
 0x18d   : > { %878 = vmatpush.bf16.msrb.mxu3 %v772_v58  ;;  %v2582_v58 = vld [vmem:[%s3168_s27 + $0x118] sm:$0xff] }
 0x191   : > { %879 = vmatpush.bf16.msrb.mxu3 %v771_v55  ;;  %v615_v55 = vld [vmem:[%s4012_s7 + $0x18] sm:$0xff] }
 0x192   : > { %1657 = vperm.xlu1 %2698, %v615_v55   ;;  %1652 = vperm.xlu0 %2697, %v614_v50  }
 0x193   : > { %v3474_v5 = vpop.permute.xlu1 %1482 }
 0x195   : > { %880 = vmatpush.bf16.msrb.mxu3 %v770_v52  ;;  %v610_v52 = vld [vmem:[%s4011_s6 + $0x70] sm:$0xff] }
 0x196   : > { %1487 = vperm.xlu2 %2699, %v610_v52  }
 0x198   : > { %881 = vmatmul.bf16.vlgmr.msrb.gmra.mxu3 %v2553_v56 }
 0x199   : > { %1242 = vmatpush.bf16.msra.mxu3 %v2586_v61 }
 0x19b   : > { %1145 = vmatmul.bf16.gmra.mxu2 %v3259_v35 }
 0x19d   : > { %1243 = vmatpush.bf16.msra.mxu3 %v2585_v53  ;;  %v970_v53 = vpop.f32.mrf.mxu0 }
 0x19e   : > { %1647 = vperm.xlu2 %2699, %v613_v11  }
 0x1a1   : > { %1244 = vmatpush.bf16.msra.mxu3 %v2584_v57 }
 0x1a5   : > { %1245 = vmatpush.bf16.msra.mxu3 %v2583_v51  ;;  %v3484_v51 = vpop.permute.xlu1 %1642  ;;  %v972_v20 = vpop.f32.mrf.mxu0 }
 0x1a8   : > { %886 = vmatmul.bf16.gmra.mxu3 %v2554_v8 }
 0x1a9   : > { %1246 = vmatpush.bf16.msra.mxu3 %v2582_v58 }
 0x1ab   : > { %1150 = vmatmul.bf16.gmra.mxu2 %v3271_v47 }
 0x1ad   : > { %1247 = vmatpush.bf16.msra.mxu3 %v2581_v10 }
 0x1b1   : > { %1248 = vmatpush.bf16.msra.mxu3 %v2580_v12 }
 0x1b5   : > { %1249 = vmatpush.bf16.msra.mxu3 %v2579_v13 }
 0x1b8   : > { %1250 = vmatmul.bf16.vlgmr.msra.gmra.mxu3 %v3316_v9  ;;  %v851_v9 = vpop.f32.mrf.mxu3 }
 0x1bb   : > { %1155 = vmatmul.bf16.gmra.mxu2 %v3268_v46 }
 0x1c0   : > { %v853_v25 = vpop.f32.mrf.mxu3 }
 0x1c8   : > { %1255 = vmatmul.bf16.gmra.mxu3 %v3319_v14  ;;  %v3442_v14 = vpop.permute.xlu2 %1437  ;;  %v856_v31 = vpop.f32.mrf.mxu3 }
 0x1cb   : > { %1160 = vmatmul.bf16.gmra.mxu2 %v3265_v41 }
 0x1d0   : > { %v3449_v28 = vpop.permute.xlu2 %1442  ;;  %v858_v36 = vpop.f32.mrf.mxu3 }
 0x1d8   : > { %v3455_v26 = vpop.permute.xlu2 %1457 }
 0x1db   : > { %1165 = vmatmul.bf16.gmra.mxu2 %v3262_v39 }
 0x1e0   : > { %v3462_v43 = vpop.permute.xlu2 %1472 }
 0x1eb   : > { %1170 = vmatmul.bf16.gmra.mxu2 %v3256_v32 }
 0x1f0   : > { %v3472_v63 = vpop.permute.xlu2 %1487 }
 0x1f8   : > { %v3482_v57 = vpop.permute.xlu2 %1647 }
 0x1fc   : > { %v3477_v61 = vpop.permute.xlu0 %1492 }
 0x204   : > { %v3490_v8 = vpop.permute.xlu0 %1652 }
 0x21b   : > { %v882_v44 = vpop.f32.mrf.mxu3 }
 0x21c   : > { %v883_v45 = vadd.f32 %v882_v44, %v851_v9 }
 0x21e   : > { %v975_v59 = vadd.f32 %v965_v42, %v883_v45 }
 0x220   : > { %v3469_v60 = vadd.f32 %v2700_v48, %v975_v59 }
 0x222   : > { %v985_v6 = vsub.f32 0.0, %v3469_v60  ;;  %v1660_v12 = vmul.f32 %v3484_v51, %v3469_v60 }
 0x223   : > { %v884_v35 = vpop.f32.mrf.mxu3 }
 0x224   : > { %v885_v4 = vadd.f32 %v884_v35, %v853_v25  ;;  %v989_v1 = vmul.f32 1.442695, %v985_v6  ;;  %v1674_v46 = vmul.f32 %v1660_v12, %v1660_v12  ;;  %v3502_v25 = vpop.permute.xlu1 %1657 }
 0x226   : > { %v976_v7 = vadd.f32 %v967_v62, %v885_v4  ;;  %2703 = vpow2.f32 %v989_v1 }
 0x228   : > { %v3479_v0 = vadd.f32 %v2700_v48, %v976_v7 }
 0x22a   : > { %v986_v56 = vsub.f32 0.0, %v3479_v0  ;;  %v1661_v58 = vmul.f32 %v3482_v57, %v3479_v0 }
 0x22b   : > { %v887_v54 = vpop.f32.mrf.mxu3 }
 0x22c   : > { %v991_v55 = vmul.f32 1.442695, %v986_v56  ;;  %v888_v47 = vadd.f32 %v887_v54, %v856_v31  ;;  %v2704_v11 = vpop.eup %2703  ;;  %v1675_v19 = vmul.f32 %v1661_v58, %v1661_v58  ;;  %v1664_v31 = vadd.f32 %v1661_v58, %v1660_v12 }
 0x22d   : > { %v3498_v21 = vadd.f32 1.0, %v2704_v11 }
 0x22e   : > { %2705 = vpow2.f32 %v991_v55  ;;  %v977_v50 = vadd.f32 %v970_v53, %v888_v47  ;;  %v1678_v45 = vadd.f32 %v1675_v19, %v1674_v46 }
 0x22f   : > { %vm1006_vm0 = vweird.f32 %v3498_v21 }
 0x230   : > { %v3486_v52 = vadd.f32 %v2700_v48, %v977_v50 }
 0x232   : > { %v987_v10 = vsub.f32 0.0, %v3486_v52  ;;  %v1662_v17 = vmul.f32 %v3490_v8, %v3486_v52 }
 0x233   : > { %v889_v13 = vpop.f32.mrf.mxu3 }
 0x234   : > { %v2706_v15 = vpop.eup %2705  ;;  %v993_v16 = vmul.f32 1.442695, %v987_v10  ;;  %v890_v18 = vadd.f32 %v889_v13, %v858_v36  ;;  %v1676_v42 = vmul.f32 %v1662_v17, %v1662_v17  ;;  %v1665_v59 = vadd.f32 %v1664_v31, %v1662_v17 }
 0x235   : > { %v3500_v9 = vadd.f32 1.0, %v2706_v15 }
 0x236   : > { %2707 = vpow2.f32 %v993_v16  ;;  %v978_v22 = vadd.f32 %v972_v20, %v890_v18  ;;  %v1679_v6 = vadd.f32 %v1678_v45, %v1676_v42 }
 0x237   : > { %2709 = vrcp.f32 %v3498_v21  ;;  %vm1021_vm2 = vweird.f32 %v3500_v9 }
 0x238   : > { %v3504_v44 = vadd.f32 %v2700_v48, %v978_v22  ;;  %2711 = vrcp.f32 %v3500_v9 }
 0x23a   : > { %v988_v36 = vsub.f32 0.0, %v3504_v44  ;;  %v1663_v62 = vmul.f32 %v3502_v25, %v3504_v44 }
 0x23b   : > { %v3511_v35 = vpop.f32.mrf.mxu3 }
 0x23c   : > { %v2708_v4 = vpop.eup %2707  ;;  %v995_v7 = vmul.f32 1.442695, %v988_v36  ;;  %v1666_v1 = vadd.f32 %v1665_v59, %v1663_v62  ;;  %v1677_v56 = vmul.f32 %v1663_v62, %v1663_v62 }
 0x23d   : > { %v3513_v48 = vadd.f32 1.0, %v2708_v4  ;;  %v3516_v55 = vpop.eup %2709 }
 0x23e   : > { %2713 = vpow2.f32 %v995_v7  ;;  %v1667_v53 = vrot.slane %v1666_v1, 4  ;;  %v1680_v54 = vadd.f32 %v1679_v6, %v1677_v56  ;;  %v3518_v58 = vpop.eup %2711  ;;  %v1002_v20 = vmul.f32 %v3516_v55, %v3498_v21 }
 0x23f   : > { %2715 = vrcp.f32 %v3513_v48  ;;  %v1017_v17 = vmul.f32 %v3518_v58, %v3500_v9  ;;  %vm1007_vm1 = vweird.f32 %v3516_v55  ;;  %vm1022_vm4 = vweird.f32 %v3518_v58 }
 0x240   : > { %v1668_v47 = vadd.f32 %v1667_v53, %v1666_v1  ;;  %v1681_v50 = vrot.slane %v1680_v54, 4  ;;  %v1003_v36 = vsub.f32 1.0, %v1002_v20  ;;  %vm1036_vm5 = vweird.f32 %v3513_v48  ;;  %vm3571_vm8 = vmor %vm1021_vm2, %vm1022_vm4 }
 0x241   : > { %v1018_v45 = vsub.f32 1.0, %v1017_v17  ;;  %v1042_v17 = vand.u32 2147483648, %v3513_v48  ;;  %vm3583_vm11 = vmor %vm1006_vm0, %vm1007_vm1  ;;  %vm1323_vm0 = vcmask 261120  }
 0x242   : > { %v1669_v10 = vrot.slane %v1668_v47, 2  ;;  %v1682_v11 = vadd.f32 %v1681_v50, %v1680_v54  ;;  %v1010_v50 = vand.u32 2147483647, %v3498_v21 }
 0x243   : > { %v3521_v12 = vpop.f32.mrf.mxu3  ;;  %v1019_v53 = vmul.f32 %v3518_v58, %v1018_v45  ;;  %v1043_v39 = vor.u32 1.1754944e-38, %v1042_v17 }
 0x244   : > { %v2714_v13 = vpop.eup %2713  ;;  %v1670_v15 = vadd.f32 %v1669_v10, %v1668_v47  ;;  %v1683_v16 = vrot.slane %v1682_v11, 2  ;;  %v1004_v47 = vmul.f32 %v3516_v55, %v1003_v36  ;;  %vm1011_vm15 = vcmp.eq.f32.partialorder %v1010_v50, 8.507059e+37  ;;  %v2592_v50 = vld [vmem:[%s4009_s4 + $0x28] sm:$0xff] }
 0x245   : > { %v3525_v18 = vpop.eup %2715  ;;  %v3527_v19 = vadd.f32 1.0, %v2714_v13 }
 0x246   : > { %v1671_v22 = vrot.slane %v1670_v15, 1  ;;  %v1684_v46 = vadd.f32 %v1683_v16, %v1682_v11  ;;  %v1032_v41 = vmul.f32 %v3525_v18, %v3513_v48  ;;  %vm1037_vm3 = vweird.f32 %v3525_v18 }
 0x247   : > { %2717 = vrcp.f32 %v3527_v19  ;;  %v1040_v16 = vand.u32 2147483647, %v3513_v48  ;;  %vm3556_vm6 = vmor %vm1036_vm5, %vm1037_vm3  ;;  %v1055_v45 = vand.u32 2147483647, %v3527_v19  ;;  %vm1051_vm12 = vweird.f32 %v3527_v19 }
 0x248   : > { %v1672_v31 = vadd.f32 %v1671_v22, %v1670_v15  ;;  %v1685_v42 = vrot.slane %v1684_v46, 1  ;;  %v1033_v59 = vsub.f32 1.0, %v1032_v41  ;;  %v1025_v15 = vand.u32 2147483647, %v3500_v9 }
 0x249   : > { %v1020_v22 = vadd.f32 %v3518_v58, %v1019_v53  ;;  %v1005_v41 = vadd.f32 %v3516_v55, %v1004_v47  ;;  %vm1041_vm10 = vcmp.eq.f32.partialorder %v1040_v16, 8.507059e+37  ;;  %vm1056_vm14 = vcmp.eq.f32.partialorder %v1055_v45, 8.507059e+37 }
 0x24a   : > { %v3534_v62 = vmul.f32 0.03125, %v1672_v31  ;;  %v1686_v4 = vadd.f32 %v1685_v42, %v1684_v46  ;;  %v1034_v6 = vmul.f32 %v3525_v18, %v1033_v59  ;;  %v1027_v31 = vand.u32 2147483648, %v3500_v9  ;;  %v2701_v9 = vld [vmem:[%s3187_s22 + $0x2] ss:$0 sm:$0xff] }
 0x24b   : > { %v1256_v7 = vpop.f32.mrf.mxu3  ;;  %v1057_v59 = vand.u32 2147483648, %v3527_v19  ;;  %vm3575_vm9 = vcmp.eq.f32.partialorder %v1025_v15, 8.507059e+37  ;;  %v1024_v47 = vsel %vm3571_vm8, %v3518_v58, %v1020_v22 }
 0x24c   : > { %v1687_v1 = vmul.f32 0.03125, %v1686_v4  ;;  %v1688_v56 = vmul.f32 %v3534_v62, %v3534_v62  ;;  %v1035_v11 = vadd.f32 %v3525_v18, %v1034_v6  ;;  %v1012_v6 = vand.u32 2147483648, %v3498_v21 }
 0x24d   : > { %v2718_v54 = vpop.eup %2717  ;;  %v1058_v21 = vor.u32 1.1754944e-38, %v1057_v59  ;;  %v1257_v16 = vadd.f32 %v2701_v9, %v1256_v7 }
 0x24e   : > { %v1689_v10 = vsub.f32 %v1687_v1, %v1688_v56  ;;  %v1047_v13 = vmul.f32 %v2718_v54, %v3527_v19  ;;  %v1039_v48 = vsel %vm3556_vm6, %v3525_v18, %v1035_v11  ;;  %vm1052_vm7 = vweird.f32 %v2718_v54  ;;  %v1638_v56 = vld [vmem:[%s3187_s22 + $0x5] sm:$0x1] }
 0x24f   : > { %v1009_v11 = vsel %vm3583_vm11, %v3516_v55, %v1005_v41  ;;  %v1044_v15 = vsel %vm1041_vm10, %v1043_v39, %v1039_v48  ;;  %vm1053_vm13 = vmor %vm1051_vm12, %vm1052_vm7  ;;  %v1254_v19 = vadd.f32 %v2701_v9, %v3521_v12  ;;  %v2587_v12 = vld [vmem:[%s4009_s4] sm:$0xff] }
 0x250   : > { %v1690_v20 = vmax.f32 %v1689_v10, 0.0  ;;  %v1048_v46 = vsub.f32 1.0, %v1047_v13  ;;  %v1028_v13 = vor.u32 1.1754944e-38, %v1027_v31  ;;  %v1279_v42 = vmul.f32 %v1257_v16, %v1044_v15 }
 0x251   : > { %v1252_v31 = vadd.f32 %v2701_v9, %v3511_v35 }
 0x252   : > { %v1691_v36 = vadd.f32 3.125e-07, %v1690_v20  ;;  %v1049_v4 = vmul.f32 %v2718_v54, %v1048_v46  ;;  %v1013_v46 = vor.u32 1.1754944e-38, %v1012_v6  ;;  %v1029_v58 = vsel %vm3575_vm9, %v1028_v13, %v1024_v47 }
 0x253   : > { %v1258_v53 = vpop.f32.mrf.mxu3  ;;  %v1278_v48 = vmul.f32 %v1254_v19, %v1029_v58 }
 0x254   : > { %2719 = vrsqrt.f32 %v1691_v36  ;;  %v1050_v10 = vadd.f32 %v2718_v54, %v1049_v4  ;;  %v1259_v20 = vadd.f32 %v2701_v9, %v1258_v53  ;;  %v1014_v55 = vsel %vm1011_vm15, %v1013_v46, %v1009_v11  ;;  %v1639_v9 = vld [vmem:[%s3187_s22 + $0x6] sm:$0x1] }
 0x255   : > { %vm1698_vm2 = vweird.f32 %v1691_v36 }
 0x256   : > { %v1054_v17 = vsel %vm1053_vm13, %v2718_v54, %v1050_v10  ;;  %v1277_v54 = vmul.f32 %v1252_v31, %v1014_v55 }
 0x257   : > { %v1059_v22 = vsel %vm1056_vm14, %v1058_v21, %v1054_v17 }
 0x258   : > { %v1280_v4 = vmul.f32 %v1259_v20, %v1059_v22  ;;  %v1281_v6 = vpack.c.bf16 %v1278_v48, %v1277_v54 }
 0x25a   : > { %v2720_v41 = vpop.eup %2719  ;;  %v1282_v59 = vpack.c.bf16 %v1280_v4, %v1279_v42 }
 0x25b   : > { %v1693_v7 = vmul.f32 %v2720_v41, %v1691_v36  ;;  %vm1699_vm1 = vweird.f32 %v2720_v41 }
 0x25c   : > { %1354 = vmatpush.bf16.msra.mxu0 %v1282_v59  ;;  %2611 = vmatpush.bf16.msrb.mxu3 %v1282_v59  ;;  %vm1700_vm3 = vmor %vm1698_vm2, %vm1699_vm1 }
 0x25d   : > { %v1694_v45 = vmul.f32 %v2720_v41, %v1693_v7 }
 0x25f   : > { %v1695_v1 = vmul.f32 0.5, %v1694_v45 }
 0x260   : > { %1355 = vmatpush.bf16.msra.mxu0 %v1281_v6  ;;  %2612 = vmatpush.bf16.msrb.mxu3 %v1281_v6 }
 0x261   : > { %v1696_v35 = vsub.f32 1.5, %v1695_v1 }
 0x263   : > { %v1697_v39 = vmul.f32 %v2720_v41, %v1696_v35  ;;  %2465 = vmatmul.msk.bf16.vlgmr.msra.gmra.mxu0 %vm1323_vm0, %v2587_v12  ;;  %2470 = vmatmul.msk.bf16.vlgmr.msrb.gmra.mxu3 %vm1323_vm0, %v2592_v50  ;;  %v2589_v35 = vld [vmem:[%s4009_s4 + $0x10] sm:$0xff] }
 0x265   : > { %v1701_v53 = vsel %vm1700_vm3, %v2720_v41, %v1697_v39 }
 0x266   : > { %v1702_v18 = vmul.f32 %v1701_v53, %v1638_v56 }
 0x268   : > { %v1703_v47 = vmul.f32 %v1702_v18, %v3534_v62  ;;  %v1705_v10 = vperm.slane %v1702_v18, 0  ;;  %v2588_v62 = vld [vmem:[%s4009_s4 + $0x8] sm:$0xff] }
 0x26a   : > { %v1704_v11 = vsub.f32 %v1639_v9, %v1703_v47  ;;  %v1706_v13 = vmul.f32 %v1705_v10, %v3469_v60  ;;  %v1707_v15 = vmul.f32 %v1705_v10, %v3479_v0  ;;  %v1708_v32 = vmul.f32 %v1705_v10, %v3486_v52  ;;  %v2593_v60 = vld [vmem:[%s4009_s4 + $0x30] sm:$0xff] }
 0x26b   : > { %v1709_v36 = vmul.f32 %v1705_v10, %v3504_v44 }
 0x26c   : > { %v1710_v21 = vperm.slane %v1704_v11, 0 }
 0x26e   : > { %v3616_v16 = vadd.f32 %v1710_v21, %v1706_v13  ;;  %v3618_v17 = vadd.f32 %v1710_v21, %v1707_v15  ;;  %v3620_v20 = vadd.f32 %v1710_v21, %v1708_v32  ;;  %v3622_v46 = vadd.f32 %v1710_v21, %v1709_v36 }
 0x270   : > { %v1715_v0 = vmax.f32 %v3616_v16, 0.0  ;;  %v1716_v52 = vmax.f32 %v3618_v17, 0.0  ;;  %v1717_v44 = vmax.f32 %v3620_v20, 0.0  ;;  %v1718_v58 = vmax.f32 %v3622_v46, 0.0 }
 0x272   : > { %v1850_v22 = vmul.f32 %v1715_v0, %v3484_v51  ;;  %v1851_v19 = vmul.f32 %v1716_v52, %v3482_v57  ;;  %v1852_v42 = vmul.f32 %v1717_v44, %v3490_v8  ;;  %v1853_v4 = vmul.f32 %v1718_v58, %v3502_v25  ;;  %v2594_v25 = vld [vmem:[%s4009_s4 + $0x38] sm:$0xff] }
 0x273   : > { %2466 = vmatmul.msk.bf16.gmra.mxu0 %vm1323_vm0, %v2588_v62  ;;  %2471 = vmatmul.msk.bf16.gmra.mxu3 %vm1323_vm0, %v2593_v60  ;;  %v2590_v62 = vld [vmem:[%s4009_s4 + $0x18] sm:$0xff]  ;;  %v1136_v60 = vpop.f32.mrf.mxu2 }
 0x274   : > { %v1854_v55 = vadd.f32 %v1851_v19, %v1850_v22  ;;  %v1864_v41 = vmul.f32 %v1850_v22, %v1850_v22  ;;  %v1865_v31 = vmul.f32 %v1851_v19, %v1851_v19  ;;  %v1866_v48 = vmul.f32 %v1852_v42, %v1852_v42 }
 0x275   : > { %v1867_v57 = vmul.f32 %v1853_v4, %v1853_v4 }
 0x276   : > { %v1855_v51 = vadd.f32 %v1854_v55, %v1852_v42  ;;  %v1868_v59 = vadd.f32 %v1865_v31, %v1864_v41  ;;  %v1848_v31 = vld [vmem:[%s3187_s22 + $0x9] sm:$0x1] }
 0x278   : > { %v1856_v7 = vadd.f32 %v1855_v51, %v1853_v4  ;;  %v1869_v54 = vadd.f32 %v1868_v59, %v1866_v48  ;;  %v2591_v48 = vld [vmem:[%s4009_s4 + $0x20] sm:$0xff] }
 0x27a   : > { %v1857_v45 = vrot.slane %v1856_v7, 4  ;;  %v1870_v6 = vadd.f32 %v1869_v54, %v1867_v57  ;;  %v1849_v57 = vld [vmem:[%s3187_s22 + $0xa] sm:$0x1] }
 0x27b   : > { %v1138_v41 = vpop.f32.mrf.mxu2 }
 0x27c   : > { %v1858_v8 = vadd.f32 %v1857_v45, %v1856_v7  ;;  %v1871_v1 = vrot.slane %v1870_v6, 4 }
 0x27e   : > { %v1859_v12 = vrot.slane %v1858_v8, 2  ;;  %v1872_v50 = vadd.f32 %v1871_v1, %v1870_v6 }
 0x280   : > { %v1860_v56 = vadd.f32 %v1859_v12, %v1858_v8  ;;  %v1873_v39 = vrot.slane %v1872_v50, 2 }
 0x282   : > { %v1861_v53 = vrot.slane %v1860_v56, 1  ;;  %v1874_v18 = vadd.f32 %v1873_v39, %v1872_v50 }
 0x283   : > { %2467 = vmatmul.msk.bf16.gmra.mxu0 %vm1323_vm0, %v2589_v35  ;;  %2472 = vmatmul.msk.bf16.gmra.mxu3 %vm1323_vm0, %v2594_v25  ;;  %v1141_v1 = vpop.f32.mrf.mxu2 }
 0x284   : > { %v1862_v9 = vadd.f32 %v1861_v53, %v1860_v56  ;;  %v1875_v47 = vrot.slane %v1874_v18, 1 }
 0x286   : > { %v1863_v10 = vmul.f32 0.03125, %v1862_v9  ;;  %v1876_v11 = vadd.f32 %v1875_v47, %v1874_v18 }
 0x288   : > { %v1877_v13 = vmul.f32 0.03125, %v1876_v11  ;;  %v1878_v15 = vmul.f32 %v1863_v10, %v1863_v10 }
 0x28a   : > { %v1879_v32 = vsub.f32 %v1877_v13, %v1878_v15 }
 0x28b   : > { %v1143_v20 = vpop.f32.mrf.mxu2 }
 0x28c   : > { %v1880_v36 = vmax.f32 %v1879_v32, 0.0 }
 0x28e   : > { %v1881_v21 = vadd.f32 1e-05, %v1880_v36 }
 0x290   : > { %2721 = vrsqrt.f32 %v1881_v21  ;;  %vm1888_vm5 = vweird.f32 %v1881_v21 }
 0x293   : > { %2468 = vmatmul.msk.bf16.gmra.mxu0 %vm1323_vm0, %v2590_v62  ;;  %v1146_v46 = vpop.f32.mrf.mxu2 }
 0x296   : > { %v2722_v22 = vpop.eup %2721 }
 0x297   : > { %v1883_v19 = vmul.f32 %v2722_v22, %v1881_v21  ;;  %vm1889_vm4 = vweird.f32 %v2722_v22 }
 0x298   : > { %vm1890_vm6 = vmor %vm1888_vm5, %vm1889_vm4 }
 0x299   : > { %v1884_v42 = vmul.f32 %v2722_v22, %v1883_v19 }
 0x29b   : > { %v1885_v4 = vmul.f32 0.5, %v1884_v42 }
 0x29d   : > { %v1886_v55 = vsub.f32 1.5, %v1885_v4 }
 0x29f   : > { %v1887_v51 = vmul.f32 %v2722_v22, %v1886_v55 }
 0x2a1   : > { %v1891_v59 = vsel %vm1890_vm6, %v2722_v22, %v1887_v51  ;;  %v3683_v22 = vld [vmem:[%s3187_s22 + $0x1] ss:$0 sm:$0xff] }
 0x2a2   : > { %v1892_v7 = vmul.f32 %v1891_v59, %v1848_v31  ;;  %v1139_v19 = vadd.f32 %v3683_v22, %v1138_v41  ;;  %v1137_v55 = vadd.f32 %v3683_v22, %v1136_v60  ;;  %v1142_v31 = vadd.f32 %v3683_v22, %v1141_v1 }
 0x2a3   : > { %2469 = vmatmul.msk.bf16.gmra.mxu0 %vm1323_vm0, %v2591_v48  ;;  %v1147_v41 = vadd.f32 %v3683_v22, %v1146_v46 }
 0x2a4   : > { %v1893_v54 = vmul.f32 %v1892_v7, %v1863_v10  ;;  %v1895_v45 = vperm.slane %v1892_v7, 0  ;;  %v1144_v7 = vadd.f32 %v3683_v22, %v1143_v20 }
 0x2a6   : > { %v1894_v6 = vsub.f32 %v1849_v57, %v1893_v54  ;;  %v1896_v8 = vmul.f32 %v1895_v45, %v1715_v0  ;;  %v1897_v12 = vmul.f32 %v1895_v45, %v1716_v52  ;;  %v1898_v50 = vmul.f32 %v1895_v45, %v1717_v44  ;;  %v1148_v52 = vpop.f32.mrf.mxu2 }
 0x2a7   : > { %v1899_v35 = vmul.f32 %v1895_v45, %v1718_v58  ;;  %v1149_v1 = vadd.f32 %v3683_v22, %v1148_v52 }
 0x2a8   : > { %v1900_v25 = vperm.slane %v1894_v6, 0 }
 0x2aa   : > { %v1901_v56 = vadd.f32 %v1900_v25, %v1896_v8  ;;  %v1902_v39 = vadd.f32 %v1900_v25, %v1897_v12  ;;  %v1903_v53 = vadd.f32 %v1900_v25, %v1898_v50  ;;  %v1904_v18 = vadd.f32 %v1900_v25, %v1899_v35 }
 0x2ac   : > { %v1921_v9 = vadd.f32 %v1901_v56, %v3345_v38  ;;  %v1922_v16 = vadd.f32 %v1902_v39, %v3347_v40  ;;  %v1923_v0 = vadd.f32 %v1903_v53, %v3367_v2  ;;  %v1924_v17 = vadd.f32 %v1904_v18, %v3369_v3 }
 0x2ae   : > { %1941 = vst [vmem:[#allocation3] sm:$0xff] %v1921_v9  ;;  %v1151_v44 = vpop.f32.mrf.mxu2 }
 0x2af   : > { %1942 = vst [vmem:[#allocation3 + $0x8] sm:$0xff] %v1922_v16  ;;  %v1152_v25 = vadd.f32 %v3683_v22, %v1151_v44 }
 0x2b0   : > { %1943 = vst [vmem:[#allocation3 + $0x10] sm:$0xff] %v1923_v0 }
 0x2b1   : > { %1944 = vst [vmem:[#allocation3 + $0x18] sm:$0xff] %v1924_v17 }
 0x2b6   : > { %v1153_v58 = vpop.f32.mrf.mxu2 }
 0x2b7   : > { %v1154_v9 = vadd.f32 %v3683_v22, %v1153_v58 }
 0x2be   : > { %v1156_v10 = vpop.f32.mrf.mxu2 }
 0x2bf   : > { %v1157_v46 = vadd.f32 %v3683_v22, %v1156_v10 }
 0x2c6   : > { %v3678_v38 = vpop.f32.mrf.mxu2 }
 0x2ce   : > { %v1161_v13 = vpop.f32.mrf.mxu2 }
 0x2d6   : > { %v1163_v32 = vpop.f32.mrf.mxu2 }
 0x2de   : > { %v1166_v62 = vpop.f32.mrf.mxu2 }
 0x2e0   : > { %v1357_v47 = vpop.f32.mrf.mxu0 }
 0x2e1   : > { %v3692_v48 = vadd.f32 %v1357_v47, %v1137_v55  ;;  %v1162_v55 = vadd.f32 %v3683_v22, %v1161_v13 }
 0x2e3   : > { %v1495_v60 = vmul.f32 %v3440_v23, %v3692_v48 }
 0x2e5   : > { %v1533_v53 = vmul.f32 %v1495_v60, %v1495_v60 }
 0x2e6   : > { %v1382_v15 = vpop.f32.mrf.mxu3  ;;  %v1168_v57 = vpop.f32.mrf.mxu2 }
 0x2e8   : > { %v1359_v11 = vpop.f32.mrf.mxu0 }
 0x2e9   : > { %v3690_v51 = vadd.f32 %v1359_v11, %v1139_v19 }
 0x2eb   : > { %v1496_v54 = vmul.f32 %v3446_v27, %v3690_v51 }
 0x2ed   : > { %v1534_v50 = vmul.f32 %v1496_v54, %v1496_v54  ;;  %v1511_v16 = vadd.f32 %v1496_v54, %v1495_v60 }
 0x2ee   : > { %v3680_v36 = vpop.f32.mrf.mxu3 }
 0x2ef   : > { %v1549_v20 = vadd.f32 %v1534_v50, %v1533_v53  ;;  %v1167_v53 = vadd.f32 %v3683_v22, %v1166_v62 }
 0x2f0   : > { %v1362_v40 = vpop.f32.mrf.mxu0 }
 0x2f1   : > { %v3694_v59 = vadd.f32 %v1362_v40, %v1142_v31  ;;  %v1171_v40 = vpop.f32.mrf.mxu2 }
 0x2f3   : > { %v1497_v6 = vmul.f32 %v3444_v24, %v3694_v59 }
 0x2f5   : > { %v1535_v18 = vmul.f32 %v1497_v6, %v1497_v6  ;;  %v1512_v52 = vadd.f32 %v1511_v16, %v1497_v6 }
 0x2f6   : > { %v3686_v42 = vpop.f32.mrf.mxu3 }
 0x2f7   : > { %v3749_v62 = vadd.f32 %v3686_v42, %v1167_v53 }
 0x2f8   : > { %v1364_v2 = vpop.f32.mrf.mxu0 }
 0x2f9   : > { %v3700_v45 = vadd.f32 %v1364_v2, %v1144_v7  ;;  %v1550_v2 = vadd.f32 %v1549_v20, %v1535_v18  ;;  %v1507_v42 = vmul.f32 %v3467_v49, %v3749_v62 }
 0x2fb   : > { %v1498_v56 = vmul.f32 %v3451_v30, %v3700_v45 }
 0x2fd   : > { %v1536_v44 = vmul.f32 %v1498_v56, %v1498_v56  ;;  %v1513_v58 = vadd.f32 %v1512_v52, %v1498_v56  ;;  %v3736_v56 = vadd.f32 %v1382_v15, %v1162_v55  ;;  %v1172_v15 = vadd.f32 %v3683_v22, %v1171_v40 }
 0x2fe   : > { %v1389_v35 = vpop.f32.mrf.mxu3 }
 0x2ff   : > { %v1551_v10 = vadd.f32 %v1550_v2, %v1536_v44  ;;  %v1173_v44 = vpop.f32.mrf.mxu2 }
 0x300   : > { %v1367_v3 = vpop.f32.mrf.mxu0 }
 0x301   : > { %v3707_v12 = vadd.f32 %v1367_v3, %v1147_v41  ;;  %v1164_v41 = vadd.f32 %v3683_v22, %v1163_v32  ;;  %v1169_v32 = vadd.f32 %v3683_v22, %v1168_v57 }
 0x303   : > { %v1499_v0 = vmul.f32 %v3442_v14, %v3707_v12  ;;  %v3740_v16 = vadd.f32 %v3680_v36, %v1164_v41 }
 0x305   : > { %v1514_v31 = vadd.f32 %v1513_v58, %v1499_v0  ;;  %v1174_v58 = vadd.f32 %v3683_v22, %v1173_v44 }
 0x306   : > { %v1392_v60 = vpop.f32.mrf.mxu3 }
 0x308   : > { %v1369_v21 = vpop.f32.mrf.mxu0 }
 0x309   : > { %v3712_v39 = vadd.f32 %v1369_v21, %v1149_v1  ;;  %v1537_v21 = vmul.f32 %v1499_v0, %v1499_v0 }
 0x30b   : > { %v1500_v47 = vmul.f32 %v3449_v28, %v3712_v39  ;;  %v1552_v6 = vadd.f32 %v1551_v10, %v1537_v21  ;;  %v3756_v21 = vadd.f32 %v1389_v35, %v1169_v32 }
 0x30d   : > { %v1538_v7 = vmul.f32 %v1500_v47, %v1500_v47 }
 0x30e   : > { %v1394_v40 = vpop.f32.mrf.mxu3 }
 0x30f   : > { %v1553_v13 = vadd.f32 %v1552_v6, %v1538_v7  ;;  %v3760_v7 = vadd.f32 %v1392_v60, %v1172_v15 }
 0x310   : > { %v1372_v4 = vpop.f32.mrf.mxu0 }
 0x311   : > { %v3717_v17 = vadd.f32 %v1372_v4, %v1152_v25  ;;  %v1159_v25 = vadd.f32 %v3683_v22, %v3678_v38  ;;  %v1505_v38 = vmul.f32 %v3464_v29, %v3736_v56 }
 0x313   : > { %v1501_v19 = vmul.f32 %v3453_v33, %v3717_v17 }
 0x315   : > { %v1539_v1 = vmul.f32 %v1501_v19, %v1501_v19 }
 0x317   : > { %v1554_v20 = vadd.f32 %v1553_v13, %v1539_v1  ;;  %v3764_v1 = vadd.f32 %v1394_v40, %v1174_v58 }
 0x318   : > { %v1374_v8 = vpop.f32.mrf.mxu0 }
 0x319   : > { %v3722_v11 = vadd.f32 %v1374_v8, %v1154_v9  ;;  %v1515_v8 = vadd.f32 %v1514_v31, %v1500_v47  ;;  %v1543_v31 = vmul.f32 %v1505_v38, %v1505_v38  ;;  %v1510_v60 = vmul.f32 %v3477_v61, %v3764_v1 }
 0x31b   : > { %v1502_v54 = vmul.f32 %v3457_v34, %v3722_v11  ;;  %v1516_v18 = vadd.f32 %v1515_v8, %v1501_v19  ;;  %v1508_v8 = vmul.f32 %v3474_v5, %v3756_v21 }
 0x31d   : > { %v1540_v9 = vmul.f32 %v1502_v54, %v1502_v54 }
 0x31f   : > { %v1555_v2 = vadd.f32 %v1554_v20, %v1540_v9 }
 0x320   : > { %v1377_v3 = vpop.f32.mrf.mxu0 }
 0x321   : > { %v3726_v4 = vadd.f32 %v1377_v3, %v1157_v46  ;;  %v1517_v46 = vadd.f32 %v1516_v18, %v1502_v54  ;;  %v1506_v3 = vmul.f32 %v3462_v43, %v3740_v16  ;;  %v1546_v18 = vmul.f32 %v1508_v8, %v1508_v8 }
 0x323   : > { %v1503_v50 = vmul.f32 %v3455_v26, %v3726_v4  ;;  %v1544_v6 = vmul.f32 %v1506_v3, %v1506_v3 }
 0x325   : > { %v1541_v52 = vmul.f32 %v1503_v50, %v1503_v50  ;;  %v1518_v36 = vadd.f32 %v1517_v46, %v1503_v50  ;;  %v1545_v50 = vmul.f32 %v1507_v42, %v1507_v42 }
 0x327   : > { %v1556_v19 = vadd.f32 %v1555_v2, %v1541_v52  ;;  %v1548_v52 = vmul.f32 %v1510_v60, %v1510_v60 }
 0x328   : > { %v1379_v0 = vpop.f32.mrf.mxu0 }
 0x329   : > { %v3743_v47 = vadd.f32 %v1379_v0, %v1159_v25  ;;  %v1509_v25 = vmul.f32 %v3472_v63, %v3760_v7 }
 0x32b   : > { %v1504_v57 = vmul.f32 %v3460_v37, %v3743_v47  ;;  %v1547_v0 = vmul.f32 %v1509_v25, %v1509_v25 }
 0x32d   : > { %v1519_v55 = vadd.f32 %v1518_v36, %v1504_v57  ;;  %v1542_v10 = vmul.f32 %v1504_v57, %v1504_v57 }
 0x32f   : > { %v1520_v54 = vadd.f32 %v1519_v55, %v1505_v38  ;;  %v1557_v41 = vadd.f32 %v1556_v19, %v1542_v10 }
 0x331   : > { %v1521_v22 = vadd.f32 %v1520_v54, %v1506_v3  ;;  %v1558_v35 = vadd.f32 %v1557_v41, %v1543_v31 }
 0x333   : > { %v1522_v13 = vadd.f32 %v1521_v22, %v1507_v42  ;;  %v1559_v53 = vadd.f32 %v1558_v35, %v1544_v6 }
 0x335   : > { %v1523_v9 = vadd.f32 %v1522_v13, %v1508_v8  ;;  %v1560_v32 = vadd.f32 %v1559_v53, %v1545_v50 }
 0x337   : > { %v1524_v20 = vadd.f32 %v1523_v9, %v1509_v25  ;;  %v1561_v46 = vadd.f32 %v1560_v32, %v1546_v18  ;;  %v1413_v9 = vld [vmem:[%s3187_s22 + $0x3] sm:$0x1] }
 0x339   : > { %v1525_v44 = vadd.f32 %v1524_v20, %v1510_v60  ;;  %v1562_v38 = vadd.f32 %v1561_v46, %v1547_v0  ;;  %v1414_v46 = vld [vmem:[%s3187_s22 + $0x4] sm:$0x1] }
 0x33b   : > { %v1526_v15 = vrot.slane %v1525_v44, 4  ;;  %v1563_v2 = vadd.f32 %v1562_v38, %v1548_v52 }
 0x33d   : > { %v1527_v36 = vadd.f32 %v1526_v15, %v1525_v44  ;;  %v1564_v57 = vrot.slane %v1563_v2, 4 }
 0x33f   : > { %v1528_v3 = vrot.slane %v1527_v36, 2  ;;  %v1565_v58 = vadd.f32 %v1564_v57, %v1563_v2 }
 0x341   : > { %v1529_v19 = vadd.f32 %v1528_v3, %v1527_v36  ;;  %v1566_v55 = vrot.slane %v1565_v58, 2 }
 0x343   : > { %v1530_v10 = vrot.slane %v1529_v19, 1  ;;  %v1567_v31 = vadd.f32 %v1566_v55, %v1565_v58 }
 0x345   : > { %v1531_v40 = vadd.f32 %v1530_v10, %v1529_v19  ;;  %v1568_v42 = vrot.slane %v1567_v31, 1 }
 0x347   : > { %v1532_v54 = vmul.f32 0.0625, %v1531_v40  ;;  %v1569_v41 = vadd.f32 %v1568_v42, %v1567_v31 }
 0x349   : > { %v1570_v6 = vmul.f32 0.0625, %v1569_v41  ;;  %v1571_v8 = vmul.f32 %v1532_v54, %v1532_v54 }
 0x34b   : > { %v1572_v22 = vsub.f32 %v1570_v6, %v1571_v8 }
 0x34d   : > { %v1573_v35 = vmax.f32 %v1572_v22, 0.0 }
 0x34f   : > { %v1574_v50 = vadd.f32 1e-05, %v1573_v35 }
 0x351   : > { %2723 = vrsqrt.f32 %v1574_v50  ;;  %vm1581_vm8 = vweird.f32 %v1574_v50 }
 0x357   : > { %v2724_v25 = vpop.eup %2723 }
 0x358   : > { %v1576_v13 = vmul.f32 %v2724_v25, %v1574_v50  ;;  %vm1582_vm7 = vweird.f32 %v2724_v25 }
 0x359   : > { %vm1583_vm9 = vmor %vm1581_vm8, %vm1582_vm7 }
 0x35a   : > { %v1577_v53 = vmul.f32 %v2724_v25, %v1576_v13 }
 0x35c   : > { %v1578_v18 = vmul.f32 0.5, %v1577_v53 }
 0x35e   : > { %v1579_v60 = vsub.f32 1.5, %v1578_v18 }
 0x360   : > { %v1580_v32 = vmul.f32 %v2724_v25, %v1579_v60 }
 0x362   : > { %v1584_v0 = vsel %vm1583_vm9, %v2724_v25, %v1580_v32 }
 0x363   : > { %v1585_v20 = vmul.f32 %v1584_v0, %v1413_v9 }
 0x365   : > { %v1586_v52 = vmul.f32 %v1585_v20, %v1532_v54  ;;  %v3772_v38 = vperm.slane %v1585_v20, 0 }
 0x367   : > { %v1587_v44 = vsub.f32 %v1414_v46, %v1586_v52  ;;  %v1589_v15 = vmul.f32 %v3772_v38, %v3692_v48  ;;  %v1590_v2 = vmul.f32 %v3772_v38, %v3690_v51  ;;  %v1591_v58 = vmul.f32 %v3772_v38, %v3694_v59 }
 0x368   : > { %v1592_v19 = vmul.f32 %v3772_v38, %v3700_v45  ;;  %v1593_v10 = vmul.f32 %v3772_v38, %v3707_v12  ;;  %v1594_v59 = vmul.f32 %v3772_v38, %v3712_v39  ;;  %v1595_v12 = vmul.f32 %v3772_v38, %v3717_v17 }
 0x369   : > { %v3778_v36 = vperm.slane %v1587_v44, 0  ;;  %v1596_v39 = vmul.f32 %v3772_v38, %v3722_v11  ;;  %v1597_v50 = vmul.f32 %v3772_v38, %v3726_v4  ;;  %v1598_v18 = vmul.f32 %v3772_v38, %v3743_v47 }
 0x36a   : > { %v1599_v20 = vmul.f32 %v3772_v38, %v3736_v56 }
 0x36b   : > { %v3781_v57 = vadd.f32 %v3778_v36, %v1589_v15  ;;  %v3784_v3 = vadd.f32 %v3778_v36, %v1590_v2  ;;  %v3791_v55 = vadd.f32 %v3778_v36, %v1591_v58  ;;  %v3798_v31 = vadd.f32 %v3778_v36, %v1592_v19 }
 0x36c   : > { %v3801_v40 = vadd.f32 %v3778_v36, %v1593_v10  ;;  %v3815_v41 = vadd.f32 %v3778_v36, %v1594_v59  ;;  %v3821_v8 = vadd.f32 %v3778_v36, %v1595_v12  ;;  %v3830_v25 = vadd.f32 %v3778_v36, %v1596_v39 }
 0x36d   : > { %v1622_v48 = vmax.f32 %v3781_v57, 0.0  ;;  %v1623_v51 = vmax.f32 %v3784_v3, 0.0  ;;  %v1624_v45 = vmax.f32 %v3791_v55, 0.0  ;;  %v1625_v6 = vmax.f32 %v3798_v31, 0.0 }
 0x36e   : > { %v1627_v11 = vmax.f32 %v3815_v41, 0.0  ;;  %v1628_v60 = vmax.f32 %v3821_v8, 0.0  ;;  %v1629_v47 = vmax.f32 %v3830_v25, 0.0  ;;  %v3857_v2 = vadd.f32 %v3778_v36, %v1599_v20  ;;  %v2729_v41 = vld [vmem:[#allocation2 + $0x58] sm:$0xff] }
 0x36f   : > { %v1721_v42 = vmul.f32 %v1622_v48, %v3440_v23  ;;  %v1722_v54 = vmul.f32 %v1623_v51, %v3446_v27  ;;  %v1626_v23 = vmax.f32 %v3801_v40, 0.0  ;;  %v1723_v27 = vmul.f32 %v1624_v45, %v3444_v24  ;;  %v2730_v25 = vld [vmem:[#allocation2 + $0x18] sm:$0xff] }
 0x370   : > { %v1724_v13 = vmul.f32 %v1625_v6, %v3451_v30  ;;  %v3839_v24 = vadd.f32 %v3778_v36, %v1597_v50  ;;  %v3848_v30 = vadd.f32 %v3778_v36, %v1598_v18  ;;  %v1726_v46 = vmul.f32 %v1627_v11, %v3449_v28 }
 0x371   : > { %v1737_v22 = vadd.f32 %v1722_v54, %v1721_v42  ;;  %v1759_v35 = vmul.f32 %v1721_v42, %v1721_v42  ;;  %v1760_v17 = vmul.f32 %v1722_v54, %v1722_v54  ;;  %v1725_v4 = vmul.f32 %v1626_v23, %v3442_v14 }
 0x372   : > { %v1761_v32 = vmul.f32 %v1723_v27, %v1723_v27  ;;  %v1762_v44 = vmul.f32 %v1724_v13, %v1724_v13  ;;  %v1600_v14 = vmul.f32 %v3772_v38, %v3740_v16  ;;  %v1630_v56 = vmax.f32 %v3839_v24, 0.0 }
 0x373   : > { %v1738_v53 = vadd.f32 %v1737_v22, %v1723_v27  ;;  %v1775_v0 = vadd.f32 %v1760_v17, %v1759_v35  ;;  %v1727_v58 = vmul.f32 %v1628_v60, %v3453_v33  ;;  %v1763_v10 = vmul.f32 %v1725_v4, %v1725_v4 }
 0x374   : > { %v1601_v28 = vmul.f32 %v3772_v38, %v3749_v62  ;;  %v3866_v42 = vadd.f32 %v3778_v36, %v1600_v14  ;;  %v1631_v16 = vmax.f32 %v3848_v30, 0.0  ;;  %v1728_v54 = vmul.f32 %v1629_v47, %v3457_v34 }
 0x375   : > { %v1739_v9 = vadd.f32 %v1738_v53, %v1724_v13  ;;  %v1776_v15 = vadd.f32 %v1775_v0, %v1761_v32  ;;  %v1764_v39 = vmul.f32 %v1726_v46, %v1726_v46  ;;  %v1602_v33 = vmul.f32 %v3772_v38, %v3756_v21 }
 0x376   : > { %v3875_v22 = vadd.f32 %v3778_v36, %v1601_v28  ;;  %v1632_v62 = vmax.f32 %v3857_v2, 0.0  ;;  %v1729_v35 = vmul.f32 %v1630_v56, %v3455_v26  ;;  %v1765_v50 = vmul.f32 %v1727_v58, %v1727_v58 }
 0x377   : > { %v1740_v52 = vadd.f32 %v1739_v9, %v1725_v4  ;;  %v1777_v59 = vadd.f32 %v1776_v15, %v1762_v44  ;;  %v1603_v34 = vmul.f32 %v3772_v38, %v3760_v7  ;;  %v3884_v53 = vadd.f32 %v3778_v36, %v1602_v33 }
 0x378   : > { %v1633_v21 = vmax.f32 %v3866_v42, 0.0  ;;  %v1730_v18 = vmul.f32 %v1631_v16, %v3460_v37  ;;  %v1766_v9 = vmul.f32 %v1728_v54, %v1728_v54  ;;  %v1604_v26 = vmul.f32 %v3772_v38, %v3764_v1  ;;  %v2734_v42 = vld [vmem:[#allocation2 + $0x48] sm:$0xff] }
 0x379   : > { %v1741_v19 = vadd.f32 %v1740_v52, %v1726_v46  ;;  %v1778_v27 = vadd.f32 %v1777_v59, %v1763_v10  ;;  %v3893_v0 = vadd.f32 %v3778_v36, %v1603_v34  ;;  %v1634_v7 = vmax.f32 %v3875_v22, 0.0 }
 0x37a   : > { %v1731_v20 = vmul.f32 %v1632_v62, %v3464_v29  ;;  %v1767_v52 = vmul.f32 %v1729_v35, %v1729_v35  ;;  %v3900_v37 = vadd.f32 %v3778_v36, %v1604_v26  ;;  %v1635_v15 = vmax.f32 %v3884_v53, 0.0 }
 0x37b   : > { %v1742_v12 = vadd.f32 %v1741_v19, %v1727_v58  ;;  %v1779_v13 = vadd.f32 %v1778_v27, %v1764_v39  ;;  %v1732_v1 = vmul.f32 %v1633_v21, %v3462_v43  ;;  %v1768_v14 = vmul.f32 %v1730_v18, %v1730_v18 }
 0x37c   : > { %v1636_v19 = vmax.f32 %v3893_v0, 0.0  ;;  %v1733_v29 = vmul.f32 %v1634_v7, %v3467_v49  ;;  %v1769_v59 = vmul.f32 %v1731_v20, %v1731_v20  ;;  %v1637_v36 = vmax.f32 %v3900_v37, 0.0  ;;  %v2738_v0 = vld [vmem:[#allocation2 + $0x38] sm:$0xff] }
 0x37d   : > { %v1743_v17 = vadd.f32 %v1742_v12, %v1728_v54  ;;  %v1780_v32 = vadd.f32 %v1779_v13, %v1765_v50  ;;  %v1734_v54 = vmul.f32 %v1635_v15, %v3474_v5  ;;  %v1770_v43 = vmul.f32 %v1732_v1, %v1732_v1  ;;  %v2741_v37 = vld [vmem:[#allocation2 + $0x78] sm:$0xff] }
 0x37e   : > { %v1735_v27 = vmul.f32 %v1636_v19, %v3472_v63  ;;  %v1736_v49 = vmul.f32 %v1637_v36, %v3477_v61 }
 0x37f   : > { %v1744_v4 = vadd.f32 %v1743_v17, %v1729_v35  ;;  %v1781_v44 = vadd.f32 %v1780_v32, %v1766_v9  ;;  %v1771_v35 = vmul.f32 %v1733_v29, %v1733_v29  ;;  %v1772_v13 = vmul.f32 %v1734_v54, %v1734_v54 }
 0x380   : > { %v1774_v32 = vmul.f32 %v1736_v49, %v1736_v49 }
 0x381   : > { %v1745_v46 = vadd.f32 %v1744_v4, %v1730_v18  ;;  %v1782_v58 = vadd.f32 %v1781_v44, %v1767_v52  ;;  %v1773_v4 = vmul.f32 %v1735_v27, %v1735_v27 }
 0x383   : > { %v1746_v38 = vadd.f32 %v1745_v46, %v1731_v20  ;;  %v1783_v28 = vadd.f32 %v1782_v58, %v1768_v14 }
 0x385   : > { %v1747_v10 = vadd.f32 %v1746_v38, %v1732_v1  ;;  %v1784_v39 = vadd.f32 %v1783_v28, %v1769_v59 }
 0x387   : > { %v1748_v12 = vadd.f32 %v1747_v10, %v1733_v29  ;;  %v1785_v17 = vadd.f32 %v1784_v39, %v1770_v43 }
 0x389   : > { %v1749_v33 = vadd.f32 %v1748_v12, %v1734_v54  ;;  %v1786_v34 = vadd.f32 %v1785_v17, %v1771_v35 }
 0x38b   : > { %v1750_v50 = vadd.f32 %v1749_v33, %v1735_v27  ;;  %v1787_v5 = vadd.f32 %v1786_v34, %v1772_v13 }
 0x38d   : > { %v1751_v18 = vadd.f32 %v1750_v50, %v1736_v49  ;;  %v1788_v26 = vadd.f32 %v1787_v5, %v1773_v4  ;;  %v1719_v50 = vld [vmem:[%s3187_s22 + $0x7] sm:$0x1]  ;;  %v1720_v4 = vld [vmem:[%s3187_s22 + $0x8] sm:$0x1] }
 0x38f   : > { %v1752_v9 = vrot.slane %v1751_v18, 4  ;;  %v1789_v46 = vadd.f32 %v1788_v26, %v1774_v32 }
 0x391   : > { %v1753_v20 = vadd.f32 %v1752_v9, %v1751_v18  ;;  %v1790_v63 = vrot.slane %v1789_v46, 4 }
 0x393   : > { %v1754_v52 = vrot.slane %v1753_v20, 2  ;;  %v1791_v1 = vadd.f32 %v1790_v63, %v1789_v46 }
 0x395   : > { %v1755_v44 = vadd.f32 %v1754_v52, %v1753_v20  ;;  %v1792_v14 = vrot.slane %v1791_v1, 2 }
 0x397   : > { %v1756_v38 = vrot.slane %v1755_v44, 1  ;;  %v1793_v29 = vadd.f32 %v1792_v14, %v1791_v1 }
 0x399   : > { %v1757_v58 = vadd.f32 %v1756_v38, %v1755_v44  ;;  %v1794_v10 = vrot.slane %v1793_v29, 1 }
 0x39b   : > { %v1758_v61 = vmul.f32 0.0625, %v1757_v58  ;;  %v1795_v59 = vadd.f32 %v1794_v10, %v1793_v29  ;;  %v2728_v58 = vld [vmem:[#allocation2] sm:$0xff] }
 0x39d   : > { %v1797_v28 = vmul.f32 %v1758_v61, %v1758_v61  ;;  %v1796_v54 = vmul.f32 0.0625, %v1795_v59 }
 0x39f   : > { %v1798_v12 = vsub.f32 %v1796_v54, %v1797_v28  ;;  %v2732_v54 = vld [vmem:[#allocation2 + $0x68] sm:$0xff] }
 0x3a1   : > { %v1799_v43 = vmax.f32 %v1798_v12, 0.0 }
 0x3a3   : > { %v1800_v39 = vadd.f32 1e-05, %v1799_v43 }
 0x3a5   : > { %2725 = vrsqrt.f32 %v1800_v39  ;;  %vm1807_vm11 = vweird.f32 %v1800_v39 }
 0x3ab   : > { %v2726_v27 = vpop.eup %2725 }
 0x3ac   : > { %v1802_v33 = vmul.f32 %v2726_v27, %v1800_v39  ;;  %vm1808_vm10 = vweird.f32 %v2726_v27 }
 0x3ad   : > { %vm1809_vm12 = vmor %vm1807_vm11, %vm1808_vm10 }
 0x3ae   : > { %v1803_v35 = vmul.f32 %v2726_v27, %v1802_v33 }
 0x3b0   : > { %v1804_v17 = vmul.f32 0.5, %v1803_v35  ;;  %v2735_v35 = vld [vmem:[#allocation2 + $0x40] sm:$0xff] }
 0x3b2   : > { %v1805_v49 = vsub.f32 1.5, %v1804_v17 }
 0x3b4   : > { %v1806_v13 = vmul.f32 %v2726_v27, %v1805_v49  ;;  %v2736_v49 = vld [vmem:[#allocation2 + $0x20] sm:$0xff] }
 0x3b6   : > { %v1810_v34 = vsel %vm1809_vm12, %v2726_v27, %v1806_v13 }
 0x3b7   : > { %v1811_v18 = vmul.f32 %v1810_v34, %v1719_v50  ;;  %v2737_v50 = vld [vmem:[#allocation2 + $0x10] sm:$0xff] }
 0x3b9   : > { %v1812_v5 = vmul.f32 %v1811_v18, %v1758_v61  ;;  %v1814_v32 = vperm.slane %v1811_v18, 0  ;;  %v2731_v61 = vld [vmem:[#allocation2 + $0x50] sm:$0xff]  ;;  %v2739_v18 = vld [vmem:[#allocation2 + $0x60] sm:$0xff] }
 0x3bb   : > { %v1813_v9 = vsub.f32 %v1720_v4, %v1812_v5  ;;  %v1815_v26 = vmul.f32 %v1814_v32, %v1622_v48  ;;  %v1816_v20 = vmul.f32 %v1814_v32, %v1623_v51  ;;  %v1817_v46 = vmul.f32 %v1814_v32, %v1624_v45  ;;  %v2740_v5 = vld [vmem:[#allocation2 + $0x70] sm:$0xff] }
 0x3bc   : > { %v1818_v63 = vmul.f32 %v1814_v32, %v1625_v6  ;;  %v1819_v44 = vmul.f32 %v1814_v32, %v1626_v23  ;;  %v1820_v57 = vmul.f32 %v1814_v32, %v1627_v11  ;;  %v1821_v3 = vmul.f32 %v1814_v32, %v1628_v60  ;;  %v2727_v6 = vld [vmem:[#allocation2 + $0x30] sm:$0xff] }
 0x3bd   : > { %v1831_v52 = vperm.slane %v1813_v9, 0  ;;  %v1822_v55 = vmul.f32 %v1814_v32, %v1629_v47  ;;  %v1823_v31 = vmul.f32 %v1814_v32, %v1630_v56  ;;  %v1824_v8 = vmul.f32 %v1814_v32, %v1631_v16 }
 0x3be   : > { %v1825_v24 = vmul.f32 %v1814_v32, %v1632_v62  ;;  %v1826_v59 = vmul.f32 %v1814_v32, %v1633_v21  ;;  %v1827_v16 = vmul.f32 %v1814_v32, %v1634_v7  ;;  %v2733_v62 = vld [vmem:[#allocation2 + $0x8] sm:$0xff]  ;;  %v1828_v43 = vmul.f32 %v1814_v32, %v1635_v15 }
 0x3bf   : > { %v1832_v1 = vadd.f32 %v1831_v52, %v1815_v26  ;;  %v1833_v38 = vadd.f32 %v1831_v52, %v1816_v20  ;;  %v1834_v14 = vadd.f32 %v1831_v52, %v1817_v46  ;;  %v1835_v48 = vadd.f32 %v1831_v52, %v1818_v63 }
 0x3c0   : > { %v1836_v51 = vadd.f32 %v1831_v52, %v1819_v44  ;;  %v1837_v45 = vadd.f32 %v1831_v52, %v1820_v57  ;;  %v1838_v40 = vadd.f32 %v1831_v52, %v1821_v3  ;;  %v1839_v60 = vadd.f32 %v1831_v52, %v1822_v55 }
 0x3c1   : > { %v3940_v23 = vadd.f32 %v2727_v6, %v1832_v1  ;;  %v3942_v29 = vadd.f32 %v2728_v58, %v1833_v38  ;;  %v3944_v11 = vadd.f32 %v2729_v41, %v1834_v14  ;;  %v3948_v47 = vadd.f32 %v2730_v25, %v1835_v48 }
 0x3c2   : > { %v1840_v56 = vadd.f32 %v1831_v52, %v1823_v31  ;;  %v3952_v10 = vadd.f32 %v2731_v61, %v1836_v51  ;;  %v1841_v28 = vadd.f32 %v1831_v52, %v1824_v8  ;;  %v3957_v30 = vadd.f32 %v2732_v54, %v1837_v45 }
 0x3c3   : > { %1925 = vst [vmem:[#allocation2 + $0x30] sm:$0xff] %v3940_v23  ;;  %v1842_v2 = vadd.f32 %v1831_v52, %v1825_v24  ;;  %v1911_v12 = vadd.f32 %v2733_v62, %v1838_v40  ;;  %v1843_v39 = vadd.f32 %v1831_v52, %v1826_v59  ;;  %v1912_v21 = vadd.f32 %v2734_v42, %v1839_v60 }
 0x3c4   : > { %1926 = vst [vmem:[#allocation2] sm:$0xff] %v3942_v29  ;;  %v1829_v27 = vmul.f32 %v1814_v32, %v1636_v19  ;;  %v1844_v33 = vadd.f32 %v1831_v52, %v1827_v16  ;;  %v1913_v22 = vadd.f32 %v2735_v35, %v1840_v56  ;;  %v1830_v7 = vmul.f32 %v1814_v32, %v1637_v36  ;;  %v2742_v32 = vld [vmem:[#allocation2 + $0x28] sm:$0xff] }
 0x3c5   : > { %1927 = vst [vmem:[#allocation2 + $0x58] sm:$0xff] %v3944_v11  ;;  %v1845_v17 = vadd.f32 %v1831_v52, %v1828_v43  ;;  %v1914_v53 = vadd.f32 %v2736_v49, %v1841_v28  ;;  %v1915_v13 = vadd.f32 %v2737_v50, %v1842_v2  ;;  %v1916_v19 = vadd.f32 %v2738_v0, %v1843_v39 }
 0x3c6   : > { %1928 = vst [vmem:[#allocation2 + $0x18] sm:$0xff] %v3948_v47  ;;  %v1846_v15 = vadd.f32 %v1831_v52, %v1829_v27  ;;  %v1847_v34 = vadd.f32 %v1831_v52, %v1830_v7  ;;  %v1917_v4 = vadd.f32 %v2739_v18, %v1844_v33 }
 0x3c7   : > { %1929 = vst [vmem:[#allocation2 + $0x50] sm:$0xff] %v3952_v10  ;;  %v1918_v9 = vadd.f32 %v2740_v5, %v1845_v17 }
 0x3c8   : > { %1930 = vst [vmem:[#allocation2 + $0x68] sm:$0xff] %v3957_v30  ;;  %v1919_v36 = vadd.f32 %v2741_v37, %v1846_v15  ;;  %v1920_v26 = vadd.f32 %v2742_v32, %v1847_v34 }
 0x3c9   : > { %1931 = vst [vmem:[#allocation2 + $0x8] sm:$0xff] %v1911_v12 }
 0x3ca   : > { %1932 = vst [vmem:[#allocation2 + $0x48] sm:$0xff] %v1912_v21 }
 0x3cb   : > { %1933 = vst [vmem:[#allocation2 + $0x40] sm:$0xff] %v1913_v22 }
 0x3cc   : > { %1934 = vst [vmem:[#allocation2 + $0x20] sm:$0xff] %v1914_v53 }
 0x3cd   : > { %1935 = vst [vmem:[#allocation2 + $0x10] sm:$0xff] %v1915_v13 }
 0x3ce   : > { %1936 = vst [vmem:[#allocation2 + $0x38] sm:$0xff] %v1916_v19  ;;  %1948 = sbr.rel (%p2473_p1) target bundleno = 1412 (0x584), region = 117 }
 0x3cf   : > { %1937 = vst [vmem:[#allocation2 + $0x60] sm:$0xff] %v1917_v4 }
 0x3d0   : > { %1938 = vst [vmem:[#allocation2 + $0x70] sm:$0xff] %v1918_v9 }
 0x3d1   : > { %1939 = vst [vmem:[#allocation2 + $0x78] sm:$0xff] %v1919_v36 }
 0x3d2   : > { %1940 = vst [vmem:[#allocation2 + $0x28] sm:$0xff] %v1920_v26 }
 0x3d3   : > { %v1957_v20 = vpack.c.bf16 %v1920_v26, %v1919_v36  ;;  %v2602_v46 = vld [vmem:[#allocation9 + $0x38] sm:$0xff]  ;;  %v1956_v52 = vpack.c.bf16 %v1918_v9, %v1917_v4  ;;  %v2601_v63 = vld [vmem:[#allocation9 + $0x30] sm:$0xff]  ;;  %v1955_v44 = vpack.c.bf16 %v1916_v19, %v1915_v13  ;;  %v2600_v1 = vld [vmem:[#allocation9 + $0x28] sm:$0xff]  ;;  %v1954_v38 = vpack.c.bf16 %v1914_v53, %v1913_v22 }
 0x3d4   : > { %2040 = vmatpush.bf16.msra.mxu1 %v2602_v46  ;;  %v2599_v14 = vld [vmem:[#allocation9 + $0x20] sm:$0xff]  ;;  %v1953_v57 = vpack.c.bf16 %v1912_v21, %v1911_v12  ;;  %v2598_v48 = vld [vmem:[#allocation9 + $0x18] sm:$0xff]  ;;  %v1952_v3 = vpack.c.bf16 %v3957_v30, %v3952_v10  ;;  %v2597_v51 = vld [vmem:[#allocation9 + $0x10] sm:$0xff]  ;;  %v1951_v55 = vpack.c.bf16 %v3948_v47, %v3944_v11  ;;  %v1950_v45 = vpack.c.bf16 %v3942_v29, %v3940_v23 }
 0x3d5   : > { %1958 = vmatpush.bf16.msra.mxu0 %v1957_v20  ;;  %v2596_v31 = vld [vmem:[#allocation9 + $0x8] sm:$0xff]  ;;  %v1949_v40 = vld [vmem:[%s4010_s5] sm:$0x1]  ;;  %v2595_v6 = vld [vmem:[#allocation9] sm:$0xff] }
 0x3d6   : > { %v2610_v58 = vld [vmem:[#allocation10 + $0x38] sm:$0xff]  ;;  %v2609_v41 = vld [vmem:[#allocation10 + $0x30] sm:$0xff]  ;;  %v2608_v11 = vld [vmem:[#allocation10 + $0x28] sm:$0xff] }
 0x3d7   : > { %2123 = vmatpush.bf16.msra.mxu2 %v2610_v58  ;;  %v2607_v8 = vld [vmem:[#allocation10 + $0x20] sm:$0xff]  ;;  %v2606_v60 = vld [vmem:[#allocation10 + $0x18] sm:$0xff]  ;;  %v2605_v23 = vld [vmem:[#allocation10 + $0x10] sm:$0xff] }
 0x3d8   : > { %2041 = vmatpush.bf16.msra.mxu1 %v2601_v63  ;;  %v2604_v24 = vld [vmem:[#allocation10 + $0x8] sm:$0xff]  ;;  %v2603_v56 = vld [vmem:[#allocation10] sm:$0xff]  ;;  %v2743_v61 = vld [vmem:[%s4016_s11] ss:$0 sm:$0xff] }
 0x3d9   : > { %1959 = vmatpush.bf16.msra.mxu0 %v1956_v52  ;;  %v2744_v16 = vld [vmem:[%s4018_s13] ss:$0 sm:$0xff] }
 0x3db   : > { %2124 = vmatpush.bf16.msra.mxu2 %v2609_v41 }
 0x3dc   : > { %2042 = vmatpush.bf16.msra.mxu1 %v2600_v1 }
 0x3dd   : > { %1960 = vmatpush.bf16.msra.mxu0 %v1955_v44 }
 0x3df   : > { %2125 = vmatpush.bf16.msra.mxu2 %v2608_v11 }
 0x3e0   : > { %2043 = vmatpush.bf16.msra.mxu1 %v2599_v14 }
 0x3e1   : > { %1961 = vmatpush.bf16.msra.mxu0 %v1954_v38 }
 0x3e3   : > { %2126 = vmatpush.bf16.msra.mxu2 %v2607_v8 }
 0x3e4   : > { %2044 = vmatpush.bf16.msra.mxu1 %v2598_v48 }
 0x3e5   : > { %1962 = vmatpush.bf16.msra.mxu0 %v1953_v57 }
 0x3e7   : > { %2127 = vmatpush.bf16.msra.mxu2 %v2606_v60 }
 0x3e8   : > { %2045 = vmatpush.bf16.msra.mxu1 %v2597_v51 }
 0x3e9   : > { %1963 = vmatpush.bf16.msra.mxu0 %v1952_v3 }
 0x3eb   : > { %2128 = vmatpush.bf16.msra.mxu2 %v2605_v23 }
 0x3ec   : > { %2046 = vmatpush.bf16.msra.mxu1 %v2596_v31 }
 0x3ed   : > { %1964 = vmatpush.bf16.msra.mxu0 %v1951_v55 }
 0x3ef   : > { %2129 = vmatpush.bf16.msra.mxu2 %v2604_v24 }
 0x3f0   : > { %2047 = vmatpush.bf16.msra.mxu1 %v2595_v6 }
 0x3f1   : > { %1965 = vmatpush.bf16.msra.mxu0 %v1950_v45 }
 0x3f3   : > { %2130 = vmatpush.bf16.msra.mxu2 %v2603_v56 }
 0x3f4   : > { %1966 = vmatmul.bf16.vlgmr.msra.gmra.mxu0 %v1949_v40 }
 0x471   : > { %v1967_v29 = vpop.f32.mrf.mxu0 }
 0x472   : > { %v1971_v25 = vpack.c.bf16 %v1967_v29, %v1967_v29 }
 0x474   : > { %2048 = vmatmul.bf16.vlgmr.msra.gmra.mxu1 %v1971_v25 }
 0x479   : > { %v1969_v47 = vpop.f32.mrf.mxu0 }
 0x4f1   : > { %v2049_v10 = vpop.f32.mrf.mxu1 }
 0x4f2   : > { %v2050_v59 = vadd.f32 %v2743_v61, %v2049_v10 }
 0x4f4   : > { %v2053_v28 = vmax.f32 %v2050_v59, 0.0 }
 0x4f6   : > { %v2054_v54 = vpack.c.bf16 %v2053_v28, %v2053_v28 }
 0x4f8   : > { %2131 = vmatmul.bf16.vlgmr.msra.gmra.mxu2 %v2054_v54 }
 0x4f9   : > { %v2051_v30 = vpop.f32.mrf.mxu1 }
 0x57b   : > { %v2132_v2 = vpop.f32.mrf.mxu2 }
 0x57c   : > { %v2133_v62 = vadd.f32 %v2744_v16, %v2132_v2 }
 0x57e   : > { %2136 = vst [vmem:[#allocation12] sm:$0x3] %v2133_v62 }
 0x583   : > { %v2134_v12 = vpop.f32.mrf.mxu2 }
 0x584 PF: > { %p2655_p4 = scmp.eq.s32.totalorder %s3075_s17, 4  ;;  %s2980_s14 = smov [#allocation12]  }
 0x585   : > { %s2143_s25 = sshll.u32 %s2980_s14, 4  ;;  %s4049_s15 = sld [smem:[#allocation33_spill]]  ;;  %s2144_s25 = int_to_ptr.vmem [resolvable:$true] %s2143_s25 }
 0x58b   : > { %s2145_s24 = sshll.u32 %s4049_s15, 4  ;;  %s2146_s24 = int_to_ptr.hbm [resolvable:$true] %s2145_s24 }
 0x58c   : > { %2631 = dma.vmem_to_hbm [thread:$0]  (%p2655_p4), %s2144_s25, 32, %s2146_s24, [#allocation6]  }
 0x58d   : > { %2954 = dma.done.wait (%p2655_p4), [#allocation6], 32  }
 0x58e   : > { %2956 = vsyncadd (%p2655_p4), [#allocation6], 4294967264 }
 0x58f PF: > { %s4050_s16 = sld [smem:[#allocation28_spill]]  ;;  %s4053_s29 = smov %s2963_s30 }
 0x590   : > { %s4051_s26 = sld [smem:[#allocation27_spill]] }
 0x591   : > { %s4052_s15 = sld [smem:[#allocation29_spill]] }
 0x595   : > { %p27_p5 = scmp.ge.s32.totalorder %s4050_s16, 7  }
 0x596   : > { %s4054_s30 = smov %s4051_s26 }
 0x597   :  { %29 = sbr.rel (!%p27_p5) target bundleno = 11 (0xb), region = 158 }
 0x59c   :  { %2159 = vsyncpa [#allocation5], 1 }
 0x59d   :  { %2161 = vsyncpa [#allocation5 + $0x1], 1 }
 0x59e   :  { %2162 = vsyncpa [#allocation8], 1 }
 0x59f   :  { %2164 = vsyncpa [#allocation8 + $0x1], 1 }
 0x5a0   :  { %2165 = vsyncpa [#allocation11], 1 }
 0x5a1   :  { %2166 = vsyncpa [#allocation6], 1 }
 0x5a2   :  { %2168 = vsyncpa [#allocation6 + $0x1], 1 }

// kernel: tpu_custom_call.1
= control target key start
LH: loop header
LB: loop body
LE: loop exit
PB: predicated region body
PF: predicated region fallthrough
CT: control target
= control target key end

     0   :  { %s4074_s0 = inlined_call_operand.vmem [shape: f32[128,128], index: 0, kind: input, shape index: {}]   ;;  %s4075_s1 = inlined_call_operand.hbm [shape: f32[32,128], index: 1, kind: input, shape index: {}]   ;;  %s4076_s2 = inlined_call_operand.vmem [shape: bf16[32,128], index: 2, kind: input, shape index: {}]   ;;  %s4077_s3 = inlined_call_operand.hbm [shape: bf16[32,128], index: 3, kind: input, shape index: {}]   ;;  %s4078_s4 = inlined_call_operand.vmem [shape: bf16[128,32], index: 4, kind: input, shape index: {}]   ;;  %s4079_s5 = inlined_call_operand.vmem [shape: bf16[2,128], index: 5, kind: input, shape index: {}]   ;;  %s4080_s6 = inlined_call_operand.vmem [shape: f32[128,1], index: 6, kind: input, shape index: {}]   ;;  %s4081_s7 = inlined_call_operand.vmem [shape: f32[32,1], index: 7, kind: input, shape index: {}]   ;;  %s4082_s8 = inlined_call_operand.hbm [shape: bf16[5,640,128], index: 8, kind: input, shape index: {}]   ;;  %s4083_s9 = inlined_call_operand.vmem [shape: f32[5,11,128], index: 9, kind: input, shape index: {}]   ;;  %s4084_s10 = inlined_call_operand.hbm [shape: bf16[128,128], index: 10, kind: input, shape index: {}]   ;;  %s4085_s11 = inlined_call_operand.vmem [shape: f32[1,128], index: 11, kind: input, shape index: {}]   ;;  %s4086_s12 = inlined_call_operand.hbm [shape: bf16[128,128], index: 12, kind: input, shape index: {}]   ;;  %s4087_s13 = inlined_call_operand.vmem [shape: f32[1,128], index: 13, kind: input, shape index: {}]   ;;  %s4088_s14 = inlined_call_operand.hbm [shape: f32[2,128], index: 14, kind: output, shape index: {}]  }
   0x1   :  { %4091 = sst [smem:[#allocation21_spill]] %s4075_s1 }
   0x2   :  { %4092 = sst [smem:[#allocation22_spill]] %s4077_s3 }
   0x3   :  { %4093 = sst [smem:[#allocation23_spill]] %s4084_s10 }
   0x4   :  { %4094 = sst [smem:[#allocation24_spill]] %s4086_s12 }
   0x5   :  { %4095 = sst [smem:[#allocation25_spill]] %s4088_s14 }
   0x6   :  { %19 = vsyncpa [#allocation5], 0 }
   0x7   :  { %20 = vsyncpa [#allocation8], 0 }
   0x8   :  { %21 = vsyncpa [#allocation12], 0 }
   0x9   :  { %22 = vsyncpa [#allocation6], 0  ;;  %s3119_s29 = smov 0   ;;  %s3121_s30 = smov 0  }
   0xa   :  { %s3123_s15 = smov 0   ;;  %s3125_s16 = smov 0  }
   0xb LB: > { %s3138_s17 = sadd.s32 4294967295, %s3032_s16   ;;  %p216_p0 = scmp.ne.s32.totalorder %s3024_s30, %s3020_s29  ;;  %s3032_s16 = sphi %s3125_s16, %s4120_s16   ;;  %s3028_s15 = sphi %s3123_s15, %s4119_s15   ;;  %s3024_s30 = sphi %s3121_s30, %s4118_s30   ;;  %s3020_s29 = sphi %s3119_s29, %s4117_s29  }
   0xc   : > { %p217_p1 = scmp.eq.s32.totalorder %s3138_s17, 0  ;;  %p2286_p2 = scmp.ge.s32.totalorder %s3032_s16, 1 }
   0xd   : > { %p358_p3 = scmp.lt.s32.totalorder %s3032_s16, 6  ;;  %p2287_p4 = scmp.ne.s32.totalorder %s3138_s17, 0 }
   0xe   : > { %p3147_p5 = por %p217_p1, %p216_p0  ;;  %s4097_s1 = sld [smem:[#allocation21_spill]] }
   0xf   : > { %p3154_p6 = pnand %p2286_p2, %p358_p3  ;;  %s3034_s23 = smov [#allocation4]  }
  0x10   : > { %s374_s24 = sshll.u32 %s3034_s23, 4  ;;  %s4100_s3 = sld [smem:[#allocation22_spill]]  ;;  %s375_s24 = int_to_ptr.vmem [resolvable:$true] %s374_s24 }
  0x11   : > { %p2682_p7 = pneg %p3154_p6  ;;  %s3035_s29 = smov 128  }
  0x12   : > { %s3036_s19 = smov 8   ;;  %s3037_s20 = smov [#allocation7]  }
  0x13   : > { %p3162_p8 = pnand %p2682_p7, %p217_p1  ;;  %s391_s23 = sshll.u32 %s3037_s20, 4  ;;  %s392_s23 = int_to_ptr.vmem [resolvable:$true] %s391_s23 }
  0x14   : > { %s372_s21 = sshll.u32 %s4097_s1, 4  ;;  %s4089_s1 = smov 64   ;;  %s373_s21 = int_to_ptr.hbm [resolvable:$true] %s372_s21 }
  0x15   : > { %2685 = dma.hbm_to_vmem [thread:$0]  (!%p3162_p8), %s373_s21, 512, %s375_s24, [#allocation5], %s3035_s29, %s3035_s29, %s3036_s19  }
  0x16   : > { %s389_s28 = sshll.u32 %s4100_s3, 4  ;;  %s4090_s14 = smov 4   ;;  %s390_s28 = int_to_ptr.hbm [resolvable:$true] %s389_s28 }
  0x17   : > { %2688 = dma.hbm_to_vmem [thread:$0]  (!%p3162_p8), %s390_s28, 256, %s392_s23, [#allocation8], %s4089_s1, %s4089_s1, %s4090_s14  }
  0x18   : > { %s4101_s10 = sld [smem:[#allocation23_spill]]  ;;  %s3040_s24 = smov [#allocation10]  }
  0x19   : > { %s417_s29 = sshll.u32 %s3040_s24, 4  ;;  %s4102_s12 = sld [smem:[#allocation24_spill]]  ;;  %s418_s29 = int_to_ptr.vmem [resolvable:$true] %s417_s29 }
  0x1a   : > { %s3041_s28 = smov [#allocation11]   ;;  %s3193_s26 = sadd.s32 1, %s3032_s16  }
  0x1b   : > { %s434_s23 = sshll.u32 %s3041_s28, 4  ;;  %s203_s27 = sadd.s32 1, %s3028_s15  ;;  %s435_s23 = int_to_ptr.vmem [resolvable:$true] %s434_s23 }
  0x1c   : > { %s200_s24 = ssub.s32 %s3032_s16, %s3193_s26  ;;  %p210_p9 = scmp.ne.s32.totalorder %s3028_s15, %s3024_s30 }
  0x1d   : > { %p201_p10 = scmp.eq.s32.totalorder %s200_s24, 0  ;;  %p211_p11 = scmp.eq.s32.totalorder %s3032_s16, 0 }
  0x1e   : > { %s415_s21 = sshll.u32 %s4101_s10, 4  ;;  %p2703_p12 = scmp.lt.s32.totalorder %s3032_s16, 5  ;;  %s416_s21 = int_to_ptr.hbm [resolvable:$true] %s415_s21 }
  0x1f   : > { %s432_s3 = sshll.u32 %s4102_s12, 4  ;;  %p212_p13 = por %p211_p11, %p210_p9  ;;  %s433_s3 = int_to_ptr.hbm [resolvable:$true] %s432_s3 }
  0x20   : > { %2691 = dma.hbm_to_vmem [thread:$0]  (!%p3162_p8), %s416_s21, 1024, %s418_s29, [#allocation8], %s4089_s1, %s4089_s1, %s4090_s14  }
  0x21   : > { %2694 = dma.hbm_to_vmem [thread:$0]  (!%p3162_p8), %s433_s3, 1024, %s435_s23, [#allocation12], %s4089_s1, %s4089_s1, %s4090_s14  }
  0x22   : > { %s3203_s21 = scalar_select %p201_p10, %s3028_s15, %s203_s27  }
  0x23   : > { %s451_s29 = sand.u32 1, %s3032_s16   ;;  %s453_s19 = sand.u32 1, %s3028_s15  }
  0x24   : > { %4103 = sst [smem:[#allocation20_spill]] %s3203_s21  ;;  %s2658_s20 = smul.u32 320, %s3032_s16 }
  0x25   : > { %s2657_s25 = smul.u32 320, %s453_s19  ;;  %p3208_p0 = pnand %p2703_p12, %p212_p13 }
  0x26   : > { %s460_s1 = scalar_lea.hbm %s4082_s8, %s2658_s20  ;;  %s452_s27 = scalar_lea.sflag [#allocation5], %s451_s29 }
  0x27   : > { %s461_s14 = sshll.u32 %s460_s1, 4  ;;  %s455_s24 = scalar_lea.vmem [#allocation9], %s2657_s25  ;;  %s462_s14 = int_to_ptr.hbm [resolvable:$true] %s461_s14 }
  0x28   : > { %s463_s10 = sshll.u32 %s455_s24, 4  ;;  %s2920_s12 = sshra.s32 %s462_s14, 4  ;;  %s464_s10 = int_to_ptr.vmem [resolvable:$true] %s463_s10  ;;  %s2921_s12 = int_to_ptr.hbm [resolvable:$true] %s2920_s12 }
  0x29   : > { %s2922_s21 = scalar_lea.hbm %s2921_s12, 320  ;;  %p2924_p3 = pneg %p3208_p0 }
  0x2a   : > { %p2923_p2 = scmp.ne.s32.totalorder %s2921_s12, %s2922_s21  ;;  %s2927_s3 = scalar_lea.hbm %s4082_s8, 1600 }
  0x2b   : > { %p2928_p9 = scmp.lt.s32.totalorder %s2921_s12, %s4082_s8  ;;  %p2929_p10 = scmp.lt.s32.totalorder %s2927_s3, %s2922_s21 }
  0x2c   : > { %p2925_p7 = pnand %p2924_p3, %p2923_p2 }
  0x2d   : > { %p2930_p11 = por %p2929_p10, %p2928_p9 }
  0x2e   : > { %p2926_p8 = pneg %p2925_p7 }
  0x30   : > { %p2931_p12 = pnand %p2930_p11, %p2926_p8 }
  0x32   : > { %2934 = shalt.err (!%p2931_p12)
}
  0x33   : > { %s4105_s1 = smov 4   ;;  %s4106_s29 = smov 64  }
  0x34   : > { %2698 = dma.hbm_to_vmem [thread:$0]  (!%p3208_p0), %s462_s14, 5120, %s464_s10, %s452_s27, %s4106_s29, %s4106_s29, %s4105_s1  }
  0x35   : > { %483 = sbr.rel (%p3154_p6) target bundleno = 1423 (0x58f), region = 76 }
  0x3a   : > { %2995 = dma.done.wait (%p217_p1), [#allocation5], 512  }
  0x3b   : > { %2997 = vsyncadd (%p217_p1), [#allocation5], 4294966784 }
  0x3c   : > { %2999 = dma.done.wait (%p217_p1), [#allocation8], 256  }
  0x3d   : > { %3001 = vsyncadd (%p217_p1), [#allocation8], 4294967040  ;;  %s495_s12 = sand.u32 1, %s3138_s17   ;;  %s497_s10 = sand.u32 1, %s3024_s30  }
  0x3e   : > { %s2659_s14 = smul.u32 320, %s497_s10  ;;  %s496_s22 = scalar_lea.sflag [#allocation5], %s495_s12 }
  0x40   : > { %s3240_s21 = scalar_lea.vmem [#allocation9], %s2659_s14 }
  0x41   : > { %3003 = dma.done.wait (%p3147_p5), %s496_s22, 5120  }
  0x42   : > { %3005 = vsyncadd (%p3147_p5), %s496_s22, 4294962176 }
  0x43   : > { %3007 = dma.done.wait (%p217_p1), [#allocation8], 1024  }
  0x44   : > { %3009 = vsyncadd (%p217_p1), [#allocation8], 4294966272 }
  0x45   : > { %3011 = dma.done.wait (%p217_p1), [#allocation12], 1024  }
  0x46   : > { %3013 = vsyncadd (%p217_p1), [#allocation12], 4294966272  ;;  %p555_p6 = scmp.lt.s32.totalorder %s3138_s17, 4 }
  0x47   : > { %564 = sbr.rel (%p2287_p4) target bundleno = 97 (0x61), region = 100 }
  0x48   : > { %s556_s25 = scalar_select %p555_p6, %s3138_s17, 4 }
  0x4a   : > { %s2586_s28 = sshll.u32 %s556_s25, 4 }
  0x4b   : > { %s3259_s27 = scalar_lea.vmem %s4083_s9, %s2586_s28 }
  0x4c   : > { %v565_v0 = vld [vmem:[%s4074_s0] sm:$0xff]  ;;  %v566_v1 = vld [vmem:[%s4074_s0 + $0x8] sm:$0xff]  ;;  %v567_v2 = vld [vmem:[%s4074_s0 + $0x10] sm:$0xff] }
  0x4d   : > { %581 = vst [vmem:[#allocation2 + $0x30] sm:$0xff] %v565_v0  ;;  %v568_v3 = vld [vmem:[%s4074_s0 + $0x18] sm:$0xff]  ;;  %v569_v4 = vld [vmem:[%s4074_s0 + $0x20] sm:$0xff]  ;;  %v570_v5 = vld [vmem:[%s4074_s0 + $0x28] sm:$0xff] }
  0x4e   : > { %582 = vst [vmem:[#allocation2] sm:$0xff] %v566_v1  ;;  %v571_v6 = vld [vmem:[%s4074_s0 + $0x30] sm:$0xff]  ;;  %v572_v7 = vld [vmem:[%s4074_s0 + $0x38] sm:$0xff]  ;;  %v573_v8 = vld [vmem:[%s4074_s0 + $0x40] sm:$0xff] }
  0x4f   : > { %583 = vst [vmem:[#allocation2 + $0x58] sm:$0xff] %v567_v2  ;;  %v574_v9 = vld [vmem:[%s4074_s0 + $0x48] sm:$0xff]  ;;  %v575_v10 = vld [vmem:[%s4074_s0 + $0x50] sm:$0xff]  ;;  %v576_v11 = vld [vmem:[%s4074_s0 + $0x58] sm:$0xff] }
  0x50   : > { %584 = vst [vmem:[#allocation2 + $0x18] sm:$0xff] %v568_v3  ;;  %v577_v12 = vld [vmem:[%s4074_s0 + $0x60] sm:$0xff]  ;;  %v578_v13 = vld [vmem:[%s4074_s0 + $0x68] sm:$0xff]  ;;  %v579_v14 = vld [vmem:[%s4074_s0 + $0x70] sm:$0xff] }
  0x51   : > { %585 = vst [vmem:[#allocation2 + $0x50] sm:$0xff] %v569_v4  ;;  %v580_v15 = vld [vmem:[%s4074_s0 + $0x78] sm:$0xff]  ;;  %v597_v16 = vld [vmem:[#allocation4] sm:$0xff]  ;;  %v598_v17 = vld [vmem:[#allocation4 + $0x8] sm:$0xff] }
  0x52   : > { %586 = vst [vmem:[#allocation2 + $0x68] sm:$0xff] %v570_v5  ;;  %v599_v18 = vld [vmem:[#allocation4 + $0x10] sm:$0xff]  ;;  %v600_v19 = vld [vmem:[#allocation4 + $0x18] sm:$0xff] }
  0x53   : > { %587 = vst [vmem:[#allocation2 + $0x8] sm:$0xff] %v571_v6 }
  0x54   : > { %588 = vst [vmem:[#allocation2 + $0x48] sm:$0xff] %v572_v7 }
  0x55   : > { %589 = vst [vmem:[#allocation2 + $0x40] sm:$0xff] %v573_v8 }
  0x56   : > { %590 = vst [vmem:[#allocation2 + $0x20] sm:$0xff] %v574_v9 }
  0x57   : > { %591 = vst [vmem:[#allocation2 + $0x10] sm:$0xff] %v575_v10 }
  0x58   : > { %592 = vst [vmem:[#allocation2 + $0x38] sm:$0xff] %v576_v11 }
  0x59   : > { %593 = vst [vmem:[#allocation2 + $0x60] sm:$0xff] %v577_v12 }
  0x5a   : > { %594 = vst [vmem:[#allocation2 + $0x70] sm:$0xff] %v578_v13 }
  0x5b   : > { %595 = vst [vmem:[#allocation2 + $0x78] sm:$0xff] %v579_v14 }
  0x5c   : > { %596 = vst [vmem:[#allocation2 + $0x28] sm:$0xff] %v580_v15 }
  0x5d   : > { %601 = vst [vmem:[#allocation3 + $0x8] sm:$0xff] %v597_v16 }
  0x5e   : > { %602 = vst [vmem:[#allocation3] sm:$0xff] %v598_v17 }
  0x5f   : > { %603 = vst [vmem:[#allocation3 + $0x10] sm:$0xff] %v599_v18 }
  0x60   : > { %604 = vst [vmem:[#allocation3 + $0x18] sm:$0xff] %v600_v19 }
  0x61 PF: > { %v2596_v20 = vld [vmem:[%s3240_s21 + $0x38] sm:$0xff]  ;;  %v2595_v21 = vld [vmem:[%s3240_s21 + $0x30] sm:$0xff]  ;;  %v2594_v22 = vld [vmem:[%s3240_s21 + $0x28] sm:$0xff]  ;;  %p2517_p1 = scmp.ne.s32.totalorder %s3138_s17, 4 }
  0x62   : > { %756 = vmatpush.bf16.msra.mxu1 %v2596_v20  ;;  %v2593_v23 = vld [vmem:[%s3240_s21 + $0x20] sm:$0xff]  ;;  %v2592_v24 = vld [vmem:[%s3240_s21 + $0x18] sm:$0xff]  ;;  %v2591_v25 = vld [vmem:[%s3240_s21 + $0x10] sm:$0xff] }
  0x63   : > { %v2590_v26 = vld [vmem:[%s3240_s21 + $0x8] sm:$0xff]  ;;  %v2589_v27 = vld [vmem:[%s3240_s21] sm:$0xff]  ;;  %v606_v29 = vld [vmem:[#allocation2] sm:$0xff] }
  0x64   : > { %v605_v28 = vld [vmem:[#allocation2 + $0x30] sm:$0xff]  ;;  %v607_v31 = vld [vmem:[#allocation2 + $0x58] sm:$0xff]  ;;  %v620_v35 = vld [vmem:[#allocation2 + $0x28] sm:$0xff] }
  0x65   : > { %v3319_v30 = vpack.c.bf16 %v606_v29, %v605_v28  ;;  %v608_v32 = vld [vmem:[#allocation2 + $0x18] sm:$0xff]  ;;  %v609_v37 = vld [vmem:[#allocation2 + $0x50] sm:$0xff]  ;;  %v610_v38 = vld [vmem:[#allocation2 + $0x68] sm:$0xff] }
  0x66   : > { %757 = vmatpush.bf16.msra.mxu1 %v2595_v21  ;;  %v3322_v33 = vpack.c.bf16 %v608_v32, %v607_v31  ;;  %v619_v34 = vld [vmem:[#allocation2 + $0x78] sm:$0xff]  ;;  %v3328_v39 = vpack.c.bf16 %v610_v38, %v609_v37  ;;  %v617_v40 = vld [vmem:[#allocation2 + $0x60] sm:$0xff]  ;;  %v618_v41 = vld [vmem:[#allocation2 + $0x70] sm:$0xff] }
  0x67   : > { %v3325_v36 = vpack.c.bf16 %v620_v35, %v619_v34  ;;  %v615_v42 = vld [vmem:[#allocation2 + $0x10] sm:$0xff]  ;;  %v3331_v43 = vpack.c.bf16 %v618_v41, %v617_v40  ;;  %v616_v44 = vld [vmem:[#allocation2 + $0x38] sm:$0xff]  ;;  %v613_v46 = vld [vmem:[#allocation2 + $0x40] sm:$0xff] }
  0x68   : > { %v3334_v45 = vpack.c.bf16 %v616_v44, %v615_v42  ;;  %v614_v47 = vld [vmem:[#allocation2 + $0x20] sm:$0xff]  ;;  %v611_v48 = vld [vmem:[#allocation2 + $0x8] sm:$0xff]  ;;  %v2604_v2 = vld [vmem:[%s3240_s21 + $0x68] sm:$0xff] }
  0x69   : > { %671 = vmatpush.bf16.msra.mxu0 %v3325_v36  ;;  %v612_v49 = vld [vmem:[#allocation2 + $0x48] sm:$0xff]  ;;  %v3337_v50 = vpack.c.bf16 %v614_v47, %v613_v46  ;;  %v2587_v52 = vld [vmem:[#allocation7] sm:$0xff]  ;;  %v2603_v3 = vld [vmem:[%s3240_s21 + $0x60] sm:$0xff] }
  0x6a   : > { %758 = vmatpush.bf16.msra.mxu1 %v2594_v22  ;;  %v3340_v51 = vpack.c.bf16 %v612_v49, %v611_v48  ;;  %v2588_v53 = vld [vmem:[#allocation7 + $0x8] sm:$0xff]  ;;  %v2605_v0 = vld [vmem:[%s3240_s21 + $0x70] sm:$0xff]  ;;  %v2600_v10 = vld [vmem:[%s3240_s21 + $0x48] sm:$0xff] }
  0x6b   : > { %v2606_v63 = vld [vmem:[%s3240_s21 + $0x78] sm:$0xff]  ;;  %v2601_v7 = vld [vmem:[%s3240_s21 + $0x50] sm:$0xff]  ;;  %v2599_v11 = vld [vmem:[%s3240_s21 + $0x40] sm:$0xff] }
  0x6c   : > { %881 = vmatpush.bf16.msra.mxu3 %v2606_v63  ;;  %v2602_v6 = vld [vmem:[%s3240_s21 + $0x58] sm:$0xff]  ;;  %v2613_v21 = vld [vmem:[%s3240_s21 + $0xb0] sm:$0xff]  ;;  %v638_v31 = vld [vmem:[%s4080_s6 + $0x18] sm:$0xff] }
  0x6d   : > { %672 = vmatpush.bf16.msra.mxu0 %v3331_v43  ;;  %v2614_v20 = vld [vmem:[%s3240_s21 + $0xb8] sm:$0xff]  ;;  %v2609_v29 = vld [vmem:[%s3240_s21 + $0x90] sm:$0xff]  ;;  %v2608_v35 = vld [vmem:[%s3240_s21 + $0x88] sm:$0xff] }
  0x6e   : > { %759 = vmatpush.bf16.msra.mxu1 %v2593_v23  ;;  %v2612_v23 = vld [vmem:[%s3240_s21 + $0xa8] sm:$0xff]  ;;  %v2610_v28 = vld [vmem:[%s3240_s21 + $0x98] sm:$0xff]  ;;  %v635_v32 = vld [vmem:[%s4080_s6] sm:$0xff] }
  0x6f   : > { %v2607_v37 = vld [vmem:[%s3240_s21 + $0x80] sm:$0xff]  ;;  %v642_v38 = vld [vmem:[%s4080_s6 + $0x38] sm:$0xff]  ;;  %v636_v40 = vld [vmem:[%s4080_s6 + $0x8] sm:$0xff] }
  0x70   : > { %882 = vmatpush.bf16.msra.mxu3 %v2605_v0  ;;  %v3414_v42 = vld [vmem:[#allocation3 + $0x8] sm:$0xff]  ;;  %v3416_v44 = vld [vmem:[#allocation3] sm:$0xff]  ;;  %v641_v49 = vld [vmem:[%s4080_s6 + $0x30] sm:$0xff] }
  0x71   : > { %673 = vmatpush.bf16.msra.mxu0 %v3334_v45  ;;  %v633_v47 = vpack.c.bf16 %v3416_v44, %v3414_v42  ;;  %v639_v63 = vld [vmem:[%s4080_s6 + $0x20] sm:$0xff] }
  0x72   : > { %760 = vmatpush.bf16.msra.mxu1 %v2592_v24  ;;  %v2611_v24 = vld [vmem:[%s3240_s21 + $0xa0] sm:$0xff] }
  0x74   : > { %883 = vmatpush.bf16.msra.mxu3 %v2604_v2  ;;  %v644_v2 = vld [vmem:[%s4080_s6 + $0x48] sm:$0xff] }
  0x75   : > { %674 = vmatpush.bf16.msra.mxu0 %v3337_v50 }
  0x76   : > { %761 = vmatpush.bf16.msra.mxu1 %v2591_v25  ;;  %v637_v25 = vld [vmem:[%s4080_s6 + $0x10] sm:$0xff] }
  0x78   : > { %884 = vmatpush.bf16.msra.mxu3 %v2603_v3  ;;  %v648_v3 = vld [vmem:[%s4080_s6 + $0x68] sm:$0xff] }
  0x79   : > { %675 = vmatpush.bf16.msra.mxu0 %v3340_v51 }
  0x7a   : > { %762 = vmatpush.bf16.msra.mxu1 %v2590_v26 }
  0x7c   : > { %885 = vmatpush.bf16.msra.mxu3 %v2602_v6  ;;  %v3436_v6 = vld [vmem:[#allocation3 + $0x10] sm:$0xff] }
  0x7d   : > { %676 = vmatpush.bf16.msra.mxu0 %v3328_v39 }
  0x7e   : > { %763 = vmatpush.bf16.msra.mxu1 %v2589_v27  ;;  %v3042_v27 = vmov 0  }
  0x7f   : > { %2753 = vset.pattern.permute.xlu1 %v3042_v27  ;;  %2752 = vset.pattern.permute.xlu0 %v3042_v27 }
  0x80   : > { %886 = vmatpush.bf16.msra.mxu3 %v2601_v7  ;;  %1466 = vperm.xlu1 %2753, %v637_v25   ;;  %v3438_v7 = vld [vmem:[#allocation3 + $0x18] sm:$0xff] }
  0x81   : > { %764 = vmatmul.bf16.vlgmr.msra.gmra.mxu1 %v3319_v30  ;;  %677 = vmatpush.bf16.msra.mxu0 %v3322_v33  ;;  %v2616_v25 = vld [vmem:[%s3240_s21 + $0xc8] sm:$0xff] }
  0x82   : > { %2754 = vset.pattern.permute.xlu2 %v3042_v27  ;;  %1456 = vperm.xlu0 %2752, %v635_v32  }
  0x83   : > { %1476 = vperm.xlu2 %2754, %v639_v63  }
  0x84   : > { %887 = vmatpush.bf16.msra.mxu3 %v2600_v10  ;;  %v647_v10 = vld [vmem:[%s4080_s6 + $0x60] sm:$0xff] }
  0x85   : > { %678 = vmatpush.bf16.msra.mxu0 %v3319_v30 }
  0x88   : > { %679 = vmatmul.bf16.vlgmr.msra.gmra.mxu0 %v2587_v52  ;;  %888 = vmatpush.bf16.msra.mxu3 %v2599_v11  ;;  %v645_v52 = vld [vmem:[%s4080_s6 + $0x50] sm:$0xff]  ;;  %v651_v11 = vld [vmem:[%s4081_s7] sm:$0xff] }
  0x89   : > { %995 = vmatpush.bf16.msrb.mxu0 %v2614_v20  ;;  %1471 = vperm.xlu1 %2753, %v638_v31   ;;  %v2621_v20 = vld [vmem:[%s3240_s21 + $0xf0] sm:$0xff] }
  0x8a   : > { %1461 = vperm.xlu0 %2752, %v636_v40  }
  0x8d   : > { %996 = vmatpush.bf16.msrb.mxu0 %v2613_v21  ;;  %v2620_v21 = vld [vmem:[%s3240_s21 + $0xe8] sm:$0xff] }
  0x91   : > { %769 = vmatmul.bf16.gmra.mxu1 %v3322_v33  ;;  %997 = vmatpush.bf16.msrb.mxu0 %v2612_v23  ;;  %v2618_v23 = vld [vmem:[%s3240_s21 + $0xd8] sm:$0xff] }
  0x92   : > { %1491 = vperm.xlu1 %2753, %v642_v38   ;;  %1486 = vperm.xlu0 %2752, %v641_v49  }
  0x95   : > { %998 = vmatpush.bf16.msrb.mxu0 %v2611_v24  ;;  %v2617_v24 = vld [vmem:[%s3240_s21 + $0xd0] sm:$0xff] }
  0x98   : > { %684 = vmatmul.bf16.gmra.mxu0 %v2588_v53 }
  0x99   : > { %999 = vmatpush.bf16.msrb.mxu0 %v2610_v28 }
  0x9a   : > { %1506 = vperm.xlu1 %2753, %v645_v52   ;;  %1501 = vperm.xlu0 %2752, %v644_v2   ;;  %v2755_v52 = vld [vmem:[%s3259_s27] ss:$0 sm:$0xff] }
  0x9d   : > { %1000 = vmatpush.bf16.msrb.mxu0 %v2609_v29 }
  0xa1   : > { %774 = vmatmul.bf16.gmra.mxu1 %v3328_v39  ;;  %1001 = vmatpush.bf16.msrb.mxu0 %v2608_v35 }
  0xa2   : > { %1521 = vperm.xlu1 %2753, %v648_v3   ;;  %1516 = vperm.xlu0 %2752, %v647_v10  }
  0xa5   : > { %1002 = vmatpush.bf16.msrb.mxu0 %v2607_v37 }
  0xa8   : > { %1003 = vmatmul.bf16.vlgmr.msrb.gmra.mxu0 %v633_v47 }
  0xaa   : > { %1681 = vperm.xlu1 %2753, %v651_v11  }
  0xb1   : > { %779 = vmatmul.bf16.gmra.mxu1 %v3340_v51 }
  0xc1   : > { %784 = vmatmul.bf16.gmra.mxu1 %v3337_v50 }
  0xd1   : > { %789 = vmatmul.bf16.gmra.mxu1 %v3334_v45 }
  0xe1   : > { %794 = vmatmul.bf16.gmra.mxu1 %v3331_v43 }
  0xf1   : > { %799 = vmatmul.bf16.gmra.mxu1 %v3325_v36 }
  0xf2   : > { %v3513_v28 = vpop.permute.xlu1 %1466 }
  0xf4   : > { %v3509_v27 = vpop.permute.xlu0 %1456 }
  0xfc   : > { %v3515_v31 = vpop.permute.xlu0 %1461 }
  0xfe   : > { %v3351_v54 = vpop.f32.mrf.mxu1 }
 0x104   : > { %v3522_v37 = vpop.permute.xlu0 %1486 }
 0x105   : > { %v680_v8 = vpop.f32.mrf.mxu0 }
 0x106   : > { %v3353_v55 = vpop.f32.mrf.mxu1 }
 0x107   : > { %v809_v56 = vpack.c.bf16 %v3353_v55, %v3351_v54  ;;  %v653_v54 = vld [vmem:[%s4081_s7 + $0x10] sm:$0xff] }
 0x108   : > { %v2627_v55 = vld [vmem:[%s3240_s21 + $0x120] sm:$0xff] }
 0x10d   : > { %v682_v12 = vpop.f32.mrf.mxu0 }
 0x10e   : > { %v3357_v57 = vpop.f32.mrf.mxu1  ;;  %v3385_v13 = vpack.c.bf16 %v682_v12, %v680_v8  ;;  %v634_v8 = vpack.c.bf16 %v3438_v7, %v3436_v6  ;;  %v2598_v12 = vld [vmem:[%s4076_s2 + $0x8] sm:$0xff] }
 0x110   : > { %889 = vmatmul.bf16.vlgmr.msra.gmra.mxu3 %v3385_v13  ;;  %1008 = vmatmul.bf16.gmra.mxu0 %v634_v8 }
 0x115   : > { %v685_v15 = vpop.f32.mrf.mxu0 }
 0x116   : > { %v3359_v58 = vpop.f32.mrf.mxu1 }
 0x117   : > { %v810_v59 = vpack.c.bf16 %v3359_v58, %v3357_v57  ;;  %v2629_v57 = vld [vmem:[%s3240_s21 + $0x130] sm:$0xff]  ;;  %v646_v58 = vld [vmem:[%s4080_s6 + $0x58] sm:$0xff] }
 0x11d   : > { %v687_v17 = vpop.f32.mrf.mxu0 }
 0x11e   : > { %v3363_v60 = vpop.f32.mrf.mxu1  ;;  %v3388_v18 = vpack.c.bf16 %v687_v17, %v685_v15  ;;  %v652_v15 = vld [vmem:[%s4081_s7 + $0x8] sm:$0xff]  ;;  %v2623_v17 = vld [vmem:[%s3240_s21 + $0x100] sm:$0xff] }
 0x120   : > { %894 = vmatmul.bf16.gmra.mxu3 %v3388_v18 }
 0x126   : > { %v3365_v61 = vpop.f32.mrf.mxu1 }
 0x127   : > { %v811_v62 = vpack.c.bf16 %v3365_v61, %v3363_v60  ;;  %v2597_v60 = vld [vmem:[%s4076_s2] sm:$0xff]  ;;  %v2628_v61 = vld [vmem:[%s3240_s21 + $0x128] sm:$0xff] }
 0x12e   : > { %v3371_v1 = vpop.f32.mrf.mxu1 }
 0x136   : > { %v3375_v4 = vpop.f32.mrf.mxu1 }
 0x137   : > { %v812_v5 = vpack.c.bf16 %v3375_v4, %v3371_v1  ;;  %v2630_v1 = vld [vmem:[%s3240_s21 + $0x138] sm:$0xff]  ;;  %v643_v4 = vld [vmem:[%s4080_s6 + $0x40] sm:$0xff] }
 0x13e   : > { %v3381_v9 = vpop.f32.mrf.mxu1 }
 0x146   : > { %v787_v14 = vpop.f32.mrf.mxu1 }
 0x147   : > { %v813_v0 = vpack.c.bf16 %v787_v14, %v3381_v9  ;;  %v640_v9 = vld [vmem:[%s4080_s6 + $0x28] sm:$0xff]  ;;  %v2625_v14 = vld [vmem:[%s3240_s21 + $0x110] sm:$0xff] }
 0x148   : > { %1481 = vperm.xlu2 %2754, %v640_v9  }
 0x14e   : > { %v790_v16 = vpop.f32.mrf.mxu1 }
 0x150   : > { %1496 = vperm.xlu2 %2754, %v643_v4  }
 0x156   : > { %v792_v19 = vpop.f32.mrf.mxu1 }
 0x157   : > { %v814_v53 = vpack.c.bf16 %v792_v19, %v790_v16  ;;  %v2624_v16 = vld [vmem:[%s3240_s21 + $0x108] sm:$0xff]  ;;  %v2622_v19 = vld [vmem:[%s3240_s21 + $0xf8] sm:$0xff] }
 0x158   : > { %1511 = vperm.xlu2 %2754, %v646_v58   ;;  %1166 = vmatpush.bf16.msra.mxu2 %v2622_v19 }
 0x15c   : > { %1167 = vmatpush.bf16.msra.mxu2 %v2621_v20 }
 0x15e   : > { %v795_v22 = vpop.f32.mrf.mxu1 }
 0x160   : > { %1168 = vmatpush.bf16.msra.mxu2 %v2620_v21 }
 0x166   : > { %v797_v26 = vpop.f32.mrf.mxu1 }
 0x167   : > { %v815_v48 = vpack.c.bf16 %v797_v26, %v795_v22  ;;  %v2619_v22 = vld [vmem:[%s3240_s21 + $0xe0] sm:$0xff] }
 0x168   : > { %1169 = vmatpush.bf16.msra.mxu2 %v2619_v22  ;;  %v2615_v26 = vld [vmem:[%s3240_s21 + $0xc0] sm:$0xff] }
 0x16c   : > { %1170 = vmatpush.bf16.msra.mxu2 %v2618_v23 }
 0x16e   : > { %v800_v34 = vpop.f32.mrf.mxu1 }
 0x170   : > { %1171 = vmatpush.bf16.msra.mxu2 %v2617_v24 }
 0x174   : > { %1172 = vmatpush.bf16.msra.mxu2 %v2616_v25 }
 0x176   : > { %v802_v41 = vpop.f32.mrf.mxu1 }
 0x177   : > { %v816_v46 = vpack.c.bf16 %v802_v41, %v800_v34  ;;  %v3520_v34 = vpop.permute.xlu1 %1471  ;;  %v3529_v41 = vpop.permute.xlu0 %1501 }
 0x178   : > { %1173 = vmatpush.bf16.msra.mxu2 %v2615_v26 }
 0x179   : > { %912 = vmatpush.bf16.msrb.mxu3 %v816_v46  ;;  %v1004_v46 = vpop.f32.mrf.mxu0 }
 0x17b   : > { %1174 = vmatmul.bf16.vlgmr.msra.gmra.mxu2 %v3319_v30 }
 0x17d   : > { %913 = vmatpush.bf16.msrb.mxu3 %v815_v48 }
 0x17f   : > { %v3526_v38 = vpop.permute.xlu1 %1491 }
 0x181   : > { %914 = vmatpush.bf16.msrb.mxu3 %v814_v53  ;;  %v3536_v53 = vpop.permute.xlu0 %1516  ;;  %v1006_v2 = vpop.f32.mrf.mxu0 }
 0x185   : > { %915 = vmatpush.bf16.msrb.mxu3 %v813_v0 }
 0x189   : > { %916 = vmatpush.bf16.msrb.mxu3 %v812_v5  ;;  %v650_v5 = vld [vmem:[%s4080_s6 + $0x78] sm:$0xff] }
 0x18a   : > { %1531 = vperm.xlu0 %2752, %v650_v5  }
 0x18b   : > { %1179 = vmatmul.bf16.gmra.mxu2 %v3322_v33  ;;  %v3533_v33 = vpop.permute.xlu1 %1506 }
 0x18d   : > { %917 = vmatpush.bf16.msrb.mxu3 %v811_v62  ;;  %v2626_v62 = vld [vmem:[%s3240_s21 + $0x118] sm:$0xff] }
 0x191   : > { %918 = vmatpush.bf16.msrb.mxu3 %v810_v59  ;;  %v654_v59 = vld [vmem:[%s4081_s7 + $0x18] sm:$0xff] }
 0x192   : > { %1696 = vperm.xlu1 %2753, %v654_v59   ;;  %1691 = vperm.xlu0 %2752, %v653_v54  }
 0x193   : > { %v3543_v9 = vpop.permute.xlu1 %1521 }
 0x195   : > { %919 = vmatpush.bf16.msrb.mxu3 %v809_v56  ;;  %v649_v56 = vld [vmem:[%s4080_s6 + $0x70] sm:$0xff] }
 0x196   : > { %1526 = vperm.xlu2 %2754, %v649_v56  }
 0x198   : > { %920 = vmatmul.bf16.vlgmr.msrb.gmra.mxu3 %v2597_v60 }
 0x199   : > { %1281 = vmatpush.bf16.msra.mxu3 %v2630_v1 }
 0x19b   : > { %1184 = vmatmul.bf16.gmra.mxu2 %v3328_v39 }
 0x19d   : > { %1282 = vmatpush.bf16.msra.mxu3 %v2629_v57  ;;  %v1009_v57 = vpop.f32.mrf.mxu0 }
 0x19e   : > { %1686 = vperm.xlu2 %2754, %v652_v15  }
 0x1a1   : > { %1283 = vmatpush.bf16.msra.mxu3 %v2628_v61 }
 0x1a5   : > { %1284 = vmatpush.bf16.msra.mxu3 %v2627_v55  ;;  %v3553_v55 = vpop.permute.xlu1 %1681  ;;  %v1011_v24 = vpop.f32.mrf.mxu0 }
 0x1a8   : > { %925 = vmatmul.bf16.gmra.mxu3 %v2598_v12 }
 0x1a9   : > { %1285 = vmatpush.bf16.msra.mxu3 %v2626_v62 }
 0x1ab   : > { %1189 = vmatmul.bf16.gmra.mxu2 %v3340_v51 }
 0x1ad   : > { %1286 = vmatpush.bf16.msra.mxu3 %v2625_v14 }
 0x1b1   : > { %1287 = vmatpush.bf16.msra.mxu3 %v2624_v16 }
 0x1b5   : > { %1288 = vmatpush.bf16.msra.mxu3 %v2623_v17 }
 0x1b8   : > { %1289 = vmatmul.bf16.vlgmr.msra.gmra.mxu3 %v3385_v13  ;;  %v890_v13 = vpop.f32.mrf.mxu3 }
 0x1bb   : > { %1194 = vmatmul.bf16.gmra.mxu2 %v3337_v50 }
 0x1c0   : > { %v892_v29 = vpop.f32.mrf.mxu3 }
 0x1c8   : > { %1294 = vmatmul.bf16.gmra.mxu3 %v3388_v18  ;;  %v3511_v18 = vpop.permute.xlu2 %1476  ;;  %v895_v35 = vpop.f32.mrf.mxu3 }
 0x1cb   : > { %1199 = vmatmul.bf16.gmra.mxu2 %v3334_v45 }
 0x1d0   : > { %v3518_v32 = vpop.permute.xlu2 %1481  ;;  %v897_v40 = vpop.f32.mrf.mxu3 }
 0x1d8   : > { %v3524_v30 = vpop.permute.xlu2 %1496 }
 0x1db   : > { %1204 = vmatmul.bf16.gmra.mxu2 %v3331_v43 }
 0x1e0   : > { %v3531_v47 = vpop.permute.xlu2 %1511 }
 0x1eb   : > { %1209 = vmatmul.bf16.gmra.mxu2 %v3325_v36 }
 0x1f0   : > { %v3541_v3 = vpop.permute.xlu2 %1526 }
 0x1f8   : > { %v3551_v61 = vpop.permute.xlu2 %1686 }
 0x1fc   : > { %v3546_v1 = vpop.permute.xlu0 %1531 }
 0x204   : > { %v3559_v12 = vpop.permute.xlu0 %1691 }
 0x21b   : > { %v921_v48 = vpop.f32.mrf.mxu3 }
 0x21c   : > { %v922_v49 = vadd.f32 %v921_v48, %v890_v13 }
 0x21e   : > { %v1014_v63 = vadd.f32 %v1004_v46, %v922_v49 }
 0x220   : > { %v3538_v0 = vadd.f32 %v2755_v52, %v1014_v63 }
 0x222   : > { %v1024_v10 = vsub.f32 0.0, %v3538_v0  ;;  %v1699_v16 = vmul.f32 %v3553_v55, %v3538_v0 }
 0x223   : > { %v923_v39 = vpop.f32.mrf.mxu3 }
 0x224   : > { %v924_v8 = vadd.f32 %v923_v39, %v892_v29  ;;  %v1028_v5 = vmul.f32 1.442695, %v1024_v10  ;;  %v1713_v50 = vmul.f32 %v1699_v16, %v1699_v16  ;;  %v3571_v29 = vpop.permute.xlu1 %1696 }
 0x226   : > { %v1015_v11 = vadd.f32 %v1006_v2, %v924_v8  ;;  %2758 = vpow2.f32 %v1028_v5 }
 0x228   : > { %v3548_v4 = vadd.f32 %v2755_v52, %v1015_v11 }
 0x22a   : > { %v1025_v60 = vsub.f32 0.0, %v3548_v4  ;;  %v1700_v62 = vmul.f32 %v3551_v61, %v3548_v4 }
 0x22b   : > { %v926_v58 = vpop.f32.mrf.mxu3 }
 0x22c   : > { %v1030_v59 = vmul.f32 1.442695, %v1025_v60  ;;  %v927_v51 = vadd.f32 %v926_v58, %v895_v35  ;;  %v2759_v15 = vpop.eup %2758  ;;  %v1714_v23 = vmul.f32 %v1700_v62, %v1700_v62  ;;  %v1703_v35 = vadd.f32 %v1700_v62, %v1699_v16 }
 0x22d   : > { %v3567_v25 = vadd.f32 1.0, %v2759_v15 }
 0x22e   : > { %2760 = vpow2.f32 %v1030_v59  ;;  %v1016_v54 = vadd.f32 %v1009_v57, %v927_v51  ;;  %v1717_v49 = vadd.f32 %v1714_v23, %v1713_v50 }
 0x22f   : > { %vm1045_vm0 = vweird.f32 %v3567_v25 }
 0x230   : > { %v3555_v56 = vadd.f32 %v2755_v52, %v1016_v54 }
 0x232   : > { %v1026_v14 = vsub.f32 0.0, %v3555_v56  ;;  %v1701_v21 = vmul.f32 %v3559_v12, %v3555_v56 }
 0x233   : > { %v928_v17 = vpop.f32.mrf.mxu3 }
 0x234   : > { %v2761_v19 = vpop.eup %2760  ;;  %v1032_v20 = vmul.f32 1.442695, %v1026_v14  ;;  %v929_v22 = vadd.f32 %v928_v17, %v897_v40  ;;  %v1715_v46 = vmul.f32 %v1701_v21, %v1701_v21  ;;  %v1704_v63 = vadd.f32 %v1703_v35, %v1701_v21 }
 0x235   : > { %v3569_v13 = vadd.f32 1.0, %v2761_v19 }
 0x236   : > { %2762 = vpow2.f32 %v1032_v20  ;;  %v1017_v26 = vadd.f32 %v1011_v24, %v929_v22  ;;  %v1718_v10 = vadd.f32 %v1717_v49, %v1715_v46 }
 0x237   : > { %2764 = vrcp.f32 %v3567_v25  ;;  %vm1060_vm2 = vweird.f32 %v3569_v13 }
 0x238   : > { %v3573_v48 = vadd.f32 %v2755_v52, %v1017_v26  ;;  %2766 = vrcp.f32 %v3569_v13 }
 0x23a   : > { %v1027_v40 = vsub.f32 0.0, %v3573_v48  ;;  %v1702_v2 = vmul.f32 %v3571_v29, %v3573_v48 }
 0x23b   : > { %v3580_v39 = vpop.f32.mrf.mxu3 }
 0x23c   : > { %v2763_v8 = vpop.eup %2762  ;;  %v1034_v11 = vmul.f32 1.442695, %v1027_v40  ;;  %v1705_v5 = vadd.f32 %v1704_v63, %v1702_v2  ;;  %v1716_v60 = vmul.f32 %v1702_v2, %v1702_v2 }
 0x23d   : > { %v3582_v52 = vadd.f32 1.0, %v2763_v8  ;;  %v3585_v59 = vpop.eup %2764 }
 0x23e   : > { %2768 = vpow2.f32 %v1034_v11  ;;  %v1706_v57 = vrot.slane %v1705_v5, 4  ;;  %v1719_v58 = vadd.f32 %v1718_v10, %v1716_v60  ;;  %v3587_v62 = vpop.eup %2766  ;;  %v1041_v24 = vmul.f32 %v3585_v59, %v3567_v25 }
 0x23f   : > { %2770 = vrcp.f32 %v3582_v52  ;;  %v1056_v21 = vmul.f32 %v3587_v62, %v3569_v13  ;;  %vm1046_vm1 = vweird.f32 %v3585_v59  ;;  %vm1061_vm4 = vweird.f32 %v3587_v62 }
 0x240   : > { %v1707_v51 = vadd.f32 %v1706_v57, %v1705_v5  ;;  %v1720_v54 = vrot.slane %v1719_v58, 4  ;;  %v1042_v40 = vsub.f32 1.0, %v1041_v24  ;;  %vm1075_vm5 = vweird.f32 %v3582_v52  ;;  %vm3640_vm8 = vmor %vm1060_vm2, %vm1061_vm4 }
 0x241   : > { %v1057_v49 = vsub.f32 1.0, %v1056_v21  ;;  %v1081_v21 = vand.u32 2147483648, %v3582_v52  ;;  %vm3652_vm11 = vmor %vm1045_vm0, %vm1046_vm1  ;;  %vm1362_vm0 = vcmask 261120  }
 0x242   : > { %v1708_v14 = vrot.slane %v1707_v51, 2  ;;  %v1721_v15 = vadd.f32 %v1720_v54, %v1719_v58  ;;  %v1049_v54 = vand.u32 2147483647, %v3567_v25 }
 0x243   : > { %v3590_v16 = vpop.f32.mrf.mxu3  ;;  %v1058_v57 = vmul.f32 %v3587_v62, %v1057_v49  ;;  %v1082_v43 = vor.u32 1.1754944e-38, %v1081_v21 }
 0x244   : > { %v2769_v17 = vpop.eup %2768  ;;  %v1709_v19 = vadd.f32 %v1708_v14, %v1707_v51  ;;  %v1722_v20 = vrot.slane %v1721_v15, 2  ;;  %v1043_v51 = vmul.f32 %v3585_v59, %v1042_v40  ;;  %vm1050_vm15 = vcmp.eq.f32.partialorder %v1049_v54, 8.507059e+37  ;;  %v2636_v54 = vld [vmem:[%s4078_s4 + $0x28] sm:$0xff] }
 0x245   : > { %v3594_v22 = vpop.eup %2770  ;;  %v3596_v23 = vadd.f32 1.0, %v2769_v17 }
 0x246   : > { %v1710_v26 = vrot.slane %v1709_v19, 1  ;;  %v1723_v50 = vadd.f32 %v1722_v20, %v1721_v15  ;;  %v1071_v45 = vmul.f32 %v3594_v22, %v3582_v52  ;;  %vm1076_vm3 = vweird.f32 %v3594_v22 }
 0x247   : > { %2772 = vrcp.f32 %v3596_v23  ;;  %v1079_v20 = vand.u32 2147483647, %v3582_v52  ;;  %vm3625_vm6 = vmor %vm1075_vm5, %vm1076_vm3  ;;  %v1094_v49 = vand.u32 2147483647, %v3596_v23  ;;  %vm1090_vm12 = vweird.f32 %v3596_v23 }
 0x248   : > { %v1711_v35 = vadd.f32 %v1710_v26, %v1709_v19  ;;  %v1724_v46 = vrot.slane %v1723_v50, 1  ;;  %v1072_v63 = vsub.f32 1.0, %v1071_v45  ;;  %v1064_v19 = vand.u32 2147483647, %v3569_v13 }
 0x249   : > { %v1059_v26 = vadd.f32 %v3587_v62, %v1058_v57  ;;  %v1044_v45 = vadd.f32 %v3585_v59, %v1043_v51  ;;  %vm1080_vm10 = vcmp.eq.f32.partialorder %v1079_v20, 8.507059e+37  ;;  %vm1095_vm14 = vcmp.eq.f32.partialorder %v1094_v49, 8.507059e+37 }
 0x24a   : > { %v3603_v2 = vmul.f32 0.03125, %v1711_v35  ;;  %v1725_v8 = vadd.f32 %v1724_v46, %v1723_v50  ;;  %v1073_v10 = vmul.f32 %v3594_v22, %v1072_v63  ;;  %v1066_v35 = vand.u32 2147483648, %v3569_v13  ;;  %v2756_v13 = vld [vmem:[%s3259_s27 + $0x2] ss:$0 sm:$0xff] }
 0x24b   : > { %v1295_v11 = vpop.f32.mrf.mxu3  ;;  %v1096_v63 = vand.u32 2147483648, %v3596_v23  ;;  %vm3644_vm9 = vcmp.eq.f32.partialorder %v1064_v19, 8.507059e+37  ;;  %v1063_v51 = vsel %vm3640_vm8, %v3587_v62, %v1059_v26 }
 0x24c   : > { %v1726_v5 = vmul.f32 0.03125, %v1725_v8  ;;  %v1727_v60 = vmul.f32 %v3603_v2, %v3603_v2  ;;  %v1074_v15 = vadd.f32 %v3594_v22, %v1073_v10  ;;  %v1051_v10 = vand.u32 2147483648, %v3567_v25 }
 0x24d   : > { %v2773_v58 = vpop.eup %2772  ;;  %v1097_v25 = vor.u32 1.1754944e-38, %v1096_v63  ;;  %v1296_v20 = vadd.f32 %v2756_v13, %v1295_v11 }
 0x24e   : > { %v1728_v14 = vsub.f32 %v1726_v5, %v1727_v60  ;;  %v1086_v17 = vmul.f32 %v2773_v58, %v3596_v23  ;;  %v1078_v52 = vsel %vm3625_vm6, %v3594_v22, %v1074_v15  ;;  %vm1091_vm7 = vweird.f32 %v2773_v58  ;;  %v1677_v60 = vld [vmem:[%s3259_s27 + $0x5] sm:$0x1] }
 0x24f   : > { %v1048_v15 = vsel %vm3652_vm11, %v3585_v59, %v1044_v45  ;;  %v1083_v19 = vsel %vm1080_vm10, %v1082_v43, %v1078_v52  ;;  %vm1092_vm13 = vmor %vm1090_vm12, %vm1091_vm7  ;;  %v1293_v23 = vadd.f32 %v2756_v13, %v3590_v16  ;;  %v2631_v16 = vld [vmem:[%s4078_s4] sm:$0xff] }
 0x250   : > { %v1729_v24 = vmax.f32 %v1728_v14, 0.0  ;;  %v1087_v50 = vsub.f32 1.0, %v1086_v17  ;;  %v1067_v17 = vor.u32 1.1754944e-38, %v1066_v35  ;;  %v1318_v46 = vmul.f32 %v1296_v20, %v1083_v19 }
 0x251   : > { %v1291_v35 = vadd.f32 %v2756_v13, %v3580_v39 }
 0x252   : > { %v1730_v40 = vadd.f32 3.125e-07, %v1729_v24  ;;  %v1088_v8 = vmul.f32 %v2773_v58, %v1087_v50  ;;  %v1052_v50 = vor.u32 1.1754944e-38, %v1051_v10  ;;  %v1068_v62 = vsel %vm3644_vm9, %v1067_v17, %v1063_v51 }
 0x253   : > { %v1297_v57 = vpop.f32.mrf.mxu3  ;;  %v1317_v52 = vmul.f32 %v1293_v23, %v1068_v62 }
 0x254   : > { %2774 = vrsqrt.f32 %v1730_v40  ;;  %v1089_v14 = vadd.f32 %v2773_v58, %v1088_v8  ;;  %v1298_v24 = vadd.f32 %v2756_v13, %v1297_v57  ;;  %v1053_v59 = vsel %vm1050_vm15, %v1052_v50, %v1048_v15  ;;  %v1678_v13 = vld [vmem:[%s3259_s27 + $0x6] sm:$0x1] }
 0x255   : > { %vm1737_vm2 = vweird.f32 %v1730_v40 }
 0x256   : > { %v1093_v21 = vsel %vm1092_vm13, %v2773_v58, %v1089_v14  ;;  %v1316_v58 = vmul.f32 %v1291_v35, %v1053_v59 }
 0x257   : > { %v1098_v26 = vsel %vm1095_vm14, %v1097_v25, %v1093_v21 }
 0x258   : > { %v1319_v8 = vmul.f32 %v1298_v24, %v1098_v26  ;;  %v1320_v10 = vpack.c.bf16 %v1317_v52, %v1316_v58 }
 0x25a   : > { %v2775_v45 = vpop.eup %2774  ;;  %v1321_v63 = vpack.c.bf16 %v1319_v8, %v1318_v46 }
 0x25b   : > { %v1732_v11 = vmul.f32 %v2775_v45, %v1730_v40  ;;  %vm1738_vm1 = vweird.f32 %v2775_v45 }
 0x25c   : > { %1393 = vmatpush.bf16.msra.mxu0 %v1321_v63  ;;  %2655 = vmatpush.bf16.msrb.mxu3 %v1321_v63  ;;  %vm1739_vm3 = vmor %vm1737_vm2, %vm1738_vm1 }
 0x25d   : > { %v1733_v49 = vmul.f32 %v2775_v45, %v1732_v11 }
 0x25f   : > { %v1734_v5 = vmul.f32 0.5, %v1733_v49 }
 0x260   : > { %1394 = vmatpush.bf16.msra.mxu0 %v1320_v10  ;;  %2656 = vmatpush.bf16.msrb.mxu3 %v1320_v10 }
 0x261   : > { %v1735_v39 = vsub.f32 1.5, %v1734_v5 }
 0x263   : > { %v1736_v43 = vmul.f32 %v2775_v45, %v1735_v39  ;;  %2509 = vmatmul.msk.bf16.vlgmr.msra.gmra.mxu0 %vm1362_vm0, %v2631_v16  ;;  %2514 = vmatmul.msk.bf16.vlgmr.msrb.gmra.mxu3 %vm1362_vm0, %v2636_v54  ;;  %v2633_v39 = vld [vmem:[%s4078_s4 + $0x10] sm:$0xff] }
 0x265   : > { %v1740_v57 = vsel %vm1739_vm3, %v2775_v45, %v1736_v43 }
 0x266   : > { %v1741_v22 = vmul.f32 %v1740_v57, %v1677_v60 }
 0x268   : > { %v1742_v51 = vmul.f32 %v1741_v22, %v3603_v2  ;;  %v1744_v14 = vperm.slane %v1741_v22, 0  ;;  %v2632_v2 = vld [vmem:[%s4078_s4 + $0x8] sm:$0xff] }
 0x26a   : > { %v1743_v15 = vsub.f32 %v1678_v13, %v1742_v51  ;;  %v1745_v17 = vmul.f32 %v1744_v14, %v3538_v0  ;;  %v1746_v19 = vmul.f32 %v1744_v14, %v3548_v4  ;;  %v1747_v36 = vmul.f32 %v1744_v14, %v3555_v56  ;;  %v2637_v0 = vld [vmem:[%s4078_s4 + $0x30] sm:$0xff] }
 0x26b   : > { %v1748_v40 = vmul.f32 %v1744_v14, %v3573_v48 }
 0x26c   : > { %v1749_v25 = vperm.slane %v1743_v15, 0 }
 0x26e   : > { %v3685_v20 = vadd.f32 %v1749_v25, %v1745_v17  ;;  %v3687_v21 = vadd.f32 %v1749_v25, %v1746_v19  ;;  %v3689_v24 = vadd.f32 %v1749_v25, %v1747_v36  ;;  %v3691_v50 = vadd.f32 %v1749_v25, %v1748_v40 }
 0x270   : > { %v1754_v4 = vmax.f32 %v3685_v20, 0.0  ;;  %v1755_v56 = vmax.f32 %v3687_v21, 0.0  ;;  %v1756_v48 = vmax.f32 %v3689_v24, 0.0  ;;  %v1757_v62 = vmax.f32 %v3691_v50, 0.0 }
 0x272   : > { %v1889_v26 = vmul.f32 %v1754_v4, %v3553_v55  ;;  %v1890_v23 = vmul.f32 %v1755_v56, %v3551_v61  ;;  %v1891_v46 = vmul.f32 %v1756_v48, %v3559_v12  ;;  %v1892_v8 = vmul.f32 %v1757_v62, %v3571_v29  ;;  %v2638_v29 = vld [vmem:[%s4078_s4 + $0x38] sm:$0xff] }
 0x273   : > { %2510 = vmatmul.msk.bf16.gmra.mxu0 %vm1362_vm0, %v2632_v2  ;;  %2515 = vmatmul.msk.bf16.gmra.mxu3 %vm1362_vm0, %v2637_v0  ;;  %v2634_v2 = vld [vmem:[%s4078_s4 + $0x18] sm:$0xff]  ;;  %v1175_v0 = vpop.f32.mrf.mxu2 }
 0x274   : > { %v1893_v59 = vadd.f32 %v1890_v23, %v1889_v26  ;;  %v1903_v45 = vmul.f32 %v1889_v26, %v1889_v26  ;;  %v1904_v35 = vmul.f32 %v1890_v23, %v1890_v23  ;;  %v1905_v52 = vmul.f32 %v1891_v46, %v1891_v46 }
 0x275   : > { %v1906_v61 = vmul.f32 %v1892_v8, %v1892_v8 }
 0x276   : > { %v1894_v55 = vadd.f32 %v1893_v59, %v1891_v46  ;;  %v1907_v63 = vadd.f32 %v1904_v35, %v1903_v45  ;;  %v1887_v35 = vld [vmem:[%s3259_s27 + $0x9] sm:$0x1] }
 0x278   : > { %v1895_v11 = vadd.f32 %v1894_v55, %v1892_v8  ;;  %v1908_v58 = vadd.f32 %v1907_v63, %v1905_v52  ;;  %v2635_v52 = vld [vmem:[%s4078_s4 + $0x20] sm:$0xff] }
 0x27a   : > { %v1896_v49 = vrot.slane %v1895_v11, 4  ;;  %v1909_v10 = vadd.f32 %v1908_v58, %v1906_v61  ;;  %v1888_v61 = vld [vmem:[%s3259_s27 + $0xa] sm:$0x1] }
 0x27b   : > { %v1177_v45 = vpop.f32.mrf.mxu2 }
 0x27c   : > { %v1897_v12 = vadd.f32 %v1896_v49, %v1895_v11  ;;  %v1910_v5 = vrot.slane %v1909_v10, 4 }
 0x27e   : > { %v1898_v16 = vrot.slane %v1897_v12, 2  ;;  %v1911_v54 = vadd.f32 %v1910_v5, %v1909_v10 }
 0x280   : > { %v1899_v60 = vadd.f32 %v1898_v16, %v1897_v12  ;;  %v1912_v43 = vrot.slane %v1911_v54, 2 }
 0x282   : > { %v1900_v57 = vrot.slane %v1899_v60, 1  ;;  %v1913_v22 = vadd.f32 %v1912_v43, %v1911_v54 }
 0x283   : > { %2511 = vmatmul.msk.bf16.gmra.mxu0 %vm1362_vm0, %v2633_v39  ;;  %2516 = vmatmul.msk.bf16.gmra.mxu3 %vm1362_vm0, %v2638_v29  ;;  %v1180_v5 = vpop.f32.mrf.mxu2 }
 0x284   : > { %v1901_v13 = vadd.f32 %v1900_v57, %v1899_v60  ;;  %v1914_v51 = vrot.slane %v1913_v22, 1 }
 0x286   : > { %v1902_v14 = vmul.f32 0.03125, %v1901_v13  ;;  %v1915_v15 = vadd.f32 %v1914_v51, %v1913_v22 }
 0x288   : > { %v1916_v17 = vmul.f32 0.03125, %v1915_v15  ;;  %v1917_v19 = vmul.f32 %v1902_v14, %v1902_v14 }
 0x28a   : > { %v1918_v36 = vsub.f32 %v1916_v17, %v1917_v19 }
 0x28b   : > { %v1182_v24 = vpop.f32.mrf.mxu2 }
 0x28c   : > { %v1919_v40 = vmax.f32 %v1918_v36, 0.0 }
 0x28e   : > { %v1920_v25 = vadd.f32 1e-05, %v1919_v40 }
 0x290   : > { %2776 = vrsqrt.f32 %v1920_v25  ;;  %vm1927_vm5 = vweird.f32 %v1920_v25 }
 0x293   : > { %2512 = vmatmul.msk.bf16.gmra.mxu0 %vm1362_vm0, %v2634_v2  ;;  %v1185_v50 = vpop.f32.mrf.mxu2 }
 0x296   : > { %v2777_v26 = vpop.eup %2776 }
 0x297   : > { %v1922_v23 = vmul.f32 %v2777_v26, %v1920_v25  ;;  %vm1928_vm4 = vweird.f32 %v2777_v26 }
 0x298   : > { %vm1929_vm6 = vmor %vm1927_vm5, %vm1928_vm4 }
 0x299   : > { %v1923_v46 = vmul.f32 %v2777_v26, %v1922_v23 }
 0x29b   : > { %v1924_v8 = vmul.f32 0.5, %v1923_v46 }
 0x29d   : > { %v1925_v59 = vsub.f32 1.5, %v1924_v8 }
 0x29f   : > { %v1926_v55 = vmul.f32 %v2777_v26, %v1925_v59 }
 0x2a1   : > { %v1930_v63 = vsel %vm1929_vm6, %v2777_v26, %v1926_v55  ;;  %v3752_v26 = vld [vmem:[%s3259_s27 + $0x1] ss:$0 sm:$0xff] }
 0x2a2   : > { %v1931_v11 = vmul.f32 %v1930_v63, %v1887_v35  ;;  %v1178_v23 = vadd.f32 %v3752_v26, %v1177_v45  ;;  %v1176_v59 = vadd.f32 %v3752_v26, %v1175_v0  ;;  %v1181_v35 = vadd.f32 %v3752_v26, %v1180_v5 }
 0x2a3   : > { %2513 = vmatmul.msk.bf16.gmra.mxu0 %vm1362_vm0, %v2635_v52  ;;  %v1186_v45 = vadd.f32 %v3752_v26, %v1185_v50 }
 0x2a4   : > { %v1932_v58 = vmul.f32 %v1931_v11, %v1902_v14  ;;  %v1934_v49 = vperm.slane %v1931_v11, 0  ;;  %v1183_v11 = vadd.f32 %v3752_v26, %v1182_v24 }
 0x2a6   : > { %v1933_v10 = vsub.f32 %v1888_v61, %v1932_v58  ;;  %v1935_v12 = vmul.f32 %v1934_v49, %v1754_v4  ;;  %v1936_v16 = vmul.f32 %v1934_v49, %v1755_v56  ;;  %v1937_v54 = vmul.f32 %v1934_v49, %v1756_v48  ;;  %v1187_v56 = vpop.f32.mrf.mxu2 }
 0x2a7   : > { %v1938_v39 = vmul.f32 %v1934_v49, %v1757_v62  ;;  %v1188_v5 = vadd.f32 %v3752_v26, %v1187_v56 }
 0x2a8   : > { %v1939_v29 = vperm.slane %v1933_v10, 0 }
 0x2aa   : > { %v1940_v60 = vadd.f32 %v1939_v29, %v1935_v12  ;;  %v1941_v43 = vadd.f32 %v1939_v29, %v1936_v16  ;;  %v1942_v57 = vadd.f32 %v1939_v29, %v1937_v54  ;;  %v1943_v22 = vadd.f32 %v1939_v29, %v1938_v39 }
 0x2ac   : > { %v1960_v13 = vadd.f32 %v1940_v60, %v3414_v42  ;;  %v1961_v20 = vadd.f32 %v1941_v43, %v3416_v44  ;;  %v1962_v4 = vadd.f32 %v1942_v57, %v3436_v6  ;;  %v1963_v21 = vadd.f32 %v1943_v22, %v3438_v7 }
 0x2ae   : > { %1980 = vst [vmem:[#allocation3 + $0x8] sm:$0xff] %v1960_v13  ;;  %v1190_v48 = vpop.f32.mrf.mxu2 }
 0x2af   : > { %1981 = vst [vmem:[#allocation3] sm:$0xff] %v1961_v20  ;;  %v1191_v29 = vadd.f32 %v3752_v26, %v1190_v48 }
 0x2b0   : > { %1982 = vst [vmem:[#allocation3 + $0x10] sm:$0xff] %v1962_v4 }
 0x2b1   : > { %1983 = vst [vmem:[#allocation3 + $0x18] sm:$0xff] %v1963_v21 }
 0x2b6   : > { %v1192_v62 = vpop.f32.mrf.mxu2 }
 0x2b7   : > { %v1193_v13 = vadd.f32 %v3752_v26, %v1192_v62 }
 0x2be   : > { %v1195_v14 = vpop.f32.mrf.mxu2 }
 0x2bf   : > { %v1196_v50 = vadd.f32 %v3752_v26, %v1195_v14 }
 0x2c6   : > { %v3747_v42 = vpop.f32.mrf.mxu2 }
 0x2ce   : > { %v1200_v17 = vpop.f32.mrf.mxu2 }
 0x2d6   : > { %v1202_v36 = vpop.f32.mrf.mxu2 }
 0x2de   : > { %v1205_v2 = vpop.f32.mrf.mxu2 }
 0x2e0   : > { %v1396_v51 = vpop.f32.mrf.mxu0 }
 0x2e1   : > { %v3761_v52 = vadd.f32 %v1396_v51, %v1176_v59  ;;  %v1201_v59 = vadd.f32 %v3752_v26, %v1200_v17 }
 0x2e3   : > { %v1534_v0 = vmul.f32 %v3509_v27, %v3761_v52 }
 0x2e5   : > { %v1572_v57 = vmul.f32 %v1534_v0, %v1534_v0 }
 0x2e6   : > { %v1421_v19 = vpop.f32.mrf.mxu3  ;;  %v1207_v61 = vpop.f32.mrf.mxu2 }
 0x2e8   : > { %v1398_v15 = vpop.f32.mrf.mxu0 }
 0x2e9   : > { %v3759_v55 = vadd.f32 %v1398_v15, %v1178_v23 }
 0x2eb   : > { %v1535_v58 = vmul.f32 %v3515_v31, %v3759_v55 }
 0x2ed   : > { %v1573_v54 = vmul.f32 %v1535_v58, %v1535_v58  ;;  %v1550_v20 = vadd.f32 %v1535_v58, %v1534_v0 }
 0x2ee   : > { %v3749_v40 = vpop.f32.mrf.mxu3 }
 0x2ef   : > { %v1588_v24 = vadd.f32 %v1573_v54, %v1572_v57  ;;  %v1206_v57 = vadd.f32 %v3752_v26, %v1205_v2 }
 0x2f0   : > { %v1401_v44 = vpop.f32.mrf.mxu0 }
 0x2f1   : > { %v3763_v63 = vadd.f32 %v1401_v44, %v1181_v35  ;;  %v1210_v44 = vpop.f32.mrf.mxu2 }
 0x2f3   : > { %v1536_v10 = vmul.f32 %v3513_v28, %v3763_v63 }
 0x2f5   : > { %v1574_v22 = vmul.f32 %v1536_v10, %v1536_v10  ;;  %v1551_v56 = vadd.f32 %v1550_v20, %v1536_v10 }
 0x2f6   : > { %v3755_v46 = vpop.f32.mrf.mxu3 }
 0x2f7   : > { %v3818_v2 = vadd.f32 %v3755_v46, %v1206_v57 }
 0x2f8   : > { %v1403_v6 = vpop.f32.mrf.mxu0 }
 0x2f9   : > { %v3769_v49 = vadd.f32 %v1403_v6, %v1183_v11  ;;  %v1589_v6 = vadd.f32 %v1588_v24, %v1574_v22  ;;  %v1546_v46 = vmul.f32 %v3536_v53, %v3818_v2 }
 0x2fb   : > { %v1537_v60 = vmul.f32 %v3520_v34, %v3769_v49 }
 0x2fd   : > { %v1575_v48 = vmul.f32 %v1537_v60, %v1537_v60  ;;  %v1552_v62 = vadd.f32 %v1551_v56, %v1537_v60  ;;  %v3805_v60 = vadd.f32 %v1421_v19, %v1201_v59  ;;  %v1211_v19 = vadd.f32 %v3752_v26, %v1210_v44 }
 0x2fe   : > { %v1428_v39 = vpop.f32.mrf.mxu3 }
 0x2ff   : > { %v1590_v14 = vadd.f32 %v1589_v6, %v1575_v48  ;;  %v1212_v48 = vpop.f32.mrf.mxu2 }
 0x300   : > { %v1406_v7 = vpop.f32.mrf.mxu0 }
 0x301   : > { %v3776_v16 = vadd.f32 %v1406_v7, %v1186_v45  ;;  %v1203_v45 = vadd.f32 %v3752_v26, %v1202_v36  ;;  %v1208_v36 = vadd.f32 %v3752_v26, %v1207_v61 }
 0x303   : > { %v1538_v4 = vmul.f32 %v3511_v18, %v3776_v16  ;;  %v3809_v20 = vadd.f32 %v3749_v40, %v1203_v45 }
 0x305   : > { %v1553_v35 = vadd.f32 %v1552_v62, %v1538_v4  ;;  %v1213_v62 = vadd.f32 %v3752_v26, %v1212_v48 }
 0x306   : > { %v1431_v0 = vpop.f32.mrf.mxu3 }
 0x308   : > { %v1408_v25 = vpop.f32.mrf.mxu0 }
 0x309   : > { %v3781_v43 = vadd.f32 %v1408_v25, %v1188_v5  ;;  %v1576_v25 = vmul.f32 %v1538_v4, %v1538_v4 }
 0x30b   : > { %v1539_v51 = vmul.f32 %v3518_v32, %v3781_v43  ;;  %v1591_v10 = vadd.f32 %v1590_v14, %v1576_v25  ;;  %v3825_v25 = vadd.f32 %v1428_v39, %v1208_v36 }
 0x30d   : > { %v1577_v11 = vmul.f32 %v1539_v51, %v1539_v51 }
 0x30e   : > { %v1433_v44 = vpop.f32.mrf.mxu3 }
 0x30f   : > { %v1592_v17 = vadd.f32 %v1591_v10, %v1577_v11  ;;  %v3829_v11 = vadd.f32 %v1431_v0, %v1211_v19 }
 0x310   : > { %v1411_v8 = vpop.f32.mrf.mxu0 }
 0x311   : > { %v3786_v21 = vadd.f32 %v1411_v8, %v1191_v29  ;;  %v1198_v29 = vadd.f32 %v3752_v26, %v3747_v42  ;;  %v1544_v42 = vmul.f32 %v3533_v33, %v3805_v60 }
 0x313   : > { %v1540_v23 = vmul.f32 %v3522_v37, %v3786_v21 }
 0x315   : > { %v1578_v5 = vmul.f32 %v1540_v23, %v1540_v23 }
 0x317   : > { %v1593_v24 = vadd.f32 %v1592_v17, %v1578_v5  ;;  %v3833_v5 = vadd.f32 %v1433_v44, %v1213_v62 }
 0x318   : > { %v1413_v12 = vpop.f32.mrf.mxu0 }
 0x319   : > { %v3791_v15 = vadd.f32 %v1413_v12, %v1193_v13  ;;  %v1554_v12 = vadd.f32 %v1553_v35, %v1539_v51  ;;  %v1582_v35 = vmul.f32 %v1544_v42, %v1544_v42  ;;  %v1549_v0 = vmul.f32 %v3546_v1, %v3833_v5 }
 0x31b   : > { %v1541_v58 = vmul.f32 %v3526_v38, %v3791_v15  ;;  %v1555_v22 = vadd.f32 %v1554_v12, %v1540_v23  ;;  %v1547_v12 = vmul.f32 %v3543_v9, %v3825_v25 }
 0x31d   : > { %v1579_v13 = vmul.f32 %v1541_v58, %v1541_v58 }
 0x31f   : > { %v1594_v6 = vadd.f32 %v1593_v24, %v1579_v13 }
 0x320   : > { %v1416_v7 = vpop.f32.mrf.mxu0 }
 0x321   : > { %v3795_v8 = vadd.f32 %v1416_v7, %v1196_v50  ;;  %v1556_v50 = vadd.f32 %v1555_v22, %v1541_v58  ;;  %v1545_v7 = vmul.f32 %v3531_v47, %v3809_v20  ;;  %v1585_v22 = vmul.f32 %v1547_v12, %v1547_v12 }
 0x323   : > { %v1542_v54 = vmul.f32 %v3524_v30, %v3795_v8  ;;  %v1583_v10 = vmul.f32 %v1545_v7, %v1545_v7 }
 0x325   : > { %v1580_v56 = vmul.f32 %v1542_v54, %v1542_v54  ;;  %v1557_v40 = vadd.f32 %v1556_v50, %v1542_v54  ;;  %v1584_v54 = vmul.f32 %v1546_v46, %v1546_v46 }
 0x327   : > { %v1595_v23 = vadd.f32 %v1594_v6, %v1580_v56  ;;  %v1587_v56 = vmul.f32 %v1549_v0, %v1549_v0 }
 0x328   : > { %v1418_v4 = vpop.f32.mrf.mxu0 }
 0x329   : > { %v3812_v51 = vadd.f32 %v1418_v4, %v1198_v29  ;;  %v1548_v29 = vmul.f32 %v3541_v3, %v3829_v11 }
 0x32b   : > { %v1543_v61 = vmul.f32 %v3529_v41, %v3812_v51  ;;  %v1586_v4 = vmul.f32 %v1548_v29, %v1548_v29 }
 0x32d   : > { %v1558_v59 = vadd.f32 %v1557_v40, %v1543_v61  ;;  %v1581_v14 = vmul.f32 %v1543_v61, %v1543_v61 }
 0x32f   : > { %v1559_v58 = vadd.f32 %v1558_v59, %v1544_v42  ;;  %v1596_v45 = vadd.f32 %v1595_v23, %v1581_v14 }
 0x331   : > { %v1560_v26 = vadd.f32 %v1559_v58, %v1545_v7  ;;  %v1597_v39 = vadd.f32 %v1596_v45, %v1582_v35 }
 0x333   : > { %v1561_v17 = vadd.f32 %v1560_v26, %v1546_v46  ;;  %v1598_v57 = vadd.f32 %v1597_v39, %v1583_v10 }
 0x335   : > { %v1562_v13 = vadd.f32 %v1561_v17, %v1547_v12  ;;  %v1599_v36 = vadd.f32 %v1598_v57, %v1584_v54 }
 0x337   : > { %v1563_v24 = vadd.f32 %v1562_v13, %v1548_v29  ;;  %v1600_v50 = vadd.f32 %v1599_v36, %v1585_v22  ;;  %v1452_v13 = vld [vmem:[%s3259_s27 + $0x3] sm:$0x1] }
 0x339   : > { %v1564_v48 = vadd.f32 %v1563_v24, %v1549_v0  ;;  %v1601_v42 = vadd.f32 %v1600_v50, %v1586_v4  ;;  %v1453_v50 = vld [vmem:[%s3259_s27 + $0x4] sm:$0x1] }
 0x33b   : > { %v1565_v19 = vrot.slane %v1564_v48, 4  ;;  %v1602_v6 = vadd.f32 %v1601_v42, %v1587_v56 }
 0x33d   : > { %v1566_v40 = vadd.f32 %v1565_v19, %v1564_v48  ;;  %v1603_v61 = vrot.slane %v1602_v6, 4 }
 0x33f   : > { %v1567_v7 = vrot.slane %v1566_v40, 2  ;;  %v1604_v62 = vadd.f32 %v1603_v61, %v1602_v6 }
 0x341   : > { %v1568_v23 = vadd.f32 %v1567_v7, %v1566_v40  ;;  %v1605_v59 = vrot.slane %v1604_v62, 2 }
 0x343   : > { %v1569_v14 = vrot.slane %v1568_v23, 1  ;;  %v1606_v35 = vadd.f32 %v1605_v59, %v1604_v62 }
 0x345   : > { %v1570_v44 = vadd.f32 %v1569_v14, %v1568_v23  ;;  %v1607_v46 = vrot.slane %v1606_v35, 1 }
 0x347   : > { %v1571_v58 = vmul.f32 0.0625, %v1570_v44  ;;  %v1608_v45 = vadd.f32 %v1607_v46, %v1606_v35 }
 0x349   : > { %v1609_v10 = vmul.f32 0.0625, %v1608_v45  ;;  %v1610_v12 = vmul.f32 %v1571_v58, %v1571_v58 }
 0x34b   : > { %v1611_v26 = vsub.f32 %v1609_v10, %v1610_v12 }
 0x34d   : > { %v1612_v39 = vmax.f32 %v1611_v26, 0.0 }
 0x34f   : > { %v1613_v54 = vadd.f32 1e-05, %v1612_v39 }
 0x351   : > { %2778 = vrsqrt.f32 %v1613_v54  ;;  %vm1620_vm8 = vweird.f32 %v1613_v54 }
 0x357   : > { %v2779_v29 = vpop.eup %2778 }
 0x358   : > { %v1615_v17 = vmul.f32 %v2779_v29, %v1613_v54  ;;  %vm1621_vm7 = vweird.f32 %v2779_v29 }
 0x359   : > { %vm1622_vm9 = vmor %vm1620_vm8, %vm1621_vm7 }
 0x35a   : > { %v1616_v57 = vmul.f32 %v2779_v29, %v1615_v17 }
 0x35c   : > { %v1617_v22 = vmul.f32 0.5, %v1616_v57 }
 0x35e   : > { %v1618_v0 = vsub.f32 1.5, %v1617_v22 }
 0x360   : > { %v1619_v36 = vmul.f32 %v2779_v29, %v1618_v0 }
 0x362   : > { %v1623_v4 = vsel %vm1622_vm9, %v2779_v29, %v1619_v36 }
 0x363   : > { %v1624_v24 = vmul.f32 %v1623_v4, %v1452_v13 }
 0x365   : > { %v1625_v56 = vmul.f32 %v1624_v24, %v1571_v58  ;;  %v3841_v42 = vperm.slane %v1624_v24, 0 }
 0x367   : > { %v1626_v48 = vsub.f32 %v1453_v50, %v1625_v56  ;;  %v1628_v19 = vmul.f32 %v3841_v42, %v3761_v52  ;;  %v1629_v6 = vmul.f32 %v3841_v42, %v3759_v55  ;;  %v1630_v62 = vmul.f32 %v3841_v42, %v3763_v63 }
 0x368   : > { %v1631_v23 = vmul.f32 %v3841_v42, %v3769_v49  ;;  %v1632_v14 = vmul.f32 %v3841_v42, %v3776_v16  ;;  %v1633_v63 = vmul.f32 %v3841_v42, %v3781_v43  ;;  %v1634_v16 = vmul.f32 %v3841_v42, %v3786_v21 }
 0x369   : > { %v3847_v40 = vperm.slane %v1626_v48, 0  ;;  %v1635_v43 = vmul.f32 %v3841_v42, %v3791_v15  ;;  %v1636_v54 = vmul.f32 %v3841_v42, %v3795_v8  ;;  %v1637_v22 = vmul.f32 %v3841_v42, %v3812_v51 }
 0x36a   : > { %v1638_v24 = vmul.f32 %v3841_v42, %v3805_v60 }
 0x36b   : > { %v3850_v61 = vadd.f32 %v3847_v40, %v1628_v19  ;;  %v3853_v7 = vadd.f32 %v3847_v40, %v1629_v6  ;;  %v3860_v59 = vadd.f32 %v3847_v40, %v1630_v62  ;;  %v3867_v35 = vadd.f32 %v3847_v40, %v1631_v23 }
 0x36c   : > { %v3870_v44 = vadd.f32 %v3847_v40, %v1632_v14  ;;  %v3884_v45 = vadd.f32 %v3847_v40, %v1633_v63  ;;  %v3890_v12 = vadd.f32 %v3847_v40, %v1634_v16  ;;  %v3899_v29 = vadd.f32 %v3847_v40, %v1635_v43 }
 0x36d   : > { %v1661_v52 = vmax.f32 %v3850_v61, 0.0  ;;  %v1662_v55 = vmax.f32 %v3853_v7, 0.0  ;;  %v1663_v49 = vmax.f32 %v3860_v59, 0.0  ;;  %v1664_v10 = vmax.f32 %v3867_v35, 0.0 }
 0x36e   : > { %v1666_v15 = vmax.f32 %v3884_v45, 0.0  ;;  %v1667_v0 = vmax.f32 %v3890_v12, 0.0  ;;  %v1668_v51 = vmax.f32 %v3899_v29, 0.0  ;;  %v3926_v6 = vadd.f32 %v3847_v40, %v1638_v24  ;;  %v2784_v45 = vld [vmem:[#allocation2 + $0x58] sm:$0xff] }
 0x36f   : > { %v1760_v46 = vmul.f32 %v1661_v52, %v3509_v27  ;;  %v1761_v58 = vmul.f32 %v1662_v55, %v3515_v31  ;;  %v1665_v27 = vmax.f32 %v3870_v44, 0.0  ;;  %v1762_v31 = vmul.f32 %v1663_v49, %v3513_v28  ;;  %v2785_v29 = vld [vmem:[#allocation2 + $0x18] sm:$0xff] }
 0x370   : > { %v1763_v17 = vmul.f32 %v1664_v10, %v3520_v34  ;;  %v3908_v28 = vadd.f32 %v3847_v40, %v1636_v54  ;;  %v3917_v34 = vadd.f32 %v3847_v40, %v1637_v22  ;;  %v1765_v50 = vmul.f32 %v1666_v15, %v3518_v32 }
 0x371   : > { %v1776_v26 = vadd.f32 %v1761_v58, %v1760_v46  ;;  %v1798_v39 = vmul.f32 %v1760_v46, %v1760_v46  ;;  %v1799_v21 = vmul.f32 %v1761_v58, %v1761_v58  ;;  %v1764_v8 = vmul.f32 %v1665_v27, %v3511_v18 }
 0x372   : > { %v1800_v36 = vmul.f32 %v1762_v31, %v1762_v31  ;;  %v1801_v48 = vmul.f32 %v1763_v17, %v1763_v17  ;;  %v1639_v18 = vmul.f32 %v3841_v42, %v3809_v20  ;;  %v1669_v60 = vmax.f32 %v3908_v28, 0.0 }
 0x373   : > { %v1777_v57 = vadd.f32 %v1776_v26, %v1762_v31  ;;  %v1814_v4 = vadd.f32 %v1799_v21, %v1798_v39  ;;  %v1766_v62 = vmul.f32 %v1667_v0, %v3522_v37  ;;  %v1802_v14 = vmul.f32 %v1764_v8, %v1764_v8 }
 0x374   : > { %v1640_v32 = vmul.f32 %v3841_v42, %v3818_v2  ;;  %v3935_v46 = vadd.f32 %v3847_v40, %v1639_v18  ;;  %v1670_v20 = vmax.f32 %v3917_v34, 0.0  ;;  %v1767_v58 = vmul.f32 %v1668_v51, %v3526_v38 }
 0x375   : > { %v1778_v13 = vadd.f32 %v1777_v57, %v1763_v17  ;;  %v1815_v19 = vadd.f32 %v1814_v4, %v1800_v36  ;;  %v1803_v43 = vmul.f32 %v1765_v50, %v1765_v50  ;;  %v1641_v37 = vmul.f32 %v3841_v42, %v3825_v25 }
 0x376   : > { %v3944_v26 = vadd.f32 %v3847_v40, %v1640_v32  ;;  %v1671_v2 = vmax.f32 %v3926_v6, 0.0  ;;  %v1768_v39 = vmul.f32 %v1669_v60, %v3524_v30  ;;  %v1804_v54 = vmul.f32 %v1766_v62, %v1766_v62 }
 0x377   : > { %v1779_v56 = vadd.f32 %v1778_v13, %v1764_v8  ;;  %v1816_v63 = vadd.f32 %v1815_v19, %v1801_v48  ;;  %v1642_v38 = vmul.f32 %v3841_v42, %v3829_v11  ;;  %v3953_v57 = vadd.f32 %v3847_v40, %v1641_v37 }
 0x378   : > { %v1672_v25 = vmax.f32 %v3935_v46, 0.0  ;;  %v1769_v22 = vmul.f32 %v1670_v20, %v3529_v41  ;;  %v1805_v13 = vmul.f32 %v1767_v58, %v1767_v58  ;;  %v1643_v30 = vmul.f32 %v3841_v42, %v3833_v5  ;;  %v2789_v46 = vld [vmem:[#allocation2 + $0x48] sm:$0xff] }
 0x379   : > { %v1780_v23 = vadd.f32 %v1779_v56, %v1765_v50  ;;  %v1817_v31 = vadd.f32 %v1816_v63, %v1802_v14  ;;  %v3962_v4 = vadd.f32 %v3847_v40, %v1642_v38  ;;  %v1673_v11 = vmax.f32 %v3944_v26, 0.0 }
 0x37a   : > { %v1770_v24 = vmul.f32 %v1671_v2, %v3533_v33  ;;  %v1806_v56 = vmul.f32 %v1768_v39, %v1768_v39  ;;  %v3969_v41 = vadd.f32 %v3847_v40, %v1643_v30  ;;  %v1674_v19 = vmax.f32 %v3953_v57, 0.0 }
 0x37b   : > { %v1781_v16 = vadd.f32 %v1780_v23, %v1766_v62  ;;  %v1818_v17 = vadd.f32 %v1817_v31, %v1803_v43  ;;  %v1771_v5 = vmul.f32 %v1672_v25, %v3531_v47  ;;  %v1807_v18 = vmul.f32 %v1769_v22, %v1769_v22 }
 0x37c   : > { %v1675_v23 = vmax.f32 %v3962_v4, 0.0  ;;  %v1772_v33 = vmul.f32 %v1673_v11, %v3536_v53  ;;  %v1808_v63 = vmul.f32 %v1770_v24, %v1770_v24  ;;  %v1676_v40 = vmax.f32 %v3969_v41, 0.0  ;;  %v2793_v4 = vld [vmem:[#allocation2 + $0x38] sm:$0xff] }
 0x37d   : > { %v1782_v21 = vadd.f32 %v1781_v16, %v1767_v58  ;;  %v1819_v36 = vadd.f32 %v1818_v17, %v1804_v54  ;;  %v1773_v58 = vmul.f32 %v1674_v19, %v3543_v9  ;;  %v1809_v47 = vmul.f32 %v1771_v5, %v1771_v5  ;;  %v2796_v41 = vld [vmem:[#allocation2 + $0x78] sm:$0xff] }
 0x37e   : > { %v1774_v31 = vmul.f32 %v1675_v23, %v3541_v3  ;;  %v1775_v53 = vmul.f32 %v1676_v40, %v3546_v1 }
 0x37f   : > { %v1783_v8 = vadd.f32 %v1782_v21, %v1768_v39  ;;  %v1820_v48 = vadd.f32 %v1819_v36, %v1805_v13  ;;  %v1810_v39 = vmul.f32 %v1772_v33, %v1772_v33  ;;  %v1811_v17 = vmul.f32 %v1773_v58, %v1773_v58 }
 0x380   : > { %v1813_v36 = vmul.f32 %v1775_v53, %v1775_v53 }
 0x381   : > { %v1784_v50 = vadd.f32 %v1783_v8, %v1769_v22  ;;  %v1821_v62 = vadd.f32 %v1820_v48, %v1806_v56  ;;  %v1812_v8 = vmul.f32 %v1774_v31, %v1774_v31 }
 0x383   : > { %v1785_v42 = vadd.f32 %v1784_v50, %v1770_v24  ;;  %v1822_v32 = vadd.f32 %v1821_v62, %v1807_v18 }
 0x385   : > { %v1786_v14 = vadd.f32 %v1785_v42, %v1771_v5  ;;  %v1823_v43 = vadd.f32 %v1822_v32, %v1808_v63 }
 0x387   : > { %v1787_v16 = vadd.f32 %v1786_v14, %v1772_v33  ;;  %v1824_v21 = vadd.f32 %v1823_v43, %v1809_v47 }
 0x389   : > { %v1788_v37 = vadd.f32 %v1787_v16, %v1773_v58  ;;  %v1825_v38 = vadd.f32 %v1824_v21, %v1810_v39 }
 0x38b   : > { %v1789_v54 = vadd.f32 %v1788_v37, %v1774_v31  ;;  %v1826_v9 = vadd.f32 %v1825_v38, %v1811_v17 }
 0x38d   : > { %v1790_v22 = vadd.f32 %v1789_v54, %v1775_v53  ;;  %v1827_v30 = vadd.f32 %v1826_v9, %v1812_v8  ;;  %v1758_v54 = vld [vmem:[%s3259_s27 + $0x7] sm:$0x1]  ;;  %v1759_v8 = vld [vmem:[%s3259_s27 + $0x8] sm:$0x1] }
 0x38f   : > { %v1791_v13 = vrot.slane %v1790_v22, 4  ;;  %v1828_v50 = vadd.f32 %v1827_v30, %v1813_v36 }
 0x391   : > { %v1792_v24 = vadd.f32 %v1791_v13, %v1790_v22  ;;  %v1829_v3 = vrot.slane %v1828_v50, 4 }
 0x393   : > { %v1793_v56 = vrot.slane %v1792_v24, 2  ;;  %v1830_v5 = vadd.f32 %v1829_v3, %v1828_v50 }
 0x395   : > { %v1794_v48 = vadd.f32 %v1793_v56, %v1792_v24  ;;  %v1831_v18 = vrot.slane %v1830_v5, 2 }
 0x397   : > { %v1795_v42 = vrot.slane %v1794_v48, 1  ;;  %v1832_v33 = vadd.f32 %v1831_v18, %v1830_v5 }
 0x399   : > { %v1796_v62 = vadd.f32 %v1795_v42, %v1794_v48  ;;  %v1833_v14 = vrot.slane %v1832_v33, 1 }
 0x39b   : > { %v1797_v1 = vmul.f32 0.0625, %v1796_v62  ;;  %v1834_v63 = vadd.f32 %v1833_v14, %v1832_v33  ;;  %v2783_v62 = vld [vmem:[#allocation2] sm:$0xff] }
 0x39d   : > { %v1836_v32 = vmul.f32 %v1797_v1, %v1797_v1  ;;  %v1835_v58 = vmul.f32 0.0625, %v1834_v63 }
 0x39f   : > { %v1837_v16 = vsub.f32 %v1835_v58, %v1836_v32  ;;  %v2787_v58 = vld [vmem:[#allocation2 + $0x68] sm:$0xff] }
 0x3a1   : > { %v1838_v47 = vmax.f32 %v1837_v16, 0.0 }
 0x3a3   : > { %v1839_v43 = vadd.f32 1e-05, %v1838_v47 }
 0x3a5   : > { %2780 = vrsqrt.f32 %v1839_v43  ;;  %vm1846_vm11 = vweird.f32 %v1839_v43 }
 0x3ab   : > { %v2781_v31 = vpop.eup %2780 }
 0x3ac   : > { %v1841_v37 = vmul.f32 %v2781_v31, %v1839_v43  ;;  %vm1847_vm10 = vweird.f32 %v2781_v31 }
 0x3ad   : > { %vm1848_vm12 = vmor %vm1846_vm11, %vm1847_vm10 }
 0x3ae   : > { %v1842_v39 = vmul.f32 %v2781_v31, %v1841_v37 }
 0x3b0   : > { %v1843_v21 = vmul.f32 0.5, %v1842_v39  ;;  %v2790_v39 = vld [vmem:[#allocation2 + $0x40] sm:$0xff] }
 0x3b2   : > { %v1844_v53 = vsub.f32 1.5, %v1843_v21 }
 0x3b4   : > { %v1845_v17 = vmul.f32 %v2781_v31, %v1844_v53  ;;  %v2791_v53 = vld [vmem:[#allocation2 + $0x20] sm:$0xff] }
 0x3b6   : > { %v1849_v38 = vsel %vm1848_vm12, %v2781_v31, %v1845_v17 }
 0x3b7   : > { %v1850_v22 = vmul.f32 %v1849_v38, %v1758_v54  ;;  %v2792_v54 = vld [vmem:[#allocation2 + $0x10] sm:$0xff] }
 0x3b9   : > { %v1851_v9 = vmul.f32 %v1850_v22, %v1797_v1  ;;  %v1853_v36 = vperm.slane %v1850_v22, 0  ;;  %v2786_v1 = vld [vmem:[#allocation2 + $0x50] sm:$0xff]  ;;  %v2794_v22 = vld [vmem:[#allocation2 + $0x60] sm:$0xff] }
 0x3bb   : > { %v1852_v13 = vsub.f32 %v1759_v8, %v1851_v9  ;;  %v1854_v30 = vmul.f32 %v1853_v36, %v1661_v52  ;;  %v1855_v24 = vmul.f32 %v1853_v36, %v1662_v55  ;;  %v1856_v50 = vmul.f32 %v1853_v36, %v1663_v49  ;;  %v2795_v9 = vld [vmem:[#allocation2 + $0x70] sm:$0xff] }
 0x3bc   : > { %v1857_v3 = vmul.f32 %v1853_v36, %v1664_v10  ;;  %v1858_v48 = vmul.f32 %v1853_v36, %v1665_v27  ;;  %v1859_v61 = vmul.f32 %v1853_v36, %v1666_v15  ;;  %v1860_v7 = vmul.f32 %v1853_v36, %v1667_v0  ;;  %v2782_v10 = vld [vmem:[#allocation2 + $0x30] sm:$0xff] }
 0x3bd   : > { %v1870_v56 = vperm.slane %v1852_v13, 0  ;;  %v1861_v59 = vmul.f32 %v1853_v36, %v1668_v51  ;;  %v1862_v35 = vmul.f32 %v1853_v36, %v1669_v60  ;;  %v1863_v12 = vmul.f32 %v1853_v36, %v1670_v20 }
 0x3be   : > { %v1864_v28 = vmul.f32 %v1853_v36, %v1671_v2  ;;  %v1865_v63 = vmul.f32 %v1853_v36, %v1672_v25  ;;  %v1866_v20 = vmul.f32 %v1853_v36, %v1673_v11  ;;  %v2788_v2 = vld [vmem:[#allocation2 + $0x8] sm:$0xff]  ;;  %v1867_v47 = vmul.f32 %v1853_v36, %v1674_v19 }
 0x3bf   : > { %v1871_v5 = vadd.f32 %v1870_v56, %v1854_v30  ;;  %v1872_v42 = vadd.f32 %v1870_v56, %v1855_v24  ;;  %v1873_v18 = vadd.f32 %v1870_v56, %v1856_v50  ;;  %v1874_v52 = vadd.f32 %v1870_v56, %v1857_v3 }
 0x3c0   : > { %v1875_v55 = vadd.f32 %v1870_v56, %v1858_v48  ;;  %v1876_v49 = vadd.f32 %v1870_v56, %v1859_v61  ;;  %v1877_v44 = vadd.f32 %v1870_v56, %v1860_v7  ;;  %v1878_v0 = vadd.f32 %v1870_v56, %v1861_v59 }
 0x3c1   : > { %v4009_v27 = vadd.f32 %v2782_v10, %v1871_v5  ;;  %v4011_v33 = vadd.f32 %v2783_v62, %v1872_v42  ;;  %v4013_v15 = vadd.f32 %v2784_v45, %v1873_v18  ;;  %v4017_v51 = vadd.f32 %v2785_v29, %v1874_v52 }
 0x3c2   : > { %v1879_v60 = vadd.f32 %v1870_v56, %v1862_v35  ;;  %v4021_v14 = vadd.f32 %v2786_v1, %v1875_v55  ;;  %v1880_v32 = vadd.f32 %v1870_v56, %v1863_v12  ;;  %v4026_v34 = vadd.f32 %v2787_v58, %v1876_v49 }
 0x3c3   : > { %1964 = vst [vmem:[#allocation2 + $0x30] sm:$0xff] %v4009_v27  ;;  %v1881_v6 = vadd.f32 %v1870_v56, %v1864_v28  ;;  %v1950_v16 = vadd.f32 %v2788_v2, %v1877_v44  ;;  %v1882_v43 = vadd.f32 %v1870_v56, %v1865_v63  ;;  %v1951_v25 = vadd.f32 %v2789_v46, %v1878_v0 }
 0x3c4   : > { %1965 = vst [vmem:[#allocation2] sm:$0xff] %v4011_v33  ;;  %v1868_v31 = vmul.f32 %v1853_v36, %v1675_v23  ;;  %v1883_v37 = vadd.f32 %v1870_v56, %v1866_v20  ;;  %v1952_v26 = vadd.f32 %v2790_v39, %v1879_v60  ;;  %v1869_v11 = vmul.f32 %v1853_v36, %v1676_v40  ;;  %v2797_v36 = vld [vmem:[#allocation2 + $0x28] sm:$0xff] }
 0x3c5   : > { %1966 = vst [vmem:[#allocation2 + $0x58] sm:$0xff] %v4013_v15  ;;  %v1884_v21 = vadd.f32 %v1870_v56, %v1867_v47  ;;  %v1953_v57 = vadd.f32 %v2791_v53, %v1880_v32  ;;  %v1954_v17 = vadd.f32 %v2792_v54, %v1881_v6  ;;  %v1955_v23 = vadd.f32 %v2793_v4, %v1882_v43 }
 0x3c6   : > { %1967 = vst [vmem:[#allocation2 + $0x18] sm:$0xff] %v4017_v51  ;;  %v1885_v19 = vadd.f32 %v1870_v56, %v1868_v31  ;;  %v1886_v38 = vadd.f32 %v1870_v56, %v1869_v11  ;;  %v1956_v8 = vadd.f32 %v2794_v22, %v1883_v37 }
 0x3c7   : > { %1968 = vst [vmem:[#allocation2 + $0x50] sm:$0xff] %v4021_v14  ;;  %v1957_v13 = vadd.f32 %v2795_v9, %v1884_v21 }
 0x3c8   : > { %1969 = vst [vmem:[#allocation2 + $0x68] sm:$0xff] %v4026_v34  ;;  %v1958_v40 = vadd.f32 %v2796_v41, %v1885_v19  ;;  %v1959_v30 = vadd.f32 %v2797_v36, %v1886_v38 }
 0x3c9   : > { %1970 = vst [vmem:[#allocation2 + $0x8] sm:$0xff] %v1950_v16 }
 0x3ca   : > { %1971 = vst [vmem:[#allocation2 + $0x48] sm:$0xff] %v1951_v25 }
 0x3cb   : > { %1972 = vst [vmem:[#allocation2 + $0x40] sm:$0xff] %v1952_v26 }
 0x3cc   : > { %1973 = vst [vmem:[#allocation2 + $0x20] sm:$0xff] %v1953_v57 }
 0x3cd   : > { %1974 = vst [vmem:[#allocation2 + $0x10] sm:$0xff] %v1954_v17 }
 0x3ce   : > { %1975 = vst [vmem:[#allocation2 + $0x38] sm:$0xff] %v1955_v23  ;;  %1987 = sbr.rel (%p2517_p1) target bundleno = 1412 (0x584), region = 104 }
 0x3cf   : > { %1976 = vst [vmem:[#allocation2 + $0x60] sm:$0xff] %v1956_v8 }
 0x3d0   : > { %1977 = vst [vmem:[#allocation2 + $0x70] sm:$0xff] %v1957_v13 }
 0x3d1   : > { %1978 = vst [vmem:[#allocation2 + $0x78] sm:$0xff] %v1958_v40 }
 0x3d2   : > { %1979 = vst [vmem:[#allocation2 + $0x28] sm:$0xff] %v1959_v30 }
 0x3d3   : > { %v1996_v24 = vpack.c.bf16 %v1959_v30, %v1958_v40  ;;  %v2646_v50 = vld [vmem:[#allocation10 + $0x38] sm:$0xff]  ;;  %v1995_v56 = vpack.c.bf16 %v1957_v13, %v1956_v8  ;;  %v2645_v3 = vld [vmem:[#allocation10 + $0x30] sm:$0xff]  ;;  %v1994_v48 = vpack.c.bf16 %v1955_v23, %v1954_v17  ;;  %v2644_v5 = vld [vmem:[#allocation10 + $0x28] sm:$0xff]  ;;  %v1993_v42 = vpack.c.bf16 %v1953_v57, %v1952_v26 }
 0x3d4   : > { %2079 = vmatpush.bf16.msra.mxu1 %v2646_v50  ;;  %v2643_v18 = vld [vmem:[#allocation10 + $0x20] sm:$0xff]  ;;  %v1992_v61 = vpack.c.bf16 %v1951_v25, %v1950_v16  ;;  %v2642_v52 = vld [vmem:[#allocation10 + $0x18] sm:$0xff]  ;;  %v1991_v7 = vpack.c.bf16 %v4026_v34, %v4021_v14  ;;  %v2641_v55 = vld [vmem:[#allocation10 + $0x10] sm:$0xff]  ;;  %v1990_v59 = vpack.c.bf16 %v4017_v51, %v4013_v15  ;;  %v1989_v49 = vpack.c.bf16 %v4011_v33, %v4009_v27 }
 0x3d5   : > { %1997 = vmatpush.bf16.msra.mxu0 %v1996_v24  ;;  %v2640_v35 = vld [vmem:[#allocation10 + $0x8] sm:$0xff]  ;;  %v1988_v44 = vld [vmem:[%s4079_s5] sm:$0x1]  ;;  %v2639_v10 = vld [vmem:[#allocation10] sm:$0xff] }
 0x3d6   : > { %v2654_v62 = vld [vmem:[#allocation11 + $0x38] sm:$0xff]  ;;  %v2653_v45 = vld [vmem:[#allocation11 + $0x30] sm:$0xff]  ;;  %v2652_v15 = vld [vmem:[#allocation11 + $0x28] sm:$0xff] }
 0x3d7   : > { %2162 = vmatpush.bf16.msra.mxu2 %v2654_v62  ;;  %v2651_v12 = vld [vmem:[#allocation11 + $0x20] sm:$0xff]  ;;  %v2650_v0 = vld [vmem:[#allocation11 + $0x18] sm:$0xff]  ;;  %v2649_v27 = vld [vmem:[#allocation11 + $0x10] sm:$0xff] }
 0x3d8   : > { %2080 = vmatpush.bf16.msra.mxu1 %v2645_v3  ;;  %v2648_v28 = vld [vmem:[#allocation11 + $0x8] sm:$0xff]  ;;  %v2647_v60 = vld [vmem:[#allocation11] sm:$0xff]  ;;  %v2798_v1 = vld [vmem:[%s4085_s11] ss:$0 sm:$0xff] }
 0x3d9   : > { %1998 = vmatpush.bf16.msra.mxu0 %v1995_v56  ;;  %v2799_v20 = vld [vmem:[%s4087_s13] ss:$0 sm:$0xff] }
 0x3db   : > { %2163 = vmatpush.bf16.msra.mxu2 %v2653_v45 }
 0x3dc   : > { %2081 = vmatpush.bf16.msra.mxu1 %v2644_v5 }
 0x3dd   : > { %1999 = vmatpush.bf16.msra.mxu0 %v1994_v48 }
 0x3df   : > { %2164 = vmatpush.bf16.msra.mxu2 %v2652_v15 }
 0x3e0   : > { %2082 = vmatpush.bf16.msra.mxu1 %v2643_v18 }
 0x3e1   : > { %2000 = vmatpush.bf16.msra.mxu0 %v1993_v42 }
 0x3e3   : > { %2165 = vmatpush.bf16.msra.mxu2 %v2651_v12 }
 0x3e4   : > { %2083 = vmatpush.bf16.msra.mxu1 %v2642_v52 }
 0x3e5   : > { %2001 = vmatpush.bf16.msra.mxu0 %v1992_v61 }
 0x3e7   : > { %2166 = vmatpush.bf16.msra.mxu2 %v2650_v0 }
 0x3e8   : > { %2084 = vmatpush.bf16.msra.mxu1 %v2641_v55 }
 0x3e9   : > { %2002 = vmatpush.bf16.msra.mxu0 %v1991_v7 }
 0x3eb   : > { %2167 = vmatpush.bf16.msra.mxu2 %v2649_v27 }
 0x3ec   : > { %2085 = vmatpush.bf16.msra.mxu1 %v2640_v35 }
 0x3ed   : > { %2003 = vmatpush.bf16.msra.mxu0 %v1990_v59 }
 0x3ef   : > { %2168 = vmatpush.bf16.msra.mxu2 %v2648_v28 }
 0x3f0   : > { %2086 = vmatpush.bf16.msra.mxu1 %v2639_v10 }
 0x3f1   : > { %2004 = vmatpush.bf16.msra.mxu0 %v1989_v49 }
 0x3f3   : > { %2169 = vmatpush.bf16.msra.mxu2 %v2647_v60 }
 0x3f4   : > { %2005 = vmatmul.bf16.vlgmr.msra.gmra.mxu0 %v1988_v44 }
 0x471   : > { %v2006_v33 = vpop.f32.mrf.mxu0 }
 0x472   : > { %v2010_v29 = vpack.c.bf16 %v2006_v33, %v2006_v33 }
 0x474   : > { %2087 = vmatmul.bf16.vlgmr.msra.gmra.mxu1 %v2010_v29 }
 0x479   : > { %v2008_v51 = vpop.f32.mrf.mxu0 }
 0x4f1   : > { %v2088_v14 = vpop.f32.mrf.mxu1 }
 0x4f2   : > { %v2089_v63 = vadd.f32 %v2798_v1, %v2088_v14 }
 0x4f4   : > { %v2092_v32 = vmax.f32 %v2089_v63, 0.0 }
 0x4f6   : > { %v2093_v58 = vpack.c.bf16 %v2092_v32, %v2092_v32 }
 0x4f8   : > { %2170 = vmatmul.bf16.vlgmr.msra.gmra.mxu2 %v2093_v58 }
 0x4f9   : > { %v2090_v34 = vpop.f32.mrf.mxu1 }
 0x57b   : > { %v2171_v6 = vpop.f32.mrf.mxu2 }
 0x57c   : > { %v2172_v2 = vadd.f32 %v2799_v20, %v2171_v6 }
 0x57e   : > { %2175 = vst [vmem:[#allocation13] sm:$0x3] %v2172_v2 }
 0x583   : > { %v2173_v16 = vpop.f32.mrf.mxu2 }
 0x584 PF: > { %p2708_p4 = scmp.eq.s32.totalorder %s3138_s17, 4  ;;  %s3043_s1 = smov [#allocation13]  }
 0x585   : > { %s2182_s29 = sshll.u32 %s3043_s1, 4  ;;  %s4115_s14 = sld [smem:[#allocation25_spill]]  ;;  %s2183_s29 = int_to_ptr.vmem [resolvable:$true] %s2182_s29 }
 0x58b   : > { %s2184_s22 = sshll.u32 %s4115_s14, 4  ;;  %s2185_s22 = int_to_ptr.hbm [resolvable:$true] %s2184_s22 }
 0x58c   : > { %2679 = dma.vmem_to_hbm [thread:$0]  (%p2708_p4), %s2183_s29, 32, %s2185_s22, [#allocation6]  }
 0x58d   : > { %3015 = dma.done.wait (%p2708_p4), [#allocation6], 32  }
 0x58e   : > { %3017 = vsyncadd (%p2708_p4), [#allocation6], 4294967264 }
 0x58f PF: > { %s4116_s25 = sld [smem:[#allocation20_spill]]  ;;  %p25_p5 = scmp.ge.s32.totalorder %s3193_s26, 7  }
 0x590   : > { %s4117_s29 = smov %s3024_s30  ;;  %s4118_s30 = smov %s3028_s15 }
 0x591   : > { %s4120_s16 = smov %s3193_s26  ;;  %27 = sbr.rel (!%p25_p5) target bundleno = 11 (0xb), region = 139 }
 0x595   : > { %s4119_s15 = smov %s4116_s25 }
 0x596   :  { %2198 = vsyncpa [#allocation5], 1 }
 0x597   :  { %2200 = vsyncpa [#allocation5 + $0x1], 1 }
 0x598   :  { %2201 = vsyncpa [#allocation8], 1 }
 0x599   :  { %2202 = vsyncpa [#allocation12], 1 }
 0x59a   :  { %2203 = vsyncpa [#allocation6], 1 }
 0x59b   :  { %2205 = vsyncpa [#allocation6 + $0x1], 1 }

</bundles_post_ra>
